<compile_context>
chip_gen: v5e
topology: v5e:2x2
jax: 0.10.0
libtpu: 0.0.40
codegen_flags: <defaults>
</compile_context>

<pallas_src>
import numpy as np
import jax
import jax.numpy as jnp
from jax.experimental import pallas as pl
from jax.experimental.pallas import tpu as pltpu


def _round_up(x, m):
    return -(-x // m) * m


# ----------------------------------------------------------------------------
# Weight packing (pure glue): PyTorch layouts -> tap-major bf16 matmul matrices
# with both channel axes zero-padded to CB (multiple of 8).
# ----------------------------------------------------------------------------
def _pack_conv3(w_oihw, CB):
    """(O,I,3,3) conv weight -> (CB, 9*CB) tap-major matrix."""
    O, I, K, _ = w_oihw.shape
    w = jnp.transpose(w_oihw, (0, 2, 3, 1)).reshape(O, K * K, I)
    w = jnp.pad(w, ((0, CB - O), (0, 0), (0, CB - I)))
    return w.reshape(CB, K * K * CB)


def _pack_up_phases(w_iokk, CB):
    """(I,O,6,6) ConvTranspose2d weight -> (4, CB, 9*CB) sub-pixel 3x3 weights.

    Phase (s,t): out[o, 2a+s, 2b+t] = sum_{u,v,i} x_pad1[i, a+u, b+v] *
                                       w[i, o, s+4-2u, t+4-2v]
    """
    mats = []
    for s in range(2):
        for t in range(2):
            w_sub = w_iokk[:, :, s::2, t::2][:, :, ::-1, ::-1]          # (I,O,3,3)
            O, I = w_sub.shape[1], w_sub.shape[0]
            w_sub = jnp.transpose(w_sub, (1, 2, 3, 0)).reshape(O, 9, I)
            w_sub = jnp.pad(w_sub, ((0, CB - O), (0, 0), (0, CB - I)))
            mats.append(w_sub.reshape(CB, 9 * CB))
    return jnp.stack(mats, axis=0)


def _pad_bias(b, CB):
    return jnp.pad(b, (0, CB - b.shape[0])).reshape(CB, 1)


# ----------------------------------------------------------------------------
# The fused Pallas kernel: whole MaskBranchDownUp forward, NB images/grid step.
# Layout: a (CB, H, W) image lives as (CB, LHI) rows of width Wp=W+2 (last two
# columns don't-care) plus zero lane slack >= 2*(Wp+1); NB images are stacked
# along the lane axis (per-image slack prevents cross-image roll leakage).
# ----------------------------------------------------------------------------
def _make_kernel(CB, H, W, Wp, L):
    f32, bf16 = jnp.float32, jnp.bfloat16

    def kernel(x_ref, w3_ref, b3_ref, wup_ref, bup_ref, w1_ref, b1_ref,
               mhi_ref, mev_ref, o_ref):
        mhi = mhi_ref[...]                      # (1, L) valid-pixel mask
        mev = mev_ref[...]                      # (1, L) even-row/even-col mask

        def conv3x3(a, w_bf, b, dil, act=None):
            """3x3 'same' conv (dilation `dil`) in the flat layout, one MXU dot.

            a: (CB, L) f32, w_bf: (CB, 9*CB) bf16 (tap-major), b: (CB,1) f32|None.
            Rolls of the masked image synthesize the zero padding; taps are
            concatenated in registers (no VMEM scratch).
            """
            shift = dil * (Wp + 1)
            xpv = pltpu.roll(a * mhi, shift, axis=1)
            taps = []
            for t in range(9):
                off = dil * ((t // 3) * Wp + (t % 3))
                taps.append(xpv if off == 0 else pltpu.roll(xpv, L - off, axis=1))
            P = jnp.concatenate(taps, axis=0).astype(bf16)        # (9*CB, L)
            y = jnp.dot(w_bf, P, preferred_element_type=f32)      # (CB, L) lane-dense
            if b is not None:
                y = y + b
            if act == "relu":
                y = jnp.maximum(y, 0.0)
            return y

        def res_block(a, i0, dil):
            h = conv3x3(a, w3_ref[i0], b3_ref[i0], dil, act="relu")
            return conv3x3(h, w3_ref[i0 + 1], b3_ref[i0 + 1], dil) + a

        x = x_ref[0]                                              # (CB, L) f32

        # --- MB_RB1 (full resolution) ---
        x_rb1 = res_block(x, 0, 1)

        # --- MB_Down: stride-2 3x3 = stride-1 conv kept only at even pixels ---
        x_dn = conv3x3(x_rb1, w3_ref[2], b3_ref[2], 1) * mev

        # --- MB_RB2: two low-res ResBlocks as dilation-2 convs on the embedded
        #     stride-2 grid (only even/even positions are meaningful; garbage at
        #     other positions never feeds an even/even output). ---
        x_rb2 = res_block(res_block(x_dn, 3, 2), 5, 2)

        # --- MB_Up: 6x6/stride-2 ConvTranspose = 4 sub-pixel 3x3 convs on the
        #     embedded grid; phase (s,t) is placed by a single lane roll. ---
        x_up = jnp.zeros_like(x)
        for ph in range(4):
            s, t = ph // 2, ph % 2
            p_out = conv3x3(x_rb2, wup_ref[ph], None, 2) * mev
            sh = s * Wp + t
            x_up = x_up + (p_out if sh == 0 else pltpu.roll(p_out, sh, axis=1))
        x_up = x_up + bup_ref[...]

        # --- residual join (x_RB1 + x_Up) + MB_RB3 (full resolution) ---
        x_rb3 = res_block(x_rb1 + x_up, 7, 1)

        # --- MB_1x1conv + sigmoid, fused ---
        y = jnp.dot(w1_ref[...], x_rb3.astype(bf16), preferred_element_type=f32)
        o_ref[0] = jax.nn.sigmoid(y + b1_ref[...]).astype(o_ref.dtype)

    return kernel


# ----------------------------------------------------------------------------
# Wrapper: layout glue + single pallas_call.
# ----------------------------------------------------------------------------
def mask_branch_down_up(x_nchw, params, nb_max=8):
    """Forward pass of MaskBranchDownUp. x_nchw: (N, C, H, W) float32 (PyTorch layout)."""
    N, C, H, W = x_nchw.shape
    assert H % 2 == 0 and W % 2 == 0, "stride-2 down/up assumes even H, W"
    CB = _round_up(C, 8)
    Wp = W + 2
    # per-image flat length: enough zero slack for the dilation-2 roll padding
    LHI = _round_up((H + 4) * Wp + 4, 128)

    # lane-stack NB images per grid step; keep the bf16 tap matrix (9CB, NB*LHI)
    # around <= 4 MiB so register/VMEM pressure stays modest at large C/H/W.
    nb_fit = max(1, (4 * 1024 * 1024) // (9 * CB * LHI * 2))
    NB = max(1, min(N, nb_max, nb_fit))
    G = -(-N // NB)
    Npad = G * NB
    L = NB * LHI

    # host-built masks: valid hi-res pixels, and even-row/even-col pixels
    idx = np.arange(LHI)
    r, c = idx // Wp, idx % Wp
    valid = (r < H) & (c < W)
    m_hi = valid.astype(np.float32)
    m_ev = (valid & (r % 2 == 0) & (c % 2 == 0)).astype(np.float32)
    mhi = jnp.asarray(np.tile(m_hi, NB)[None, :])            # (1, L)
    mev = jnp.asarray(np.tile(m_ev, NB)[None, :])            # (1, L)

    # weights: tap-major, channel-padded to CB, PRE-CAST to bf16 in the wrapper
    names = ("rb1_c1", "rb1_c2", "down", "rb2a_c1", "rb2a_c2",
             "rb2b_c1", "rb2b_c2", "rb3_c1", "rb3_c2")
    w3 = jnp.stack([_pack_conv3(params[k][0], CB) for k in names]).astype(jnp.bfloat16)
    b3 = jnp.stack([_pad_bias(params[k][1], CB) for k in names])      # (9,CB,1) f32
    wup = _pack_up_phases(params["up"][0], CB).astype(jnp.bfloat16)   # (4,CB,9CB)
    bup = _pad_bias(params["up"][1], CB)
    w1 = jnp.pad(params["c1x1"][0].reshape(C, C),
                 ((0, CB - C), (0, CB - C))).astype(jnp.bfloat16)
    b1 = _pad_bias(params["c1x1"][1], CB)

    # NCHW -> (G, CB, NB*LHI) flat row-extended lane-dense layout
    x_ext = jnp.pad(x_nchw, ((0, Npad - N), (0, CB - C), (0, 0), (0, 2)))
    x_ext = x_ext.reshape(Npad, CB, H * Wp)
    x_ext = jnp.pad(x_ext, ((0, 0), (0, 0), (0, LHI - H * Wp)))
    x_ext = x_ext.reshape(G, NB, CB, LHI).transpose(0, 2, 1, 3).reshape(G, CB, L)

    kernel = _make_kernel(CB, H, W, Wp, L)
    out = pl.pallas_call(
        kernel,
        out_shape=jax.ShapeDtypeStruct((G, CB, L), x_nchw.dtype),
        grid=(G,),
        in_specs=[
            pl.BlockSpec((1, CB, L), lambda g: (g, 0, 0)),           # x
            pl.BlockSpec(w3.shape, lambda g: (0, 0, 0)),             # 3x3 weights (bf16)
            pl.BlockSpec(b3.shape, lambda g: (0, 0, 0)),             # 3x3 biases (f32)
            pl.BlockSpec(wup.shape, lambda g: (0, 0, 0)),            # up-phase weights
            pl.BlockSpec(bup.shape, lambda g: (0, 0)),               # up bias
            pl.BlockSpec(w1.shape, lambda g: (0, 0)),                # 1x1 weight
            pl.BlockSpec(b1.shape, lambda g: (0, 0)),                # 1x1 bias
            pl.BlockSpec(mhi.shape, lambda g: (0, 0)),               # valid mask
            pl.BlockSpec(mev.shape, lambda g: (0, 0)),               # even/even mask
        ],
        out_specs=pl.BlockSpec((1, CB, L), lambda g: (g, 0, 0)),
        compiler_params=pltpu.CompilerParams(
            dimension_semantics=("parallel",),
            vmem_limit_bytes=64 * 1024 * 1024),
    )(x_ext, w3, b3, wup, bup, w1, b1, mhi, mev)

    # strip lane slack / channel / batch padding -> NCHW
    out = out.reshape(G, CB, NB, LHI).transpose(0, 2, 1, 3).reshape(Npad, CB, LHI)
    return out[:N, :C, :H * Wp].reshape(N, C, H, Wp)[:, :, :, :W]


# ----------------------------------------------------------------------------
# Deterministic synthetic parameters (shapes of MaskBranchDownUp.__init__)
# ----------------------------------------------------------------------------
def init_params(key, n_feat):
    ki = iter(jax.random.split(key, 32))

    def conv_wb(cin, cout, k):
        fan_in = cin * k * k
        w = jax.random.normal(next(ki), (cout, cin, k, k), jnp.float32) / np.sqrt(fan_in)
        b = 0.01 * jax.random.normal(next(ki), (cout,), jnp.float32)
        return w, b

    p = {}
    for name in ("rb1_c1", "rb1_c2", "down", "rb2a_c1", "rb2a_c2",
                 "rb2b_c1", "rb2b_c2", "rb3_c1", "rb3_c2"):
        p[name] = conv_wb(n_feat, n_feat, 3)
    wt = jax.random.normal(next(ki), (n_feat, n_feat, 6, 6), jnp.float32) / np.sqrt(n_feat * 36.0)
    bt = 0.01 * jax.random.normal(next(ki), (n_feat,), jnp.float32)
    p["up"] = (wt, bt)                      # PyTorch ConvTranspose2d layout (Cin, Cout, 6, 6)
    p["c1x1"] = conv_wb(n_feat, n_feat, 1)
    return p


# ----------------------------------------------------------------------------
# Pure-JAX reference (lax convs, f32 HIGHEST) to validate the Pallas kernel
# ----------------------------------------------------------------------------
def _ref_forward(x, params):
    def conv(x, w, b, stride=1, padding=0):
        y = jax.lax.conv_general_dilated(
            x, w, (stride, stride), [(padding, padding)] * 2,
            dimension_numbers=("NCHW", "OIHW", "NCHW"),
            precision=jax.lax.Precision.HIGHEST)
        return y + b.reshape(1, -1, 1, 1)

    def convT(x, w, b, stride, padding):
        K = w.shape[2]
        w_oihw = jnp.transpose(w, (1, 0, 2, 3))[:, :, ::-1, ::-1]
        y = jax.lax.conv_general_dilated(
            x, w_oihw, (1, 1), [(K - 1 - padding, K - 1 - padding)] * 2,
            lhs_dilation=(stride, stride),
            dimension_numbers=("NCHW", "OIHW", "NCHW"),
            precision=jax.lax.Precision.HIGHEST)
        return y + b.reshape(1, -1, 1, 1)

    def rb(x, k1, k2):
        h = jnp.maximum(conv(x, *params[k1], 1, 1), 0.0)
        return conv(h, *params[k2], 1, 1) + x

    x_rb1 = rb(x, "rb1_c1", "rb1_c2")
    x_dn = conv(x_rb1, *params["down"], 2, 1)
    x_rb2 = rb(rb(x_dn, "rb2a_c1", "rb2a_c2"), "rb2b_c1", "rb2b_c2")
    x_up = convT(x_rb2, *params["up"], 2, 2)
    x_rb3 = rb(x_rb1 + x_up, "rb3_c1", "rb3_c2")
    return jax.nn.sigmoid(conv(x_rb3, *params["c1x1"], 1, 0))


if __name__ == "__main__":
    key = jax.random.PRNGKey(0)
    kp, kx = jax.random.split(key)
    n_feat = 4
    N, H, W = 2, 16, 16

    params = init_params(kp, n_feat)
    x = jax.random.normal(kx, (N, n_feat, H, W), jnp.float32)   # NCHW, like PyTorch

    out = jax.block_until_ready(mask_branch_down_up(x, params))
    assert out.shape == (N, n_feat, H, W)

    ref = jax.block_until_ready(_ref_forward(x, params))
    # bf16 MXU operands with f32 accumulation -> relaxed tolerance vs f32 reference
    np.testing.assert_allclose(np.asarray(out), np.asarray(ref), atol=2e-2, rtol=2e-2)
    print("KERNEL_OK")
</pallas_src>

<mosaic_0001>
module attributes {stable_mosaic.version = 11 : i64} {
  func.func @kernel(%arg0: i32, %arg1: memref<1x8x768xf32, #tpu.memory_space<vmem>>, %arg2: memref<9x8x72xbf16, #tpu.memory_space<vmem>>, %arg3: memref<9x8x1xf32, #tpu.memory_space<vmem>>, %arg4: memref<4x8x72xbf16, #tpu.memory_space<vmem>>, %arg5: memref<8x1xf32, #tpu.memory_space<vmem>>, %arg6: memref<8x8xbf16, #tpu.memory_space<vmem>>, %arg7: memref<8x1xf32, #tpu.memory_space<vmem>>, %arg8: memref<1x768xf32, #tpu.memory_space<vmem>>, %arg9: memref<1x768xf32, #tpu.memory_space<vmem>>, %arg10: memref<1x8x768xf32, #tpu.memory_space<vmem>>) attributes {dimension_semantics = [#tpu.dimension_semantics<parallel>], iteration_bounds = array<i64: 1>, scalar_prefetch = 0 : i64, scratch_operands = 0 : i64, tpu.core_type = #tpu.core_type<tc>, window_params = [{transform_indices = @transform_0, window_bounds = array<i64: 1, 8, 768>}, {pipeline_mode = #tpu.pipeline_mode<synchronous>, transform_indices = @transform_1, window_bounds = array<i64: 9, 8, 72>}, {pipeline_mode = #tpu.pipeline_mode<synchronous>, transform_indices = @transform_2, window_bounds = array<i64: 9, 8, 1>}, {pipeline_mode = #tpu.pipeline_mode<synchronous>, transform_indices = @transform_3, window_bounds = array<i64: 4, 8, 72>}, {pipeline_mode = #tpu.pipeline_mode<synchronous>, transform_indices = @transform_4, window_bounds = array<i64: 8, 1>}, {pipeline_mode = #tpu.pipeline_mode<synchronous>, transform_indices = @transform_5, window_bounds = array<i64: 8, 8>}, {pipeline_mode = #tpu.pipeline_mode<synchronous>, transform_indices = @transform_6, window_bounds = array<i64: 8, 1>}, {pipeline_mode = #tpu.pipeline_mode<synchronous>, transform_indices = @transform_7, window_bounds = array<i64: 1, 768>}, {pipeline_mode = #tpu.pipeline_mode<synchronous>, transform_indices = @transform_8, window_bounds = array<i64: 1, 768>}, {transform_indices = @transform_9, window_bounds = array<i64: 1, 8, 768>}]} {
    %c0 = arith.constant 0 : index
    %c0_0 = arith.constant 0 : index
    %0 = vector.load %arg8[%c0, %c0_0] : memref<1x768xf32, #tpu.memory_space<vmem>>, vector<1x768xf32>
    %c0_1 = arith.constant 0 : index
    %c0_2 = arith.constant 0 : index
    %1 = vector.load %arg9[%c0_1, %c0_2] : memref<1x768xf32, #tpu.memory_space<vmem>>, vector<1x768xf32>
    %c0_3 = arith.constant 0 : index
    %c0_4 = arith.constant 0 : index
    %c0_5 = arith.constant 0 : index
    %2 = vector.load %arg1[%c0_3, %c0_4, %c0_5] : memref<1x8x768xf32, #tpu.memory_space<vmem>>, vector<1x8x768xf32>
    %3 = vector.shape_cast %2 : vector<1x8x768xf32> to vector<8x768xf32>
    %c0_6 = arith.constant 0 : index
    %c0_7 = arith.constant 0 : index
    %c0_8 = arith.constant 0 : index
    %4 = vector.load %arg2[%c0_6, %c0_7, %c0_8] : memref<9x8x72xbf16, #tpu.memory_space<vmem>>, vector<1x8x72xbf16>
    %5 = vector.shape_cast %4 : vector<1x8x72xbf16> to vector<8x72xbf16>
    %c0_9 = arith.constant 0 : index
    %c0_10 = arith.constant 0 : index
    %c0_11 = arith.constant 0 : index
    %6 = vector.load %arg3[%c0_9, %c0_10, %c0_11] : memref<9x8x1xf32, #tpu.memory_space<vmem>>, vector<1x8x1xf32>
    %7 = vector.shape_cast %6 : vector<1x8x1xf32> to vector<8x1xf32>
    %8 = vector.broadcast %0 : vector<1x768xf32> to vector<8x768xf32>
    %9 = arith.mulf %3, %8 : vector<8x768xf32>
    %c19_i32 = arith.constant 19 : i32
    %10 = tpu.dynamic_rotate %9 by %c19_i32 dim 1 : vector<8x768xf32>, i32 -> vector<8x768xf32>
    %c767_i32 = arith.constant 767 : i32
    %11 = tpu.dynamic_rotate %10 by %c767_i32 dim 1 : vector<8x768xf32>, i32 -> vector<8x768xf32>
    %c766_i32 = arith.constant 766 : i32
    %12 = tpu.dynamic_rotate %10 by %c766_i32 dim 1 : vector<8x768xf32>, i32 -> vector<8x768xf32>
    %c750_i32 = arith.constant 750 : i32
    %13 = tpu.dynamic_rotate %10 by %c750_i32 dim 1 : vector<8x768xf32>, i32 -> vector<8x768xf32>
    %c749_i32 = arith.constant 749 : i32
    %14 = tpu.dynamic_rotate %10 by %c749_i32 dim 1 : vector<8x768xf32>, i32 -> vector<8x768xf32>
    %c748_i32 = arith.constant 748 : i32
    %15 = tpu.dynamic_rotate %10 by %c748_i32 dim 1 : vector<8x768xf32>, i32 -> vector<8x768xf32>
    %c732_i32 = arith.constant 732 : i32
    %16 = tpu.dynamic_rotate %10 by %c732_i32 dim 1 : vector<8x768xf32>, i32 -> vector<8x768xf32>
    %c731_i32 = arith.constant 731 : i32
    %17 = tpu.dynamic_rotate %10 by %c731_i32 dim 1 : vector<8x768xf32>, i32 -> vector<8x768xf32>
    %c730_i32 = arith.constant 730 : i32
    %18 = tpu.dynamic_rotate %10 by %c730_i32 dim 1 : vector<8x768xf32>, i32 -> vector<8x768xf32>
    %19 = tpu.concatenate %10, %11, %12, %13, %14, %15, %16, %17, %18 in 0 : vector<8x768xf32>, vector<8x768xf32>, vector<8x768xf32>, vector<8x768xf32>, vector<8x768xf32>, vector<8x768xf32>, vector<8x768xf32>, vector<8x768xf32>, vector<8x768xf32> -> vector<72x768xf32>
    %20 = arith.truncf %19 : vector<72x768xf32> to vector<72x768xbf16>
    %cst = arith.constant dense<0.000000e+00> : vector<8x768xf32>
    %21 = tpu.matmul %5, %20, %cst {dimension_numbers = #tpu.dot_dimension_numbers<[1], [0], [0], [1], [0, 0, 1, 1], [], []>} : vector<8x72xbf16>, vector<72x768xbf16>, vector<8x768xf32> -> vector<8x768xf32>
    %22 = vector.broadcast %7 : vector<8x1xf32> to vector<8x768xf32>
    %23 = arith.addf %21, %22 : vector<8x768xf32>
    %cst_12 = arith.constant 0.000000e+00 : f32
    %24 = vector.broadcast %cst_12 : f32 to vector<8x768xf32>
    %25 = arith.maximumf %23, %24 : vector<8x768xf32>
    %c1 = arith.constant 1 : index
    %c0_13 = arith.constant 0 : index
    %c0_14 = arith.constant 0 : index
    %26 = vector.load %arg2[%c1, %c0_13, %c0_14] : memref<9x8x72xbf16, #tpu.memory_space<vmem>>, vector<1x8x72xbf16>
    %27 = vector.shape_cast %26 : vector<1x8x72xbf16> to vector<8x72xbf16>
    %c1_15 = arith.constant 1 : index
    %c0_16 = arith.constant 0 : index
    %c0_17 = arith.constant 0 : index
    %28 = vector.load %arg3[%c1_15, %c0_16, %c0_17] : memref<9x8x1xf32, #tpu.memory_space<vmem>>, vector<1x8x1xf32>
    %29 = vector.shape_cast %28 : vector<1x8x1xf32> to vector<8x1xf32>
    %30 = vector.broadcast %0 : vector<1x768xf32> to vector<8x768xf32>
    %31 = arith.mulf %25, %30 : vector<8x768xf32>
    %c19_i32_18 = arith.constant 19 : i32
    %32 = tpu.dynamic_rotate %31 by %c19_i32_18 dim 1 : vector<8x768xf32>, i32 -> vector<8x768xf32>
    %c767_i32_19 = arith.constant 767 : i32
    %33 = tpu.dynamic_rotate %32 by %c767_i32_19 dim 1 : vector<8x768xf32>, i32 -> vector<8x768xf32>
    %c766_i32_20 = arith.constant 766 : i32
    %34 = tpu.dynamic_rotate %32 by %c766_i32_20 dim 1 : vector<8x768xf32>, i32 -> vector<8x768xf32>
    %c750_i32_21 = arith.constant 750 : i32
    %35 = tpu.dynamic_rotate %32 by %c750_i32_21 dim 1 : vector<8x768xf32>, i32 -> vector<8x768xf32>
    %c749_i32_22 = arith.constant 749 : i32
    %36 = tpu.dynamic_rotate %32 by %c749_i32_22 dim 1 : vector<8x768xf32>, i32 -> vector<8x768xf32>
    %c748_i32_23 = arith.constant 748 : i32
    %37 = tpu.dynamic_rotate %32 by %c748_i32_23 dim 1 : vector<8x768xf32>, i32 -> vector<8x768xf32>
    %c732_i32_24 = arith.constant 732 : i32
    %38 = tpu.dynamic_rotate %32 by %c732_i32_24 dim 1 : vector<8x768xf32>, i32 -> vector<8x768xf32>
    %c731_i32_25 = arith.constant 731 : i32
    %39 = tpu.dynamic_rotate %32 by %c731_i32_25 dim 1 : vector<8x768xf32>, i32 -> vector<8x768xf32>
    %c730_i32_26 = arith.constant 730 : i32
    %40 = tpu.dynamic_rotate %32 by %c730_i32_26 dim 1 : vector<8x768xf32>, i32 -> vector<8x768xf32>
    %41 = tpu.concatenate %32, %33, %34, %35, %36, %37, %38, %39, %40 in 0 : vector<8x768xf32>, vector<8x768xf32>, vector<8x768xf32>, vector<8x768xf32>, vector<8x768xf32>, vector<8x768xf32>, vector<8x768xf32>, vector<8x768xf32>, vector<8x768xf32> -> vector<72x768xf32>
    %42 = arith.truncf %41 : vector<72x768xf32> to vector<72x768xbf16>
    %cst_27 = arith.constant dense<0.000000e+00> : vector<8x768xf32>
    %43 = tpu.matmul %27, %42, %cst_27 {dimension_numbers = #tpu.dot_dimension_numbers<[1], [0], [0], [1], [0, 0, 1, 1], [], []>} : vector<8x72xbf16>, vector<72x768xbf16>, vector<8x768xf32> -> vector<8x768xf32>
    %44 = vector.broadcast %29 : vector<8x1xf32> to vector<8x768xf32>
    %45 = arith.addf %43, %44 : vector<8x768xf32>
    %46 = arith.addf %45, %3 : vector<8x768xf32>
    %c2 = arith.constant 2 : index
    %c0_28 = arith.constant 0 : index
    %c0_29 = arith.constant 0 : index
    %47 = vector.load %arg2[%c2, %c0_28, %c0_29] : memref<9x8x72xbf16, #tpu.memory_space<vmem>>, vector<1x8x72xbf16>
    %48 = vector.shape_cast %47 : vector<1x8x72xbf16> to vector<8x72xbf16>
    %c2_30 = arith.constant 2 : index
    %c0_31 = arith.constant 0 : index
    %c0_32 = arith.constant 0 : index
    %49 = vector.load %arg3[%c2_30, %c0_31, %c0_32] : memref<9x8x1xf32, #tpu.memory_space<vmem>>, vector<1x8x1xf32>
    %50 = vector.shape_cast %49 : vector<1x8x1xf32> to vector<8x1xf32>
    %51 = vector.broadcast %0 : vector<1x768xf32> to vector<8x768xf32>
    %52 = arith.mulf %46, %51 : vector<8x768xf32>
    %c19_i32_33 = arith.constant 19 : i32
    %53 = tpu.dynamic_rotate %52 by %c19_i32_33 dim 1 : vector<8x768xf32>, i32 -> vector<8x768xf32>
    %c767_i32_34 = arith.constant 767 : i32
    %54 = tpu.dynamic_rotate %53 by %c767_i32_34 dim 1 : vector<8x768xf32>, i32 -> vector<8x768xf32>
    %c766_i32_35 = arith.constant 766 : i32
    %55 = tpu.dynamic_rotate %53 by %c766_i32_35 dim 1 : vector<8x768xf32>, i32 -> vector<8x768xf32>
    %c750_i32_36 = arith.constant 750 : i32
    %56 = tpu.dynamic_rotate %53 by %c750_i32_36 dim 1 : vector<8x768xf32>, i32 -> vector<8x768xf32>
    %c749_i32_37 = arith.constant 749 : i32
    %57 = tpu.dynamic_rotate %53 by %c749_i32_37 dim 1 : vector<8x768xf32>, i32 -> vector<8x768xf32>
    %c748_i32_38 = arith.constant 748 : i32
    %58 = tpu.dynamic_rotate %53 by %c748_i32_38 dim 1 : vector<8x768xf32>, i32 -> vector<8x768xf32>
    %c732_i32_39 = arith.constant 732 : i32
    %59 = tpu.dynamic_rotate %53 by %c732_i32_39 dim 1 : vector<8x768xf32>, i32 -> vector<8x768xf32>
    %c731_i32_40 = arith.constant 731 : i32
    %60 = tpu.dynamic_rotate %53 by %c731_i32_40 dim 1 : vector<8x768xf32>, i32 -> vector<8x768xf32>
    %c730_i32_41 = arith.constant 730 : i32
    %61 = tpu.dynamic_rotate %53 by %c730_i32_41 dim 1 : vector<8x768xf32>, i32 -> vector<8x768xf32>
    %62 = tpu.concatenate %53, %54, %55, %56, %57, %58, %59, %60, %61 in 0 : vector<8x768xf32>, vector<8x768xf32>, vector<8x768xf32>, vector<8x768xf32>, vector<8x768xf32>, vector<8x768xf32>, vector<8x768xf32>, vector<8x768xf32>, vector<8x768xf32> -> vector<72x768xf32>
    %63 = arith.truncf %62 : vector<72x768xf32> to vector<72x768xbf16>
    %cst_42 = arith.constant dense<0.000000e+00> : vector<8x768xf32>
    %64 = tpu.matmul %48, %63, %cst_42 {dimension_numbers = #tpu.dot_dimension_numbers<[1], [0], [0], [1], [0, 0, 1, 1], [], []>} : vector<8x72xbf16>, vector<72x768xbf16>, vector<8x768xf32> -> vector<8x768xf32>
    %65 = vector.broadcast %50 : vector<8x1xf32> to vector<8x768xf32>
    %66 = arith.addf %64, %65 : vector<8x768xf32>
    %67 = vector.broadcast %1 : vector<1x768xf32> to vector<8x768xf32>
    %68 = arith.mulf %66, %67 : vector<8x768xf32>
    %c3 = arith.constant 3 : index
    %c0_43 = arith.constant 0 : index
    %c0_44 = arith.constant 0 : index
    %69 = vector.load %arg2[%c3, %c0_43, %c0_44] : memref<9x8x72xbf16, #tpu.memory_space<vmem>>, vector<1x8x72xbf16>
    %70 = vector.shape_cast %69 : vector<1x8x72xbf16> to vector<8x72xbf16>
    %c3_45 = arith.constant 3 : index
    %c0_46 = arith.constant 0 : index
    %c0_47 = arith.constant 0 : index
    %71 = vector.load %arg3[%c3_45, %c0_46, %c0_47] : memref<9x8x1xf32, #tpu.memory_space<vmem>>, vector<1x8x1xf32>
    %72 = vector.shape_cast %71 : vector<1x8x1xf32> to vector<8x1xf32>
    %73 = vector.broadcast %0 : vector<1x768xf32> to vector<8x768xf32>
    %74 = arith.mulf %68, %73 : vector<8x768xf32>
    %c38_i32 = arith.constant 38 : i32
    %75 = tpu.dynamic_rotate %74 by %c38_i32 dim 1 : vector<8x768xf32>, i32 -> vector<8x768xf32>
    %c766_i32_48 = arith.constant 766 : i32
    %76 = tpu.dynamic_rotate %75 by %c766_i32_48 dim 1 : vector<8x768xf32>, i32 -> vector<8x768xf32>
    %c764_i32 = arith.constant 764 : i32
    %77 = tpu.dynamic_rotate %75 by %c764_i32 dim 1 : vector<8x768xf32>, i32 -> vector<8x768xf32>
    %c732_i32_49 = arith.constant 732 : i32
    %78 = tpu.dynamic_rotate %75 by %c732_i32_49 dim 1 : vector<8x768xf32>, i32 -> vector<8x768xf32>
    %c730_i32_50 = arith.constant 730 : i32
    %79 = tpu.dynamic_rotate %75 by %c730_i32_50 dim 1 : vector<8x768xf32>, i32 -> vector<8x768xf32>
    %c728_i32 = arith.constant 728 : i32
    %80 = tpu.dynamic_rotate %75 by %c728_i32 dim 1 : vector<8x768xf32>, i32 -> vector<8x768xf32>
    %c696_i32 = arith.constant 696 : i32
    %81 = tpu.dynamic_rotate %75 by %c696_i32 dim 1 : vector<8x768xf32>, i32 -> vector<8x768xf32>
    %c694_i32 = arith.constant 694 : i32
    %82 = tpu.dynamic_rotate %75 by %c694_i32 dim 1 : vector<8x768xf32>, i32 -> vector<8x768xf32>
    %c692_i32 = arith.constant 692 : i32
    %83 = tpu.dynamic_rotate %75 by %c692_i32 dim 1 : vector<8x768xf32>, i32 -> vector<8x768xf32>
    %84 = tpu.concatenate %75, %76, %77, %78, %79, %80, %81, %82, %83 in 0 : vector<8x768xf32>, vector<8x768xf32>, vector<8x768xf32>, vector<8x768xf32>, vector<8x768xf32>, vector<8x768xf32>, vector<8x768xf32>, vector<8x768xf32>, vector<8x768xf32> -> vector<72x768xf32>
    %85 = arith.truncf %84 : vector<72x768xf32> to vector<72x768xbf16>
    %cst_51 = arith.constant dense<0.000000e+00> : vector<8x768xf32>
    %86 = tpu.matmul %70, %85, %cst_51 {dimension_numbers = #tpu.dot_dimension_numbers<[1], [0], [0], [1], [0, 0, 1, 1], [], []>} : vector<8x72xbf16>, vector<72x768xbf16>, vector<8x768xf32> -> vector<8x768xf32>
    %87 = vector.broadcast %72 : vector<8x1xf32> to vector<8x768xf32>
    %88 = arith.addf %86, %87 : vector<8x768xf32>
    %cst_52 = arith.constant 0.000000e+00 : f32
    %89 = vector.broadcast %cst_52 : f32 to vector<8x768xf32>
    %90 = arith.maximumf %88, %89 : vector<8x768xf32>
    %c4 = arith.constant 4 : index
    %c0_53 = arith.constant 0 : index
    %c0_54 = arith.constant 0 : index
    %91 = vector.load %arg2[%c4, %c0_53, %c0_54] : memref<9x8x72xbf16, #tpu.memory_space<vmem>>, vector<1x8x72xbf16>
    %92 = vector.shape_cast %91 : vector<1x8x72xbf16> to vector<8x72xbf16>
    %c4_55 = arith.constant 4 : index
    %c0_56 = arith.constant 0 : index
    %c0_57 = arith.constant 0 : index
    %93 = vector.load %arg3[%c4_55, %c0_56, %c0_57] : memref<9x8x1xf32, #tpu.memory_space<vmem>>, vector<1x8x1xf32>
    %94 = vector.shape_cast %93 : vector<1x8x1xf32> to vector<8x1xf32>
    %95 = vector.broadcast %0 : vector<1x768xf32> to vector<8x768xf32>
    %96 = arith.mulf %90, %95 : vector<8x768xf32>
    %c38_i32_58 = arith.constant 38 : i32
    %97 = tpu.dynamic_rotate %96 by %c38_i32_58 dim 1 : vector<8x768xf32>, i32 -> vector<8x768xf32>
    %c766_i32_59 = arith.constant 766 : i32
    %98 = tpu.dynamic_rotate %97 by %c766_i32_59 dim 1 : vector<8x768xf32>, i32 -> vector<8x768xf32>
    %c764_i32_60 = arith.constant 764 : i32
    %99 = tpu.dynamic_rotate %97 by %c764_i32_60 dim 1 : vector<8x768xf32>, i32 -> vector<8x768xf32>
    %c732_i32_61 = arith.constant 732 : i32
    %100 = tpu.dynamic_rotate %97 by %c732_i32_61 dim 1 : vector<8x768xf32>, i32 -> vector<8x768xf32>
    %c730_i32_62 = arith.constant 730 : i32
    %101 = tpu.dynamic_rotate %97 by %c730_i32_62 dim 1 : vector<8x768xf32>, i32 -> vector<8x768xf32>
    %c728_i32_63 = arith.constant 728 : i32
    %102 = tpu.dynamic_rotate %97 by %c728_i32_63 dim 1 : vector<8x768xf32>, i32 -> vector<8x768xf32>
    %c696_i32_64 = arith.constant 696 : i32
    %103 = tpu.dynamic_rotate %97 by %c696_i32_64 dim 1 : vector<8x768xf32>, i32 -> vector<8x768xf32>
    %c694_i32_65 = arith.constant 694 : i32
    %104 = tpu.dynamic_rotate %97 by %c694_i32_65 dim 1 : vector<8x768xf32>, i32 -> vector<8x768xf32>
    %c692_i32_66 = arith.constant 692 : i32
    %105 = tpu.dynamic_rotate %97 by %c692_i32_66 dim 1 : vector<8x768xf32>, i32 -> vector<8x768xf32>
    %106 = tpu.concatenate %97, %98, %99, %100, %101, %102, %103, %104, %105 in 0 : vector<8x768xf32>, vector<8x768xf32>, vector<8x768xf32>, vector<8x768xf32>, vector<8x768xf32>, vector<8x768xf32>, vector<8x768xf32>, vector<8x768xf32>, vector<8x768xf32> -> vector<72x768xf32>
    %107 = arith.truncf %106 : vector<72x768xf32> to vector<72x768xbf16>
    %cst_67 = arith.constant dense<0.000000e+00> : vector<8x768xf32>
    %108 = tpu.matmul %92, %107, %cst_67 {dimension_numbers = #tpu.dot_dimension_numbers<[1], [0], [0], [1], [0, 0, 1, 1], [], []>} : vector<8x72xbf16>, vector<72x768xbf16>, vector<8x768xf32> -> vector<8x768xf32>
    %109 = vector.broadcast %94 : vector<8x1xf32> to vector<8x768xf32>
    %110 = arith.addf %108, %109 : vector<8x768xf32>
    %111 = arith.addf %110, %68 : vector<8x768xf32>
    %c5 = arith.constant 5 : index
    %c0_68 = arith.constant 0 : index
    %c0_69 = arith.constant 0 : index
    %112 = vector.load %arg2[%c5, %c0_68, %c0_69] : memref<9x8x72xbf16, #tpu.memory_space<vmem>>, vector<1x8x72xbf16>
    %113 = vector.shape_cast %112 : vector<1x8x72xbf16> to vector<8x72xbf16>
    %c5_70 = arith.constant 5 : index
    %c0_71 = arith.constant 0 : index
    %c0_72 = arith.constant 0 : index
    %114 = vector.load %arg3[%c5_70, %c0_71, %c0_72] : memref<9x8x1xf32, #tpu.memory_space<vmem>>, vector<1x8x1xf32>
    %115 = vector.shape_cast %114 : vector<1x8x1xf32> to vector<8x1xf32>
    %116 = vector.broadcast %0 : vector<1x768xf32> to vector<8x768xf32>
    %117 = arith.mulf %111, %116 : vector<8x768xf32>
    %c38_i32_73 = arith.constant 38 : i32
    %118 = tpu.dynamic_rotate %117 by %c38_i32_73 dim 1 : vector<8x768xf32>, i32 -> vector<8x768xf32>
    %c766_i32_74 = arith.constant 766 : i32
    %119 = tpu.dynamic_rotate %118 by %c766_i32_74 dim 1 : vector<8x768xf32>, i32 -> vector<8x768xf32>
    %c764_i32_75 = arith.constant 764 : i32
    %120 = tpu.dynamic_rotate %118 by %c764_i32_75 dim 1 : vector<8x768xf32>, i32 -> vector<8x768xf32>
    %c732_i32_76 = arith.constant 732 : i32
    %121 = tpu.dynamic_rotate %118 by %c732_i32_76 dim 1 : vector<8x768xf32>, i32 -> vector<8x768xf32>
    %c730_i32_77 = arith.constant 730 : i32
    %122 = tpu.dynamic_rotate %118 by %c730_i32_77 dim 1 : vector<8x768xf32>, i32 -> vector<8x768xf32>
    %c728_i32_78 = arith.constant 728 : i32
    %123 = tpu.dynamic_rotate %118 by %c728_i32_78 dim 1 : vector<8x768xf32>, i32 -> vector<8x768xf32>
    %c696_i32_79 = arith.constant 696 : i32
    %124 = tpu.dynamic_rotate %118 by %c696_i32_79 dim 1 : vector<8x768xf32>, i32 -> vector<8x768xf32>
    %c694_i32_80 = arith.constant 694 : i32
    %125 = tpu.dynamic_rotate %118 by %c694_i32_80 dim 1 : vector<8x768xf32>, i32 -> vector<8x768xf32>
    %c692_i32_81 = arith.constant 692 : i32
    %126 = tpu.dynamic_rotate %118 by %c692_i32_81 dim 1 : vector<8x768xf32>, i32 -> vector<8x768xf32>
    %127 = tpu.concatenate %118, %119, %120, %121, %122, %123, %124, %125, %126 in 0 : vector<8x768xf32>, vector<8x768xf32>, vector<8x768xf32>, vector<8x768xf32>, vector<8x768xf32>, vector<8x768xf32>, vector<8x768xf32>, vector<8x768xf32>, vector<8x768xf32> -> vector<72x768xf32>
    %128 = arith.truncf %127 : vector<72x768xf32> to vector<72x768xbf16>
    %cst_82 = arith.constant dense<0.000000e+00> : vector<8x768xf32>
    %129 = tpu.matmul %113, %128, %cst_82 {dimension_numbers = #tpu.dot_dimension_numbers<[1], [0], [0], [1], [0, 0, 1, 1], [], []>} : vector<8x72xbf16>, vector<72x768xbf16>, vector<8x768xf32> -> vector<8x768xf32>
    %130 = vector.broadcast %115 : vector<8x1xf32> to vector<8x768xf32>
    %131 = arith.addf %129, %130 : vector<8x768xf32>
    %cst_83 = arith.constant 0.000000e+00 : f32
    %132 = vector.broadcast %cst_83 : f32 to vector<8x768xf32>
    %133 = arith.maximumf %131, %132 : vector<8x768xf32>
    %c6 = arith.constant 6 : index
    %c0_84 = arith.constant 0 : index
    %c0_85 = arith.constant 0 : index
    %134 = vector.load %arg2[%c6, %c0_84, %c0_85] : memref<9x8x72xbf16, #tpu.memory_space<vmem>>, vector<1x8x72xbf16>
    %135 = vector.shape_cast %134 : vector<1x8x72xbf16> to vector<8x72xbf16>
    %c6_86 = arith.constant 6 : index
    %c0_87 = arith.constant 0 : index
    %c0_88 = arith.constant 0 : index
    %136 = vector.load %arg3[%c6_86, %c0_87, %c0_88] : memref<9x8x1xf32, #tpu.memory_space<vmem>>, vector<1x8x1xf32>
    %137 = vector.shape_cast %136 : vector<1x8x1xf32> to vector<8x1xf32>
    %138 = vector.broadcast %0 : vector<1x768xf32> to vector<8x768xf32>
    %139 = arith.mulf %133, %138 : vector<8x768xf32>
    %c38_i32_89 = arith.constant 38 : i32
    %140 = tpu.dynamic_rotate %139 by %c38_i32_89 dim 1 : vector<8x768xf32>, i32 -> vector<8x768xf32>
    %c766_i32_90 = arith.constant 766 : i32
    %141 = tpu.dynamic_rotate %140 by %c766_i32_90 dim 1 : vector<8x768xf32>, i32 -> vector<8x768xf32>
    %c764_i32_91 = arith.constant 764 : i32
    %142 = tpu.dynamic_rotate %140 by %c764_i32_91 dim 1 : vector<8x768xf32>, i32 -> vector<8x768xf32>
    %c732_i32_92 = arith.constant 732 : i32
    %143 = tpu.dynamic_rotate %140 by %c732_i32_92 dim 1 : vector<8x768xf32>, i32 -> vector<8x768xf32>
    %c730_i32_93 = arith.constant 730 : i32
    %144 = tpu.dynamic_rotate %140 by %c730_i32_93 dim 1 : vector<8x768xf32>, i32 -> vector<8x768xf32>
    %c728_i32_94 = arith.constant 728 : i32
    %145 = tpu.dynamic_rotate %140 by %c728_i32_94 dim 1 : vector<8x768xf32>, i32 -> vector<8x768xf32>
    %c696_i32_95 = arith.constant 696 : i32
    %146 = tpu.dynamic_rotate %140 by %c696_i32_95 dim 1 : vector<8x768xf32>, i32 -> vector<8x768xf32>
    %c694_i32_96 = arith.constant 694 : i32
    %147 = tpu.dynamic_rotate %140 by %c694_i32_96 dim 1 : vector<8x768xf32>, i32 -> vector<8x768xf32>
    %c692_i32_97 = arith.constant 692 : i32
    %148 = tpu.dynamic_rotate %140 by %c692_i32_97 dim 1 : vector<8x768xf32>, i32 -> vector<8x768xf32>
    %149 = tpu.concatenate %140, %141, %142, %143, %144, %145, %146, %147, %148 in 0 : vector<8x768xf32>, vector<8x768xf32>, vector<8x768xf32>, vector<8x768xf32>, vector<8x768xf32>, vector<8x768xf32>, vector<8x768xf32>, vector<8x768xf32>, vector<8x768xf32> -> vector<72x768xf32>
    %150 = arith.truncf %149 : vector<72x768xf32> to vector<72x768xbf16>
    %cst_98 = arith.constant dense<0.000000e+00> : vector<8x768xf32>
    %151 = tpu.matmul %135, %150, %cst_98 {dimension_numbers = #tpu.dot_dimension_numbers<[1], [0], [0], [1], [0, 0, 1, 1], [], []>} : vector<8x72xbf16>, vector<72x768xbf16>, vector<8x768xf32> -> vector<8x768xf32>
    %152 = vector.broadcast %137 : vector<8x1xf32> to vector<8x768xf32>
    %153 = arith.addf %151, %152 : vector<8x768xf32>
    %154 = arith.addf %153, %111 : vector<8x768xf32>
    %cst_99 = arith.constant 0.000000e+00 : f32
    %155 = vector.broadcast %cst_99 : f32 to vector<8x768xf32>
    %c0_100 = arith.constant 0 : index
    %c0_101 = arith.constant 0 : index
    %c0_102 = arith.constant 0 : index
    %156 = vector.load %arg4[%c0_100, %c0_101, %c0_102] : memref<4x8x72xbf16, #tpu.memory_space<vmem>>, vector<1x8x72xbf16>
    %157 = vector.shape_cast %156 : vector<1x8x72xbf16> to vector<8x72xbf16>
    %158 = vector.broadcast %0 : vector<1x768xf32> to vector<8x768xf32>
    %159 = arith.mulf %154, %158 : vector<8x768xf32>
    %c38_i32_103 = arith.constant 38 : i32
    %160 = tpu.dynamic_rotate %159 by %c38_i32_103 dim 1 : vector<8x768xf32>, i32 -> vector<8x768xf32>
    %c766_i32_104 = arith.constant 766 : i32
    %161 = tpu.dynamic_rotate %160 by %c766_i32_104 dim 1 : vector<8x768xf32>, i32 -> vector<8x768xf32>
    %c764_i32_105 = arith.constant 764 : i32
    %162 = tpu.dynamic_rotate %160 by %c764_i32_105 dim 1 : vector<8x768xf32>, i32 -> vector<8x768xf32>
    %c732_i32_106 = arith.constant 732 : i32
    %163 = tpu.dynamic_rotate %160 by %c732_i32_106 dim 1 : vector<8x768xf32>, i32 -> vector<8x768xf32>
    %c730_i32_107 = arith.constant 730 : i32
    %164 = tpu.dynamic_rotate %160 by %c730_i32_107 dim 1 : vector<8x768xf32>, i32 -> vector<8x768xf32>
    %c728_i32_108 = arith.constant 728 : i32
    %165 = tpu.dynamic_rotate %160 by %c728_i32_108 dim 1 : vector<8x768xf32>, i32 -> vector<8x768xf32>
    %c696_i32_109 = arith.constant 696 : i32
    %166 = tpu.dynamic_rotate %160 by %c696_i32_109 dim 1 : vector<8x768xf32>, i32 -> vector<8x768xf32>
    %c694_i32_110 = arith.constant 694 : i32
    %167 = tpu.dynamic_rotate %160 by %c694_i32_110 dim 1 : vector<8x768xf32>, i32 -> vector<8x768xf32>
    %c692_i32_111 = arith.constant 692 : i32
    %168 = tpu.dynamic_rotate %160 by %c692_i32_111 dim 1 : vector<8x768xf32>, i32 -> vector<8x768xf32>
    %169 = tpu.concatenate %160, %161, %162, %163, %164, %165, %166, %167, %168 in 0 : vector<8x768xf32>, vector<8x768xf32>, vector<8x768xf32>, vector<8x768xf32>, vector<8x768xf32>, vector<8x768xf32>, vector<8x768xf32>, vector<8x768xf32>, vector<8x768xf32> -> vector<72x768xf32>
    %170 = arith.truncf %169 : vector<72x768xf32> to vector<72x768xbf16>
    %cst_112 = arith.constant dense<0.000000e+00> : vector<8x768xf32>
    %171 = tpu.matmul %157, %170, %cst_112 {dimension_numbers = #tpu.dot_dimension_numbers<[1], [0], [0], [1], [0, 0, 1, 1], [], []>} : vector<8x72xbf16>, vector<72x768xbf16>, vector<8x768xf32> -> vector<8x768xf32>
    %172 = vector.broadcast %1 : vector<1x768xf32> to vector<8x768xf32>
    %173 = arith.mulf %171, %172 : vector<8x768xf32>
    %174 = arith.addf %155, %173 : vector<8x768xf32>
    %c1_113 = arith.constant 1 : index
    %c0_114 = arith.constant 0 : index
    %c0_115 = arith.constant 0 : index
    %175 = vector.load %arg4[%c1_113, %c0_114, %c0_115] : memref<4x8x72xbf16, #tpu.memory_space<vmem>>, vector<1x8x72xbf16>
    %176 = vector.shape_cast %175 : vector<1x8x72xbf16> to vector<8x72xbf16>
    %177 = vector.broadcast %0 : vector<1x768xf32> to vector<8x768xf32>
    %178 = arith.mulf %154, %177 : vector<8x768xf32>
    %c38_i32_116 = arith.constant 38 : i32
    %179 = tpu.dynamic_rotate %178 by %c38_i32_116 dim 1 : vector<8x768xf32>, i32 -> vector<8x768xf32>
    %c766_i32_117 = arith.constant 766 : i32
    %180 = tpu.dynamic_rotate %179 by %c766_i32_117 dim 1 : vector<8x768xf32>, i32 -> vector<8x768xf32>
    %c764_i32_118 = arith.constant 764 : i32
    %181 = tpu.dynamic_rotate %179 by %c764_i32_118 dim 1 : vector<8x768xf32>, i32 -> vector<8x768xf32>
    %c732_i32_119 = arith.constant 732 : i32
    %182 = tpu.dynamic_rotate %179 by %c732_i32_119 dim 1 : vector<8x768xf32>, i32 -> vector<8x768xf32>
    %c730_i32_120 = arith.constant 730 : i32
    %183 = tpu.dynamic_rotate %179 by %c730_i32_120 dim 1 : vector<8x768xf32>, i32 -> vector<8x768xf32>
    %c728_i32_121 = arith.constant 728 : i32
    %184 = tpu.dynamic_rotate %179 by %c728_i32_121 dim 1 : vector<8x768xf32>, i32 -> vector<8x768xf32>
    %c696_i32_122 = arith.constant 696 : i32
    %185 = tpu.dynamic_rotate %179 by %c696_i32_122 dim 1 : vector<8x768xf32>, i32 -> vector<8x768xf32>
    %c694_i32_123 = arith.constant 694 : i32
    %186 = tpu.dynamic_rotate %179 by %c694_i32_123 dim 1 : vector<8x768xf32>, i32 -> vector<8x768xf32>
    %c692_i32_124 = arith.constant 692 : i32
    %187 = tpu.dynamic_rotate %179 by %c692_i32_124 dim 1 : vector<8x768xf32>, i32 -> vector<8x768xf32>
    %188 = tpu.concatenate %179, %180, %181, %182, %183, %184, %185, %186, %187 in 0 : vector<8x768xf32>, vector<8x768xf32>, vector<8x768xf32>, vector<8x768xf32>, vector<8x768xf32>, vector<8x768xf32>, vector<8x768xf32>, vector<8x768xf32>, vector<8x768xf32> -> vector<72x768xf32>
    %189 = arith.truncf %188 : vector<72x768xf32> to vector<72x768xbf16>
    %cst_125 = arith.constant dense<0.000000e+00> : vector<8x768xf32>
    %190 = tpu.matmul %176, %189, %cst_125 {dimension_numbers = #tpu.dot_dimension_numbers<[1], [0], [0], [1], [0, 0, 1, 1], [], []>} : vector<8x72xbf16>, vector<72x768xbf16>, vector<8x768xf32> -> vector<8x768xf32>
    %191 = vector.broadcast %1 : vector<1x768xf32> to vector<8x768xf32>
    %192 = arith.mulf %190, %191 : vector<8x768xf32>
    %c1_i32 = arith.constant 1 : i32
    %193 = tpu.dynamic_rotate %192 by %c1_i32 dim 1 : vector<8x768xf32>, i32 -> vector<8x768xf32>
    %194 = arith.addf %174, %193 : vector<8x768xf32>
    %c2_126 = arith.constant 2 : index
    %c0_127 = arith.constant 0 : index
    %c0_128 = arith.constant 0 : index
    %195 = vector.load %arg4[%c2_126, %c0_127, %c0_128] : memref<4x8x72xbf16, #tpu.memory_space<vmem>>, vector<1x8x72xbf16>
    %196 = vector.shape_cast %195 : vector<1x8x72xbf16> to vector<8x72xbf16>
    %197 = vector.broadcast %0 : vector<1x768xf32> to vector<8x768xf32>
    %198 = arith.mulf %154, %197 : vector<8x768xf32>
    %c38_i32_129 = arith.constant 38 : i32
    %199 = tpu.dynamic_rotate %198 by %c38_i32_129 dim 1 : vector<8x768xf32>, i32 -> vector<8x768xf32>
    %c766_i32_130 = arith.constant 766 : i32
    %200 = tpu.dynamic_rotate %199 by %c766_i32_130 dim 1 : vector<8x768xf32>, i32 -> vector<8x768xf32>
    %c764_i32_131 = arith.constant 764 : i32
    %201 = tpu.dynamic_rotate %199 by %c764_i32_131 dim 1 : vector<8x768xf32>, i32 -> vector<8x768xf32>
    %c732_i32_132 = arith.constant 732 : i32
    %202 = tpu.dynamic_rotate %199 by %c732_i32_132 dim 1 : vector<8x768xf32>, i32 -> vector<8x768xf32>
    %c730_i32_133 = arith.constant 730 : i32
    %203 = tpu.dynamic_rotate %199 by %c730_i32_133 dim 1 : vector<8x768xf32>, i32 -> vector<8x768xf32>
    %c728_i32_134 = arith.constant 728 : i32
    %204 = tpu.dynamic_rotate %199 by %c728_i32_134 dim 1 : vector<8x768xf32>, i32 -> vector<8x768xf32>
    %c696_i32_135 = arith.constant 696 : i32
    %205 = tpu.dynamic_rotate %199 by %c696_i32_135 dim 1 : vector<8x768xf32>, i32 -> vector<8x768xf32>
    %c694_i32_136 = arith.constant 694 : i32
    %206 = tpu.dynamic_rotate %199 by %c694_i32_136 dim 1 : vector<8x768xf32>, i32 -> vector<8x768xf32>
    %c692_i32_137 = arith.constant 692 : i32
    %207 = tpu.dynamic_rotate %199 by %c692_i32_137 dim 1 : vector<8x768xf32>, i32 -> vector<8x768xf32>
    %208 = tpu.concatenate %199, %200, %201, %202, %203, %204, %205, %206, %207 in 0 : vector<8x768xf32>, vector<8x768xf32>, vector<8x768xf32>, vector<8x768xf32>, vector<8x768xf32>, vector<8x768xf32>, vector<8x768xf32>, vector<8x768xf32>, vector<8x768xf32> -> vector<72x768xf32>
    %209 = arith.truncf %208 : vector<72x768xf32> to vector<72x768xbf16>
    %cst_138 = arith.constant dense<0.000000e+00> : vector<8x768xf32>
    %210 = tpu.matmul %196, %209, %cst_138 {dimension_numbers = #tpu.dot_dimension_numbers<[1], [0], [0], [1], [0, 0, 1, 1], [], []>} : vector<8x72xbf16>, vector<72x768xbf16>, vector<8x768xf32> -> vector<8x768xf32>
    %211 = vector.broadcast %1 : vector<1x768xf32> to vector<8x768xf32>
    %212 = arith.mulf %210, %211 : vector<8x768xf32>
    %c18_i32 = arith.constant 18 : i32
    %213 = tpu.dynamic_rotate %212 by %c18_i32 dim 1 : vector<8x768xf32>, i32 -> vector<8x768xf32>
    %214 = arith.addf %194, %213 : vector<8x768xf32>
    %c3_139 = arith.constant 3 : index
    %c0_140 = arith.constant 0 : index
    %c0_141 = arith.constant 0 : index
    %215 = vector.load %arg4[%c3_139, %c0_140, %c0_141] : memref<4x8x72xbf16, #tpu.memory_space<vmem>>, vector<1x8x72xbf16>
    %216 = vector.shape_cast %215 : vector<1x8x72xbf16> to vector<8x72xbf16>
    %217 = vector.broadcast %0 : vector<1x768xf32> to vector<8x768xf32>
    %218 = arith.mulf %154, %217 : vector<8x768xf32>
    %c38_i32_142 = arith.constant 38 : i32
    %219 = tpu.dynamic_rotate %218 by %c38_i32_142 dim 1 : vector<8x768xf32>, i32 -> vector<8x768xf32>
    %c766_i32_143 = arith.constant 766 : i32
    %220 = tpu.dynamic_rotate %219 by %c766_i32_143 dim 1 : vector<8x768xf32>, i32 -> vector<8x768xf32>
    %c764_i32_144 = arith.constant 764 : i32
    %221 = tpu.dynamic_rotate %219 by %c764_i32_144 dim 1 : vector<8x768xf32>, i32 -> vector<8x768xf32>
    %c732_i32_145 = arith.constant 732 : i32
    %222 = tpu.dynamic_rotate %219 by %c732_i32_145 dim 1 : vector<8x768xf32>, i32 -> vector<8x768xf32>
    %c730_i32_146 = arith.constant 730 : i32
    %223 = tpu.dynamic_rotate %219 by %c730_i32_146 dim 1 : vector<8x768xf32>, i32 -> vector<8x768xf32>
    %c728_i32_147 = arith.constant 728 : i32
    %224 = tpu.dynamic_rotate %219 by %c728_i32_147 dim 1 : vector<8x768xf32>, i32 -> vector<8x768xf32>
    %c696_i32_148 = arith.constant 696 : i32
    %225 = tpu.dynamic_rotate %219 by %c696_i32_148 dim 1 : vector<8x768xf32>, i32 -> vector<8x768xf32>
    %c694_i32_149 = arith.constant 694 : i32
    %226 = tpu.dynamic_rotate %219 by %c694_i32_149 dim 1 : vector<8x768xf32>, i32 -> vector<8x768xf32>
    %c692_i32_150 = arith.constant 692 : i32
    %227 = tpu.dynamic_rotate %219 by %c692_i32_150 dim 1 : vector<8x768xf32>, i32 -> vector<8x768xf32>
    %228 = tpu.concatenate %219, %220, %221, %222, %223, %224, %225, %226, %227 in 0 : vector<8x768xf32>, vector<8x768xf32>, vector<8x768xf32>, vector<8x768xf32>, vector<8x768xf32>, vector<8x768xf32>, vector<8x768xf32>, vector<8x768xf32>, vector<8x768xf32> -> vector<72x768xf32>
    %229 = arith.truncf %228 : vector<72x768xf32> to vector<72x768xbf16>
    %cst_151 = arith.constant dense<0.000000e+00> : vector<8x768xf32>
    %230 = tpu.matmul %216, %229, %cst_151 {dimension_numbers = #tpu.dot_dimension_numbers<[1], [0], [0], [1], [0, 0, 1, 1], [], []>} : vector<8x72xbf16>, vector<72x768xbf16>, vector<8x768xf32> -> vector<8x768xf32>
    %231 = vector.broadcast %1 : vector<1x768xf32> to vector<8x768xf32>
    %232 = arith.mulf %230, %231 : vector<8x768xf32>
    %c19_i32_152 = arith.constant 19 : i32
    %233 = tpu.dynamic_rotate %232 by %c19_i32_152 dim 1 : vector<8x768xf32>, i32 -> vector<8x768xf32>
    %234 = arith.addf %214, %233 : vector<8x768xf32>
    %c0_153 = arith.constant 0 : index
    %c0_154 = arith.constant 0 : index
    %235 = vector.load %arg5[%c0_153, %c0_154] : memref<8x1xf32, #tpu.memory_space<vmem>>, vector<8x1xf32>
    %236 = vector.broadcast %235 : vector<8x1xf32> to vector<8x768xf32>
    %237 = arith.addf %234, %236 : vector<8x768xf32>
    %238 = arith.addf %46, %237 : vector<8x768xf32>
    %c7 = arith.constant 7 : index
    %c0_155 = arith.constant 0 : index
    %c0_156 = arith.constant 0 : index
    %239 = vector.load %arg2[%c7, %c0_155, %c0_156] : memref<9x8x72xbf16, #tpu.memory_space<vmem>>, vector<1x8x72xbf16>
    %240 = vector.shape_cast %239 : vector<1x8x72xbf16> to vector<8x72xbf16>
    %c7_157 = arith.constant 7 : index
    %c0_158 = arith.constant 0 : index
    %c0_159 = arith.constant 0 : index
    %241 = vector.load %arg3[%c7_157, %c0_158, %c0_159] : memref<9x8x1xf32, #tpu.memory_space<vmem>>, vector<1x8x1xf32>
    %242 = vector.shape_cast %241 : vector<1x8x1xf32> to vector<8x1xf32>
    %243 = vector.broadcast %0 : vector<1x768xf32> to vector<8x768xf32>
    %244 = arith.mulf %238, %243 : vector<8x768xf32>
    %c19_i32_160 = arith.constant 19 : i32
    %245 = tpu.dynamic_rotate %244 by %c19_i32_160 dim 1 : vector<8x768xf32>, i32 -> vector<8x768xf32>
    %c767_i32_161 = arith.constant 767 : i32
    %246 = tpu.dynamic_rotate %245 by %c767_i32_161 dim 1 : vector<8x768xf32>, i32 -> vector<8x768xf32>
    %c766_i32_162 = arith.constant 766 : i32
    %247 = tpu.dynamic_rotate %245 by %c766_i32_162 dim 1 : vector<8x768xf32>, i32 -> vector<8x768xf32>
    %c750_i32_163 = arith.constant 750 : i32
    %248 = tpu.dynamic_rotate %245 by %c750_i32_163 dim 1 : vector<8x768xf32>, i32 -> vector<8x768xf32>
    %c749_i32_164 = arith.constant 749 : i32
    %249 = tpu.dynamic_rotate %245 by %c749_i32_164 dim 1 : vector<8x768xf32>, i32 -> vector<8x768xf32>
    %c748_i32_165 = arith.constant 748 : i32
    %250 = tpu.dynamic_rotate %245 by %c748_i32_165 dim 1 : vector<8x768xf32>, i32 -> vector<8x768xf32>
    %c732_i32_166 = arith.constant 732 : i32
    %251 = tpu.dynamic_rotate %245 by %c732_i32_166 dim 1 : vector<8x768xf32>, i32 -> vector<8x768xf32>
    %c731_i32_167 = arith.constant 731 : i32
    %252 = tpu.dynamic_rotate %245 by %c731_i32_167 dim 1 : vector<8x768xf32>, i32 -> vector<8x768xf32>
    %c730_i32_168 = arith.constant 730 : i32
    %253 = tpu.dynamic_rotate %245 by %c730_i32_168 dim 1 : vector<8x768xf32>, i32 -> vector<8x768xf32>
    %254 = tpu.concatenate %245, %246, %247, %248, %249, %250, %251, %252, %253 in 0 : vector<8x768xf32>, vector<8x768xf32>, vector<8x768xf32>, vector<8x768xf32>, vector<8x768xf32>, vector<8x768xf32>, vector<8x768xf32>, vector<8x768xf32>, vector<8x768xf32> -> vector<72x768xf32>
    %255 = arith.truncf %254 : vector<72x768xf32> to vector<72x768xbf16>
    %cst_169 = arith.constant dense<0.000000e+00> : vector<8x768xf32>
    %256 = tpu.matmul %240, %255, %cst_169 {dimension_numbers = #tpu.dot_dimension_numbers<[1], [0], [0], [1], [0, 0, 1, 1], [], []>} : vector<8x72xbf16>, vector<72x768xbf16>, vector<8x768xf32> -> vector<8x768xf32>
    %257 = vector.broadcast %242 : vector<8x1xf32> to vector<8x768xf32>
    %258 = arith.addf %256, %257 : vector<8x768xf32>
    %cst_170 = arith.constant 0.000000e+00 : f32
    %259 = vector.broadcast %cst_170 : f32 to vector<8x768xf32>
    %260 = arith.maximumf %258, %259 : vector<8x768xf32>
    %c8 = arith.constant 8 : index
    %c0_171 = arith.constant 0 : index
    %c0_172 = arith.constant 0 : index
    %261 = vector.load %arg2[%c8, %c0_171, %c0_172] : memref<9x8x72xbf16, #tpu.memory_space<vmem>>, vector<1x8x72xbf16>
    %262 = vector.shape_cast %261 : vector<1x8x72xbf16> to vector<8x72xbf16>
    %c8_173 = arith.constant 8 : index
    %c0_174 = arith.constant 0 : index
    %c0_175 = arith.constant 0 : index
    %263 = vector.load %arg3[%c8_173, %c0_174, %c0_175] : memref<9x8x1xf32, #tpu.memory_space<vmem>>, vector<1x8x1xf32>
    %264 = vector.shape_cast %263 : vector<1x8x1xf32> to vector<8x1xf32>
    %265 = vector.broadcast %0 : vector<1x768xf32> to vector<8x768xf32>
    %266 = arith.mulf %260, %265 : vector<8x768xf32>
    %c19_i32_176 = arith.constant 19 : i32
    %267 = tpu.dynamic_rotate %266 by %c19_i32_176 dim 1 : vector<8x768xf32>, i32 -> vector<8x768xf32>
    %c767_i32_177 = arith.constant 767 : i32
    %268 = tpu.dynamic_rotate %267 by %c767_i32_177 dim 1 : vector<8x768xf32>, i32 -> vector<8x768xf32>
    %c766_i32_178 = arith.constant 766 : i32
    %269 = tpu.dynamic_rotate %267 by %c766_i32_178 dim 1 : vector<8x768xf32>, i32 -> vector<8x768xf32>
    %c750_i32_179 = arith.constant 750 : i32
    %270 = tpu.dynamic_rotate %267 by %c750_i32_179 dim 1 : vector<8x768xf32>, i32 -> vector<8x768xf32>
    %c749_i32_180 = arith.constant 749 : i32
    %271 = tpu.dynamic_rotate %267 by %c749_i32_180 dim 1 : vector<8x768xf32>, i32 -> vector<8x768xf32>
    %c748_i32_181 = arith.constant 748 : i32
    %272 = tpu.dynamic_rotate %267 by %c748_i32_181 dim 1 : vector<8x768xf32>, i32 -> vector<8x768xf32>
    %c732_i32_182 = arith.constant 732 : i32
    %273 = tpu.dynamic_rotate %267 by %c732_i32_182 dim 1 : vector<8x768xf32>, i32 -> vector<8x768xf32>
    %c731_i32_183 = arith.constant 731 : i32
    %274 = tpu.dynamic_rotate %267 by %c731_i32_183 dim 1 : vector<8x768xf32>, i32 -> vector<8x768xf32>
    %c730_i32_184 = arith.constant 730 : i32
    %275 = tpu.dynamic_rotate %267 by %c730_i32_184 dim 1 : vector<8x768xf32>, i32 -> vector<8x768xf32>
    %276 = tpu.concatenate %267, %268, %269, %270, %271, %272, %273, %274, %275 in 0 : vector<8x768xf32>, vector<8x768xf32>, vector<8x768xf32>, vector<8x768xf32>, vector<8x768xf32>, vector<8x768xf32>, vector<8x768xf32>, vector<8x768xf32>, vector<8x768xf32> -> vector<72x768xf32>
    %277 = arith.truncf %276 : vector<72x768xf32> to vector<72x768xbf16>
    %cst_185 = arith.constant dense<0.000000e+00> : vector<8x768xf32>
    %278 = tpu.matmul %262, %277, %cst_185 {dimension_numbers = #tpu.dot_dimension_numbers<[1], [0], [0], [1], [0, 0, 1, 1], [], []>} : vector<8x72xbf16>, vector<72x768xbf16>, vector<8x768xf32> -> vector<8x768xf32>
    %279 = vector.broadcast %264 : vector<8x1xf32> to vector<8x768xf32>
    %280 = arith.addf %278, %279 : vector<8x768xf32>
    %281 = arith.addf %280, %238 : vector<8x768xf32>
    %c0_186 = arith.constant 0 : index
    %c0_187 = arith.constant 0 : index
    %282 = vector.load %arg6[%c0_186, %c0_187] : memref<8x8xbf16, #tpu.memory_space<vmem>>, vector<8x8xbf16>
    %283 = arith.truncf %281 : vector<8x768xf32> to vector<8x768xbf16>
    %cst_188 = arith.constant dense<0.000000e+00> : vector<8x768xf32>
    %284 = tpu.matmul %282, %283, %cst_188 {dimension_numbers = #tpu.dot_dimension_numbers<[1], [0], [0], [1], [0, 0, 1, 1], [], []>} : vector<8x8xbf16>, vector<8x768xbf16>, vector<8x768xf32> -> vector<8x768xf32>
    %c0_189 = arith.constant 0 : index
    %c0_190 = arith.constant 0 : index
    %285 = vector.load %arg7[%c0_189, %c0_190] : memref<8x1xf32, #tpu.memory_space<vmem>>, vector<8x1xf32>
    %286 = vector.broadcast %285 : vector<8x1xf32> to vector<8x768xf32>
    %287 = arith.addf %284, %286 : vector<8x768xf32>
    %288 = arith.negf %287 : vector<8x768xf32>
    %289 = math.exp %288 : vector<8x768xf32>
    %cst_191 = arith.constant 1.000000e+00 : f32
    %290 = vector.broadcast %cst_191 : f32 to vector<8x768xf32>
    %291 = arith.addf %290, %289 : vector<8x768xf32>
    %292 = arith.divf %290, %291 : vector<8x768xf32>
    %c0_192 = arith.constant 0 : index
    %c0_193 = arith.constant 0 : index
    %c0_194 = arith.constant 0 : index
    %293 = vector.load %arg10[%c0_192, %c0_193, %c0_194] : memref<1x8x768xf32, #tpu.memory_space<vmem>>, vector<1x8x768xf32>
    %294 = vector.shape_cast %293 : vector<1x8x768xf32> to vector<8x768xf32>
    %295 = vector.shape_cast %292 : vector<8x768xf32> to vector<1x8x768xf32>
    tpu.vector_store %arg10[%c0_192, %c0_193, %c0_194], %295 {strides = array<i32>} : memref<1x8x768xf32, #tpu.memory_space<vmem>>, vector<1x8x768xf32>,
    return
  }
  func.func @transform_0(%arg0: i32) -> (i32, i32, i32) {
    %c0_i32 = arith.constant 0 : i32
    %c0_i32_0 = arith.constant 0 : i32
    %c0_i32_1 = arith.constant 0 : i32
    return %arg0, %c0_i32, %c0_i32_0 : i32, i32, i32
  }
  func.func @transform_1(%arg0: i32) -> (i32, i32, i32) {
    %c0_i32 = arith.constant 0 : i32
    %c0_i32_0 = arith.constant 0 : i32
    %c0_i32_1 = arith.constant 0 : i32
    %c0_i32_2 = arith.constant 0 : i32
    return %c0_i32, %c0_i32_0, %c0_i32_1 : i32, i32, i32
  }
  func.func @transform_2(%arg0: i32) -> (i32, i32, i32) {
    %c0_i32 = arith.constant 0 : i32
    %c0_i32_0 = arith.constant 0 : i32
    %c0_i32_1 = arith.constant 0 : i32
    %c0_i32_2 = arith.constant 0 : i32
    return %c0_i32, %c0_i32_0, %c0_i32_1 : i32, i32, i32
  }
  func.func @transform_3(%arg0: i32) -> (i32, i32, i32) {
    %c0_i32 = arith.constant 0 : i32
    %c0_i32_0 = arith.constant 0 : i32
    %c0_i32_1 = arith.constant 0 : i32
    %c0_i32_2 = arith.constant 0 : i32
    return %c0_i32, %c0_i32_0, %c0_i32_1 : i32, i32, i32
  }
  func.func @transform_4(%arg0: i32) -> (i32, i32) {
    %c0_i32 = arith.constant 0 : i32
    %c0_i32_0 = arith.constant 0 : i32
    %c0_i32_1 = arith.constant 0 : i32
    return %c0_i32, %c0_i32_0 : i32, i32
  }
  func.func @transform_5(%arg0: i32) -> (i32, i32) {
    %c0_i32 = arith.constant 0 : i32
    %c0_i32_0 = arith.constant 0 : i32
    %c0_i32_1 = arith.constant 0 : i32
    return %c0_i32, %c0_i32_0 : i32, i32
  }
  func.func @transform_6(%arg0: i32) -> (i32, i32) {
    %c0_i32 = arith.constant 0 : i32
    %c0_i32_0 = arith.constant 0 : i32
    %c0_i32_1 = arith.constant 0 : i32
    return %c0_i32, %c0_i32_0 : i32, i32
  }
  func.func @transform_7(%arg0: i32) -> (i32, i32) {
    %c0_i32 = arith.constant 0 : i32
    %c0_i32_0 = arith.constant 0 : i32
    %c0_i32_1 = arith.constant 0 : i32
    return %c0_i32, %c0_i32_0 : i32, i32
  }
  func.func @transform_8(%arg0: i32) -> (i32, i32) {
    %c0_i32 = arith.constant 0 : i32
    %c0_i32_0 = arith.constant 0 : i32
    %c0_i32_1 = arith.constant 0 : i32
    return %c0_i32, %c0_i32_0 : i32, i32
  }
  func.func @transform_9(%arg0: i32) -> (i32, i32, i32) {
    %c0_i32 = arith.constant 0 : i32
    %c0_i32_0 = arith.constant 0 : i32
    %c0_i32_1 = arith.constant 0 : i32
    return %arg0, %c0_i32, %c0_i32_0 : i32, i32, i32
  }
}

</mosaic_0001>

<bundles_post_ra>
// kernel: tpu_custom_call.1
= control target key start
LH: loop header
LB: loop body
LE: loop exit
PB: predicated region body
PF: predicated region fallthrough
CT: control target
= control target key end

     0   :  { %14 = vsyncpa [#allocation3], 0  ;;  %s9310_s0 = inlined_call_operand.vmem [shape: f32[1,8,768], index: 0, kind: input, shape index: {}]   ;;  %s9311_s1 = inlined_call_operand.vmem [shape: bf16[9,8,72], index: 1, kind: input, shape index: {}]   ;;  %s9312_s2 = inlined_call_operand.vmem [shape: f32[9,8,1], index: 2, kind: input, shape index: {}]   ;;  %s9313_s3 = inlined_call_operand.hbm [shape: bf16[4,8,72], index: 3, kind: input, shape index: {}]   ;;  %s9314_s4 = inlined_call_operand.vmem [shape: f32[8,1], index: 4, kind: input, shape index: {}]   ;;  %s9315_s5 = inlined_call_operand.vmem [shape: bf16[8,8], index: 5, kind: input, shape index: {}]   ;;  %s9316_s6 = inlined_call_operand.vmem [shape: f32[8,1], index: 6, kind: input, shape index: {}]   ;;  %s9317_s7 = inlined_call_operand.hbm [shape: f32[1,768], index: 7, kind: input, shape index: {}]   ;;  %s9318_s8 = inlined_call_operand.vmem [shape: f32[1,768], index: 8, kind: input, shape index: {}]   ;;  %s9319_s9 = inlined_call_operand.hbm [shape: f32[1,8,768], index: 9, kind: output, shape index: {}]  }
   0x1   :  { %15 = vsyncpa [#allocation6], 0 }
   0x2   :  { %16 = vsyncpa [#allocation4], 0  ;;  %s27_s11 = sshll.u32 %s9313_s3, 4  ;;  %s5358_s12 = smov [#allocation2]   ;;  %s28_s11 = int_to_ptr.hbm [resolvable:$true] %s27_s11 }
   0x3   :  { %s29_s13 = sshll.u32 %s5358_s12, 4  ;;  %s47_s16 = sshll.u32 %s9317_s7, 4  ;;  %s30_s13 = int_to_ptr.vmem [resolvable:$true] %s29_s13  ;;  %s48_s16 = int_to_ptr.hbm [resolvable:$true] %s47_s16 }
   0x4   :  { %s5359_s17 = smov 64   ;;  %s5360_s18 = smov 4  }
   0x5   :  { %35 = dma.hbm_to_vmem [thread:$0]  %s28_s11, 256, %s30_s13, [#allocation3], %s5359_s17, %s5359_s17, %s5360_s18  }
   0x6   :  { %s5361_s19 = smov [#allocation5]  }
   0x7   :  { %s49_s20 = sshll.u32 %s5361_s19, 4  ;;  %s50_s20 = int_to_ptr.vmem [resolvable:$true] %s49_s20 }
   0x8   :  { %52 = dma.hbm_to_vmem [thread:$0]  %s48_s16, 96, %s50_s20, [#allocation6]  }
   0x9   :  { %5352 = dma.done.wait [#allocation3], 256  }
   0xa   :  { %5353 = vsyncadd [#allocation3], 4294967040 }
   0xb   :  { %5354 = dma.done.wait [#allocation6], 96  }
   0xc   :  { %5355 = vsyncadd [#allocation6], 4294967200  ;;  %v64_v0 = vld [vmem:[#allocation5] sm:$0x3f]  ;;  %v70_v1 = vld [vmem:[%s9310_s0 + $0x20] sm:$0xff]  ;;  %s5362_s10 = smov 19   ;;  %v105_v22 = vlaneseq }
   0xd   :  { %v71_v2 = vld [vmem:[%s9310_s0 + $0x28] sm:$0xff]  ;;  %v5443_v3 = vperm.slane %v64_v0, 4  ;;  %v5445_v4 = vperm.slane %v64_v0, 5  ;;  %v66_v5 = vld [vmem:[%s9310_s0] sm:$0xff]  ;;  %v5453_v7 = vperm.slane %v64_v0, 0  ;;  %v5455_v8 = vperm.slane %v64_v0, 1 }
   0xe   :  { %v67_v6 = vld [vmem:[%s9310_s0 + $0x8] sm:$0xff]  ;;  %v5457_v9 = vperm.slane %v64_v0, 2  ;;  %v5459_v10 = vperm.slane %v64_v0, 3  ;;  %v68_v15 = vld [vmem:[%s9310_s0 + $0x10] sm:$0xff]  ;;  %v69_v16 = vld [vmem:[%s9310_s0 + $0x18] sm:$0xff]  ;;  %v5476_v24 = vand.u32 127, %v105_v22 }
   0xf   :  { %9400 = vst [vmem:[#allocation11_spill] sm:$0xff] %v5443_v3  ;;  %v91_v11 = vmul.f32 %v5443_v3, %v70_v1  ;;  %v92_v12 = vmul.f32 %v5445_v4, %v71_v2  ;;  %v87_v13 = vmul.f32 %v5453_v7, %v66_v5  ;;  %v88_v14 = vmul.f32 %v5455_v8, %v67_v6  ;;  %s5363_s11 = smov 92   ;;  %s5364_s12 = smov 90  }
  0x10   :  { %9401 = vst [vmem:[#allocation12_spill] sm:$0xff] %v5445_v4  ;;  %v89_v19 = vmul.f32 %v5457_v9, %v68_v15  ;;  %v90_v20 = vmul.f32 %v5459_v10, %v69_v16  ;;  %vm107_vm0 = vcmp.lt.s32.totalorder %v5476_v24, 19  ;;  %s5365_s13 = smov 109   ;;  %s5366_s14 = smov 91   ;;  %vm259_vm1 = vcmp.lt.s32.totalorder %v5476_v24, 90 }
  0x11   :  { %9402 = vst [vmem:[#allocation13_spill] sm:$0xff] %v5457_v9  ;;  %v3982_v17 = vpack.i.bf16 %v91_v11, %v92_v12  ;;  %v3972_v18 = vpack.i.bf16 %v88_v14, %v87_v13  ;;  %s5367_s15 = smov 108   ;;  %s5368_s16 = smov 110   ;;  %vm305_vm2 = vcmask 1043456   ;;  %vm221_vm3 = vcmp.lt.s32.totalorder %v5476_v24, 92 }
  0x12   :  { %9403 = vst [vmem:[#allocation14_spill] sm:$0xff] %v5459_v10  ;;  %v3977_v21 = vpack.i.bf16 %v90_v20, %v89_v19  ;;  %s5369_s17 = smov 126   ;;  %s5370_s18 = smov 127   ;;  %vm240_vm4 = vcmp.lt.s32.totalorder %v5476_v24, 91  ;;  %vm183_vm5 = vcmp.lt.s32.totalorder %v5476_v24, 109  ;;  %vm202_vm6 = vcmp.lt.s32.totalorder %v5476_v24, 108 }
  0x13   :  { %3983 = vrot.lane.b32.xlu1 %v3982_v17, %s5362_s10  ;;  %3973 = vrot.lane.b32.xlu0 %v3972_v18, %s5362_s10  ;;  %vm164_vm7 = vcmp.lt.s32.totalorder %v5476_v24, 110  ;;  %vm145_vm8 = vcmp.lt.s32.totalorder %v5476_v24, 126  ;;  %vm9320_vm9 = vcmp.lt.s32.totalorder %v5476_v24, 127  ;;  %vm301_vm10 = vcmask 588800   ;;  %s5373_s28 = smov 54   ;;  %s5374_s29 = smov 56  }
  0x14   :  { %vm1067_vm11 = vcmp.lt.s32.totalorder %v5476_v24, 38  ;;  %s5375_s30 = smov 52   ;;  %s5376_s19 = smov 88   ;;  %vm1216_vm12 = vcmp.lt.s32.totalorder %v5476_v24, 52  ;;  %vm1197_vm13 = vcmp.lt.s32.totalorder %v5476_v24, 54  ;;  %vm1178_vm14 = vcmp.lt.s32.totalorder %v5476_v24, 56 }
  0x15   :  { %s5377_s20 = smov 124   ;;  %vm1159_vm15 = vcmp.lt.s32.totalorder %v5476_v24, 88 }
  0x1b   :  { %3978 = vrot.lane.b32.xlu0 %v3977_v21, %s5362_s10 }
  0x85   :  { %v3974_v23 = vpop.permute.xlu0 %3973  ;;  %v3984_v25 = vpop.permute.xlu1 %3983 }
  0x86   :  { %v3985_v26 = vunpack.i.l.bf16 %v3984_v25  ;;  %v3976_v27 = vunpack.i.h.bf16 %v3974_v23  ;;  %v3975_v28 = vunpack.i.l.bf16 %v3974_v23  ;;  %v3986_v38 = vunpack.i.h.bf16 %v3984_v25 }
  0x88   :  { %v5481_v32 = vsel %vm107_vm0, %v3975_v28, %v3976_v27  ;;  %v5485_v33 = vsel %vm107_vm0, %v3985_v26, %v3975_v28  ;;  %v5516_v39 = vsel %vm107_vm0, %v3986_v38, %v3985_v26 }
  0x8d   :  { %v3979_v29 = vpop.permute.xlu0 %3978 }
  0x8e   :  { %v3981_v30 = vunpack.i.h.bf16 %v3979_v29  ;;  %v3980_v31 = vunpack.i.l.bf16 %v3979_v29 }
  0x90   :  { %v5489_v34 = vsel %vm107_vm0, %v3980_v31, %v3981_v30  ;;  %v5493_v35 = vsel %vm107_vm0, %v3976_v27, %v3980_v31  ;;  %v5520_v40 = vsel %vm107_vm0, %v3981_v30, %v3986_v38 }
  0x91   :  { %v4002_v36 = vpack.i.bf16 %v5485_v33, %v5489_v34  ;;  %v3987_v37 = vpack.i.bf16 %v5493_v35, %v5481_v32  ;;  %v4077_v41 = vpack.i.bf16 %v5516_v39, %v5520_v40 }
  0x93   :  { %4003 = vrot.lane.b32.xlu0 %v4002_v36, %s5363_s11  ;;  %3993 = vrot.lane.b32.xlu2 %v4002_v36, %s5364_s12 }
  0x94   :  { %3988 = vrot.lane.b32.xlu1 %v3987_v37, %s5364_s12 }
  0x9b   :  { %4018 = vrot.lane.b32.xlu0 %v3987_v37, %s5365_s13  ;;  %3998 = vrot.lane.b32.xlu2 %v3987_v37, %s5363_s11 }
  0x9c   :  { %4008 = vrot.lane.b32.xlu1 %v3987_v37, %s5366_s14 }
  0xa3   :  { %4033 = vrot.lane.b32.xlu0 %v4002_v36, %s5367_s15  ;;  %4013 = vrot.lane.b32.xlu2 %v4002_v36, %s5366_s14 }
  0xa4   :  { %4023 = vrot.lane.b32.xlu1 %v4002_v36, %s5365_s13 }
  0xab   :  { %4048 = vrot.lane.b32.xlu0 %v3987_v37, %s5368_s16  ;;  %4028 = vrot.lane.b32.xlu2 %v3987_v37, %s5367_s15 }
  0xac   :  { %4038 = vrot.lane.b32.xlu1 %v3987_v37, %s5369_s17 }
  0xb3   :  { %4063 = vrot.lane.b32.xlu0 %v3987_v37, %s5370_s18  ;;  %4043 = vrot.lane.b32.xlu2 %v4002_v36, %s5369_s17 }
  0xb4   :  { %4053 = vrot.lane.b32.xlu1 %v4002_v36, %s5368_s16 }
  0xbb   :  { %4078 = vrot.lane.b32.xlu0 %v4077_v41, %s5366_s14  ;;  %4058 = vrot.lane.b32.xlu2 %v4077_v41, %s5364_s12 }
  0xbc   :  { %4068 = vrot.lane.b32.xlu1 %v4002_v36, %s5370_s18 }
  0xc3   :  { %4093 = vrot.lane.b32.xlu0 %v4077_v41, %s5369_s17  ;;  %4073 = vrot.lane.b32.xlu2 %v4077_v41, %s5363_s11 }
  0xc4   :  { %4083 = vrot.lane.b32.xlu1 %v4077_v41, %s5365_s13 }
  0xcb   :  { %4088 = vrot.lane.b32.xlu2 %v4077_v41, %s5367_s15 }
  0xcc   :  { %4098 = vrot.lane.b32.xlu1 %v4077_v41, %s5368_s16 }
  0xd3   :  { %4103 = vrot.lane.b32.xlu2 %v4077_v41, %s5370_s18 }
  0xed   :  { %v5533_v42 = vpop.permute.xlu2 %3993 }
  0xee   :  { %v3996_v48 = vunpack.i.h.bf16 %v5533_v42  ;;  %v3995_v49 = vunpack.i.l.bf16 %v5533_v42 }
  0xf5   :  { %v3999_v43 = vpop.permute.xlu2 %3998 }
  0xf6   :  { %v4001_v58 = vunpack.i.h.bf16 %v3999_v43  ;;  %v4000_v59 = vunpack.i.l.bf16 %v3999_v43 }
  0xf8   :  { %v225_v19 = vsel %vm221_vm3, %v4000_v59, %v4001_v58 }
  0xfd   :  { %v5535_v44 = vpop.permute.xlu2 %4013 }
  0xfe   :  { %v4016_v5 = vunpack.i.h.bf16 %v5535_v44  ;;  %v4015_v6 = vunpack.i.l.bf16 %v5535_v44 }
 0x105   :  { %v5537_v45 = vpop.permute.xlu0 %4003  ;;  %v5539_v46 = vpop.permute.xlu2 %4028 }
 0x106   :  { %v3989_v47 = vpop.permute.xlu1 %3988  ;;  %v4006_v60 = vunpack.i.h.bf16 %v5537_v45  ;;  %v4005_v0 = vunpack.i.l.bf16 %v5537_v45  ;;  %v4031_v16 = vunpack.i.h.bf16 %v5539_v46  ;;  %v4030_v17 = vunpack.i.l.bf16 %v5539_v46 }
 0x107   :  { %v3991_v50 = vunpack.i.h.bf16 %v3989_v47  ;;  %v3990_v51 = vunpack.i.l.bf16 %v3989_v47 }
 0x108   :  { %v226_v18 = vsel %vm221_vm3, %v4006_v60, %v4000_v59  ;;  %v224_v22 = vsel %vm221_vm3, %v4001_v58, %v4005_v0  ;;  %v206_v31 = vsel %vm202_vm6, %v4030_v17, %v4031_v16 }
 0x109   :  { %v264_v52 = vsel %vm259_vm1, %v3996_v48, %v3990_v51  ;;  %v263_v53 = vsel %vm259_vm1, %v3990_v51, %v3991_v50  ;;  %v262_v54 = vsel %vm259_vm1, %v3991_v50, %v3995_v49 }
 0x10a   :  { %v290_v55 = vpack.c.bf16 %v264_v52, %v264_v52  ;;  %v291_v56 = vpack.c.bf16 %v263_v53, %v263_v53  ;;  %v292_v57 = vpack.c.bf16 %v262_v54, %v262_v54 }
 0x10c   :  { %v307_v61 = vsel %vm305_vm2, %v290_v55, 0  ;;  %v310_v62 = vsel %vm305_vm2, %v291_v56, 0  ;;  %v313_v63 = vsel %vm305_vm2, %v292_v57, 0 }
 0x10d   :  { %327 = vmatpush.bf16.msra.mxu0 %v307_v61  ;;  %340 = vmatpush.bf16.msra.mxu1 %v310_v62  ;;  %v4019_v1 = vpop.permute.xlu0 %4018  ;;  %v5558_v2 = vpop.permute.xlu2 %4043 }
 0x10e   :  { %353 = vmatpush.bf16.msra.mxu2 %v313_v63  ;;  %v4009_v11 = vpop.permute.xlu1 %4008  ;;  %v4021_v12 = vunpack.i.h.bf16 %v4019_v1  ;;  %v4020_v13 = vunpack.i.l.bf16 %v4019_v1 }
 0x10f   :  { %v4011_v14 = vunpack.i.h.bf16 %v4009_v11  ;;  %v4010_v15 = vunpack.i.l.bf16 %v4009_v11  ;;  %v73_v11 = vld [vmem:[%s9312_s2] sm:$0xff] }
 0x110   :  { %v187_v28 = vsel %vm183_vm5, %v4020_v13, %v4021_v12 }
 0x111   :  { %v245_v20 = vsel %vm240_vm4, %v4016_v5, %v4010_v15  ;;  %v244_v21 = vsel %vm240_vm4, %v4010_v15, %v4011_v14  ;;  %v243_v23 = vsel %vm240_vm4, %v4011_v14, %v4015_v6  ;;  %v279_v43 = vpack.c.bf16 %v206_v31, %v187_v28 }
 0x112   :  { %v284_v25 = vpack.c.bf16 %v245_v20, %v226_v18  ;;  %v285_v26 = vpack.c.bf16 %v244_v21, %v225_v19  ;;  %v286_v27 = vpack.c.bf16 %v243_v23, %v224_v22  ;;  %v4046_v19 = vunpack.i.h.bf16 %v5558_v2 }
 0x113   :  { %v4045_v23 = vunpack.i.l.bf16 %v5558_v2 }
 0x114   :  { %328 = vmatpush.bf16.msra.mxu0 %v284_v25  ;;  %341 = vmatpush.bf16.msra.mxu1 %v285_v26 }
 0x115   :  { %354 = vmatpush.bf16.msra.mxu2 %v286_v27  ;;  %v5589_v29 = vpop.permute.xlu0 %4033  ;;  %v5591_v30 = vpop.permute.xlu2 %4058 }
 0x116   :  { %v4036_v36 = vunpack.i.h.bf16 %v5589_v29  ;;  %v4035_v37 = vunpack.i.l.bf16 %v5589_v29  ;;  %v4060_v38 = vunpack.i.l.bf16 %v5591_v30  ;;  %v5598_v41 = vpop.permute.xlu1 %4023  ;;  %v4061_v14 = vunpack.i.h.bf16 %v5591_v30 }
 0x117   :  { %v4026_v46 = vunpack.i.h.bf16 %v5598_v41  ;;  %v4025_v47 = vunpack.i.l.bf16 %v5598_v41 }
 0x118   :  { %342 = vmatpush.bf16.msra.mxu1 %v279_v43  ;;  %v207_v50 = vsel %vm202_vm6, %v4036_v36, %v4030_v17  ;;  %v205_v51 = vsel %vm202_vm6, %v4031_v16, %v4035_v37  ;;  %v261_v52 = vsel %vm259_vm1, %v3995_v49, %v4060_v38  ;;  %v265_v18 = vsel %vm259_vm1, %v4061_v14, %v3996_v48 }
 0x119   :  { %v188_v53 = vsel %vm183_vm5, %v4026_v46, %v4020_v13  ;;  %v186_v54 = vsel %vm183_vm5, %v4021_v12, %v4025_v47  ;;  %v293_v55 = vpack.c.bf16 %v261_v52, %v261_v52  ;;  %v5371_v13 = vmov 0  }
 0x11a   :  { %v278_v56 = vpack.c.bf16 %v207_v50, %v188_v53  ;;  %v280_v57 = vpack.c.bf16 %v205_v51, %v186_v54  ;;  %4107 = vset.pattern.permute.xlu0 %v5371_v13  ;;  %4243 = vset.pattern.permute.xlu2 %v5371_v13  ;;  %v295_v28 = vpack.c.bf16 %v265_v18, %v265_v18  ;;  %v5666_v54 = vld [vmem:[%s9311_s1] sm:$0xf] }
 0x11b   :  { %v316_v58 = vsel %vm305_vm2, %v293_v55, 0  ;;  %298 = vperm.xlu0 %4107, %v73_v11   ;;  %4514 = vset.pattern.permute.xlu1 %v5371_v13 }
 0x11c   :  { %329 = vmatpush.bf16.msra.mxu0 %v278_v56  ;;  %355 = vmatpush.bf16.msra.mxu2 %v280_v57  ;;  %v322_v56 = vsel %vm305_vm2, %v295_v28, 0  ;;  %v260_v57 = vsel %vm259_vm1, %v4060_v38, %v4061_v14 }
 0x11d   :  { %366 = vmatpush.bf16.msra.mxu3 %v316_v58  ;;  %v4049_v59 = vpop.permute.xlu0 %4048  ;;  %v4074_v25 = vpop.permute.xlu2 %4073 }
 0x11e   :  { %v4051_v49 = vunpack.i.h.bf16 %v4049_v59  ;;  %v4050_v61 = vunpack.i.l.bf16 %v4049_v59  ;;  %v4039_v62 = vpop.permute.xlu1 %4038  ;;  %v4075_v55 = vunpack.i.l.bf16 %v4074_v25 }
 0x11f   :  { %v4041_v63 = vunpack.i.h.bf16 %v4039_v62  ;;  %v4040_v1 = vunpack.i.l.bf16 %v4039_v62 }
 0x120   :  { %v168_v12 = vsel %vm164_vm7, %v4050_v61, %v4051_v49  ;;  %v223_v30 = vsel %vm221_vm3, %v4005_v0, %v4075_v55 }
 0x121   :  { %v149_v15 = vsel %vm145_vm8, %v4040_v1, %v4041_v63  ;;  %v150_v42 = vsel %vm145_vm8, %v4046_v19, %v4040_v1  ;;  %v148_v50 = vsel %vm145_vm8, %v4041_v63, %v4045_v23  ;;  %v294_v1 = vpack.c.bf16 %v260_v57, %v260_v57 }
 0x122   :  { %v273_v16 = vpack.c.bf16 %v168_v12, %v149_v15 }
 0x124   :  { %343 = vmatpush.bf16.msra.mxu1 %v273_v16 }
 0x125   :  { %v4064_v17 = vpop.permute.xlu0 %4063  ;;  %v4089_v13 = vpop.permute.xlu2 %4088 }
 0x126   :  { %v4066_v20 = vunpack.i.h.bf16 %v4064_v17  ;;  %v4065_v21 = vunpack.i.l.bf16 %v4064_v17  ;;  %v5639_v22 = vpop.permute.xlu1 %4053  ;;  %v4091_v44 = vunpack.i.h.bf16 %v4089_v13  ;;  %v4090_v16 = vunpack.i.l.bf16 %v4089_v13 }
 0x127   :  { %v4056_v26 = vunpack.i.h.bf16 %v5639_v22  ;;  %v4055_v27 = vunpack.i.l.bf16 %v5639_v22 }
 0x128   :  { %v130_v48 = vsel %vm9320_vm9, %v4065_v21, %v4066_v20  ;;  %v203_v29 = vsel %vm202_vm6, %v4090_v16, %v4091_v44 }
 0x129   :  { %v169_v31 = vsel %vm164_vm7, %v4056_v26, %v4050_v61  ;;  %v267_v43 = vpack.c.bf16 %v130_v48, %v5481_v32  ;;  %v167_v51 = vsel %vm164_vm7, %v4051_v49, %v4055_v27  ;;  %v4076_v32 = vunpack.i.h.bf16 %v4074_v25 }
 0x12a   :  { %v272_v52 = vpack.c.bf16 %v169_v31, %v150_v42  ;;  %v274_v53 = vpack.c.bf16 %v167_v51, %v148_v50  ;;  %v204_v25 = vsel %vm202_vm6, %v4035_v37, %v4090_v16  ;;  %v208_v42 = vsel %vm202_vm6, %v4091_v44, %v4036_v36 }
 0x12b   :  { %344 = vmatpush.bf16.msra.mxu1 %v267_v43  ;;  %v227_v11 = vsel %vm221_vm3, %v4076_v32, %v4006_v60 }
 0x12c   :  { %330 = vmatpush.bf16.msra.mxu0 %v272_v52  ;;  %356 = vmatpush.bf16.msra.mxu2 %v274_v53 }
 0x12d   :  { %v4079_v58 = vpop.permute.xlu0 %4078  ;;  %v4104_v51 = vpop.permute.xlu2 %4103 }
 0x12e   :  { %v4081_v59 = vunpack.i.h.bf16 %v4079_v58  ;;  %v4080_v49 = vunpack.i.l.bf16 %v4079_v58  ;;  %v5673_v61 = vpop.permute.xlu1 %4068  ;;  %3844 = vmatmul.msk.bf16.vlgmr.msra.gmra.mxu1 %vm301_vm10, %v5666_v54  ;;  %v4106_v41 = vunpack.i.h.bf16 %v4104_v51 }
 0x12f   :  { %392 = vmatpush.bf16.msrb.mxu1 %v322_v56  ;;  %v4071_v62 = vunpack.i.h.bf16 %v5673_v61  ;;  %v4070_v63 = vunpack.i.l.bf16 %v5673_v61 }
 0x130   :  { %v242_v38 = vsel %vm240_vm4, %v4015_v6, %v4080_v49  ;;  %v246_v12 = vsel %vm240_vm4, %v4081_v59, %v4016_v5  ;;  %v319_v5 = vsel %vm305_vm2, %v294_v1, 0  ;;  %v241_v17 = vsel %vm240_vm4, %v4080_v49, %v4081_v59 }
 0x131   :  { %v131_v0 = vsel %vm9320_vm9, %v4071_v62, %v4065_v21  ;;  %v129_v14 = vsel %vm9320_vm9, %v4066_v20, %v4070_v63  ;;  %v287_v6 = vpack.c.bf16 %v242_v38, %v223_v30  ;;  %v289_v15 = vpack.c.bf16 %v246_v12, %v227_v11 }
 0x132   :  { %v266_v45 = vpack.c.bf16 %v131_v0, %v5485_v33  ;;  %v268_v60 = vpack.c.bf16 %v129_v14, %v5493_v35  ;;  %v222_v20 = vsel %vm221_vm3, %v4075_v55, %v4076_v32  ;;  %v4105_v32 = vunpack.i.l.bf16 %v4104_v51 }
 0x133   :  { %367 = vmatpush.bf16.msra.mxu3 %v287_v6  ;;  %393 = vmatpush.bf16.msrb.mxu1 %v289_v15  ;;  %v288_v35 = vpack.c.bf16 %v241_v17, %v222_v20  ;;  %v132_v2 = vsel %vm9320_vm9, %v4106_v41, %v4071_v62 }
 0x134   :  { %331 = vmatpush.bf16.msra.mxu0 %v266_v45  ;;  %357 = vmatpush.bf16.msra.mxu2 %v268_v60  ;;  %v128_v11 = vsel %vm9320_vm9, %v4070_v63, %v4105_v32 }
 0x135   :  { %v4094_v48 = vpop.permute.xlu0 %4093 }
 0x136   :  { %v4084_v18 = vpop.permute.xlu1 %4083  ;;  %v4096_v52 = vunpack.i.h.bf16 %v4094_v48  ;;  %v4095_v53 = vunpack.i.l.bf16 %v4094_v48 }
 0x137   :  { %v4086_v21 = vunpack.i.h.bf16 %v4084_v18  ;;  %v4085_v33 = vunpack.i.l.bf16 %v4084_v18  ;;  %3843 = vmatmul.msk.bf16.vlgmr.msra.gmra.mxu0 %vm301_vm10, %v5666_v54  ;;  %3845 = vmatmul.msk.bf16.vlgmr.msra.gmra.mxu2 %vm301_vm10, %v5666_v54 }
 0x138   :  { %379 = vmatpush.bf16.msrb.mxu0 %v319_v5  ;;  %v147_v56 = vsel %vm145_vm8, %v4045_v23, %v4095_v53  ;;  %v146_v57 = vsel %vm145_vm8, %v4095_v53, %v4096_v52  ;;  %v151_v49 = vsel %vm145_vm8, %v4096_v52, %v4046_v19  ;;  %v269_v19 = vpack.c.bf16 %v128_v11, %v5489_v34 }
 0x139   :  { %v185_v28 = vsel %vm183_vm5, %v4025_v47, %v4085_v33  ;;  %v189_v31 = vsel %vm183_vm5, %v4086_v21, %v4026_v46  ;;  %v184_v37 = vsel %vm183_vm5, %v4085_v33, %v4086_v21 }
 0x13a   :  { %v281_v43 = vpack.c.bf16 %v204_v25, %v185_v28  ;;  %v283_v36 = vpack.c.bf16 %v208_v42, %v189_v31  ;;  %v282_v50 = vpack.c.bf16 %v203_v29, %v184_v37 }
 0x13c   :  { %380 = vmatpush.bf16.msrb.mxu0 %v288_v35  ;;  %368 = vmatpush.bf16.msra.mxu3 %v281_v43 }
 0x13d   :  { %394 = vmatpush.bf16.msrb.mxu1 %v283_v36 }
 0x13e   :  { %v4099_v47 = vpop.permute.xlu1 %4098 }
 0x13f   :  { %v4101_v55 = vunpack.i.h.bf16 %v4099_v47  ;;  %v4100_v46 = vunpack.i.l.bf16 %v4099_v47 }
 0x140   :  { %381 = vmatpush.bf16.msrb.mxu0 %v282_v50 }
 0x141   :  { %v166_v58 = vsel %vm164_vm7, %v4055_v27, %v4100_v46  ;;  %v165_v59 = vsel %vm164_vm7, %v4100_v46, %v4101_v55  ;;  %v170_v23 = vsel %vm164_vm7, %v4101_v55, %v4056_v26  ;;  %v127_v27 = vsel %vm9320_vm9, %v4105_v32, %v4106_v41 }
 0x142   :  { %v275_v1 = vpack.c.bf16 %v166_v58, %v147_v56  ;;  %v276_v30 = vpack.c.bf16 %v165_v59, %v146_v57  ;;  %v277_v38 = vpack.c.bf16 %v170_v23, %v151_v49  ;;  %v270_v22 = vpack.c.bf16 %v127_v27, %v5520_v40 }
 0x143   :  { %v271_v26 = vpack.c.bf16 %v132_v2, %v5516_v39 }
 0x144   :  { %369 = vmatpush.bf16.msra.mxu3 %v275_v1  ;;  %382 = vmatpush.bf16.msrb.mxu0 %v276_v30 }
 0x145   :  { %395 = vmatpush.bf16.msrb.mxu1 %v277_v38 }
 0x148   :  { %370 = vmatpush.bf16.msra.mxu3 %v269_v19  ;;  %383 = vmatpush.bf16.msrb.mxu0 %v270_v22 }
 0x149   :  { %396 = vmatpush.bf16.msrb.mxu1 %v271_v26 }
 0x14b   :  { %3846 = vmatmul.msk.bf16.vlgmr.msra.gmra.mxu3 %vm301_vm10, %v5666_v54  ;;  %3847 = vmatmul.msk.bf16.vlgmr.msrb.gmra.mxu0 %vm301_vm10, %v5666_v54 }
 0x14c   :  { %3848 = vmatmul.msk.bf16.vlgmr.msrb.gmra.mxu1 %vm301_vm10, %v5666_v54 }
 0x18d   :  { %v299_v62 = vpop.permute.xlu0 %298 }
 0x1ab   :  { %v346_v61 = vpop.f32.mrf.mxu1 }
 0x1ac   :  { %v347_v63 = vadd.f32 %v346_v61, %v299_v62 }
 0x1ae   :  { %v403_v12 = vmax.f32 %v347_v63, 0.0 }
 0x1b0   :  { %v413_v0 = vmul.f32 %v403_v12, %v5455_v8 }
 0x1b3   :  { %v348_v34 = vpop.f32.mrf.mxu1 }
 0x1b4   :  { %v333_v40 = vpop.f32.mrf.mxu0 }
 0x1b5   :  { %v334_v13 = vadd.f32 %v333_v40, %v299_v62 }
 0x1b7   :  { %v402_v39 = vmax.f32 %v334_v13, 0.0 }
 0x1b9   :  { %v412_v14 = vmul.f32 %v402_v39, %v5453_v7 }
 0x1ba   :  { %v359_v6 = vpop.f32.mrf.mxu2 }
 0x1bb   :  { %v4108_v15 = vpack.i.bf16 %v413_v0, %v412_v14  ;;  %v360_v44 = vadd.f32 %v359_v6, %v299_v62 }
 0x1bc   :  { %v335_v45 = vpop.f32.mrf.mxu0 }
 0x1bd   :  { %4109 = vrot.lane.b32.xlu1 %v4108_v15, %s5362_s10  ;;  %v404_v5 = vmax.f32 %v360_v44, 0.0 }
 0x1bf   :  { %v414_v21 = vmul.f32 %v404_v5, %v5457_v9 }
 0x1c2   :  { %v361_v60 = vpop.f32.mrf.mxu2 }
 0x1c8   :  { %v385_v54 = vpop.f32.mrf.mxu0 }
 0x1c9   :  { %v398_v16 = vpop.f32.mrf.mxu1  ;;  %v386_v18 = vadd.f32 %v385_v54, %v299_v62 }
 0x1ca   :  { %v399_v17 = vadd.f32 %v398_v16, %v299_v62 }
 0x1cb   :  { %v406_v25 = vmax.f32 %v386_v18, 0.0 }
 0x1cc   :  { %v407_v20 = vmax.f32 %v399_v17, 0.0 }
 0x1cd   :  { %v416_v29 = vmul.f32 %v406_v25, %v5443_v3 }
 0x1ce   :  { %v417_v33 = vmul.f32 %v407_v20, %v5445_v4  ;;  %v372_v35 = vpop.f32.mrf.mxu3 }
 0x1cf   :  { %v373_v42 = vadd.f32 %v372_v35, %v299_v62 }
 0x1d0   :  { %v387_v48 = vpop.f32.mrf.mxu0  ;;  %v4113_v28 = vpack.i.bf16 %v417_v33, %v414_v21 }
 0x1d1   :  { %v405_v31 = vmax.f32 %v373_v42, 0.0  ;;  %v400_v37 = vpop.f32.mrf.mxu1 }
 0x1d2   :  { %4114 = vrot.lane.b32.xlu2 %v4113_v28, %s5362_s10 }
 0x1d3   :  { %v415_v43 = vmul.f32 %v405_v31, %v5459_v10 }
 0x1d5   :  { %v4118_v36 = vpack.i.bf16 %v416_v29, %v415_v43 }
 0x1d6   :  { %v374_v50 = vpop.f32.mrf.mxu3 }
 0x1d7   :  { %4119 = vrot.lane.b32.xlu1 %v4118_v36, %s5362_s10 }
 0x22c   :  { %v4115_v51 = vpop.permute.xlu2 %4114 }
 0x22d   :  { %v4116_v53 = vunpack.i.l.bf16 %v4115_v51  ;;  %v4117_v57 = vunpack.i.h.bf16 %v4115_v51 }
 0x22f   :  { %v4110_v52 = vpop.permute.xlu1 %4109 }
 0x230   :  { %v4112_v47 = vunpack.i.h.bf16 %v4110_v52  ;;  %v4111_v41 = vunpack.i.l.bf16 %v4110_v52 }
 0x232   :  { %v5780_v32 = vsel %vm107_vm0, %v4112_v47, %v4116_v53  ;;  %v5784_v55 = vsel %vm107_vm0, %v4111_v41, %v4112_v47  ;;  %v5798_v49 = vsel %vm107_vm0, %v4117_v57, %v4111_v41 }
 0x233   :  { %v4133_v46 = vpack.i.bf16 %v5780_v32, %v5784_v55 }
 0x235   :  { %4134 = vrot.lane.b32.xlu1 %v4133_v46, %s5366_s14  ;;  %4129 = vrot.lane.b32.xlu0 %v4133_v46, %s5363_s11 }
 0x236   :  { %4124 = vrot.lane.b32.xlu2 %v4133_v46, %s5364_s12 }
 0x23d   :  { %4159 = vrot.lane.b32.xlu1 %v4133_v46, %s5370_s18  ;;  %4144 = vrot.lane.b32.xlu0 %v4133_v46, %s5367_s15 }
 0x23e   :  { %4139 = vrot.lane.b32.xlu2 %v4133_v46, %s5365_s13 }
 0x245   :  { %4154 = vrot.lane.b32.xlu0 %v4133_v46, %s5368_s16 }
 0x246   :  { %4149 = vrot.lane.b32.xlu2 %v4133_v46, %s5369_s17 }
 0x249   :  { %v4120_v56 = vpop.permute.xlu1 %4119 }
 0x24a   :  { %v4122_v58 = vunpack.i.h.bf16 %v4120_v56  ;;  %v4121_v59 = vunpack.i.l.bf16 %v4120_v56 }
 0x24c   :  { %v5802_v23 = vsel %vm107_vm0, %v4122_v58, %v4117_v57  ;;  %v5806_v1 = vsel %vm107_vm0, %v4121_v59, %v4122_v58  ;;  %v5810_v30 = vsel %vm107_vm0, %v4116_v53, %v4121_v59  ;;  %v5917_v57 = vld [vmem:[%s9311_s1 + $0x4] sm:$0xf] }
 0x24d   :  { %v4163_v38 = vpack.i.bf16 %v5810_v30, %v5798_v49  ;;  %v4178_v11 = vpack.i.bf16 %v5802_v23, %v5806_v1 }
 0x24f   :  { %4164 = vrot.lane.b32.xlu1 %v4163_v38, %s5364_s12  ;;  %4179 = vrot.lane.b32.xlu0 %v4178_v11, %s5364_s12 }
 0x250   :  { %4174 = vrot.lane.b32.xlu2 %v4163_v38, %s5366_s14 }
 0x257   :  { %4169 = vrot.lane.b32.xlu1 %v4163_v38, %s5363_s11  ;;  %4189 = vrot.lane.b32.xlu0 %v4163_v38, %s5367_s15 }
 0x258   :  { %4184 = vrot.lane.b32.xlu2 %v4163_v38, %s5365_s13 }
 0x25f   :  { %4194 = vrot.lane.b32.xlu1 %v4178_v11, %s5363_s11  ;;  %4204 = vrot.lane.b32.xlu0 %v4163_v38, %s5369_s17 }
 0x260   :  { %4199 = vrot.lane.b32.xlu2 %v4178_v11, %s5366_s14 }
 0x267   :  { %4209 = vrot.lane.b32.xlu1 %v4163_v38, %s5368_s16  ;;  %4219 = vrot.lane.b32.xlu0 %v4178_v11, %s5367_s15 }
 0x268   :  { %4214 = vrot.lane.b32.xlu2 %v4178_v11, %s5365_s13 }
 0x26f   :  { %4224 = vrot.lane.b32.xlu1 %v4163_v38, %s5370_s18  ;;  %4234 = vrot.lane.b32.xlu0 %v4178_v11, %s5368_s16 }
 0x270   :  { %4229 = vrot.lane.b32.xlu2 %v4178_v11, %s5369_s17 }
 0x277   :  { %4239 = vrot.lane.b32.xlu1 %v4178_v11, %s5370_s18 }
 0x290   :  { %v4125_v27 = vpop.permute.xlu2 %4124 }
 0x291   :  { %v4127_v2 = vunpack.i.h.bf16 %v4125_v27  ;;  %v4126_v19 = vunpack.i.l.bf16 %v4125_v27 }
 0x293   :  { %v577_v22 = vsel %vm259_vm1, %v4126_v19, %v4127_v2 }
 0x294   :  { %v605_v26 = vpack.c.bf16 %v577_v22, %v577_v22 }
 0x296   :  { %v622_v61 = vsel %vm305_vm2, %v605_v26, 0 }
 0x297   :  { %652 = vmatpush.bf16.msrb.mxu3 %v622_v61 }
 0x298   :  { %v5835_v62 = vpop.permute.xlu2 %4139 }
 0x299   :  { %v4142_v15 = vunpack.i.h.bf16 %v5835_v62  ;;  %v4141_v45 = vunpack.i.l.bf16 %v5835_v62 }
 0x29b   :  { %v505_v5 = vsel %vm183_vm5, %v4141_v45, %v4142_v15 }
 0x2a0   :  { %v5859_v60 = vpop.permute.xlu2 %4149 }
 0x2a1   :  { %v4152_v21 = vunpack.i.h.bf16 %v5859_v60  ;;  %v4151_v33 = vunpack.i.l.bf16 %v5859_v60 }
 0x2a3   :  { %v469_v37 = vsel %vm145_vm8, %v4151_v33, %v4152_v21 }
 0x2a7   :  { %v5837_v63 = vpop.permute.xlu1 %4134  ;;  %v5839_v34 = vpop.permute.xlu0 %4129 }
 0x2a8   :  { %v4137_v12 = vunpack.i.h.bf16 %v5837_v63  ;;  %v4136_v40 = vunpack.i.l.bf16 %v5837_v63  ;;  %v4132_v13 = vunpack.i.h.bf16 %v5839_v34  ;;  %v4131_v39 = vunpack.i.l.bf16 %v5839_v34 }
 0x2aa   :  { %v541_v0 = vsel %vm221_vm3, %v4131_v39, %v4132_v13  ;;  %v559_v14 = vsel %vm240_vm4, %v4136_v40, %v4137_v12  ;;  %v5881_v35 = vpop.permute.xlu2 %4174 }
 0x2ab   :  { %v599_v6 = vpack.c.bf16 %v559_v14, %v541_v0  ;;  %v4177_v26 = vunpack.i.h.bf16 %v5881_v35 }
 0x2ad   :  { %653 = vmatpush.bf16.msrb.mxu3 %v599_v6 }
 0x2af   :  { %v5861_v44 = vpop.permute.xlu0 %4144  ;;  %v5877_v20 = vpop.permute.xlu1 %4159 }
 0x2b0   :  { %v4147_v54 = vunpack.i.h.bf16 %v5861_v44  ;;  %v4146_v16 = vunpack.i.l.bf16 %v5861_v44  ;;  %v4162_v42 = vunpack.i.h.bf16 %v5877_v20  ;;  %v4161_v48 = vunpack.i.l.bf16 %v5877_v20 }
 0x2b2   :  { %v523_v17 = vsel %vm202_vm6, %v4146_v16, %v4147_v54  ;;  %v451_v36 = vsel %vm9320_vm9, %v4161_v48, %v4162_v42  ;;  %v5908_v51 = vpop.permute.xlu2 %4184 }
 0x2b3   :  { %v593_v18 = vpack.c.bf16 %v523_v17, %v505_v5  ;;  %v581_v50 = vpack.c.bf16 %v451_v36, %v5784_v55 }
 0x2b5   :  { %654 = vmatpush.bf16.msrb.mxu3 %v593_v18 }
 0x2b7   :  { %v5883_v25 = vpop.permute.xlu0 %4154 }
 0x2b8   :  { %v4157_v28 = vunpack.i.h.bf16 %v5883_v25  ;;  %v4156_v31 = vunpack.i.l.bf16 %v5883_v25 }
 0x2ba   :  { %v487_v29 = vsel %vm164_vm7, %v4156_v31, %v4157_v28  ;;  %v5939_v18 = vpop.permute.xlu2 %4199 }
 0x2bb   :  { %v587_v43 = vpack.c.bf16 %v487_v29, %v469_v37  ;;  %v4201_v34 = vunpack.i.l.bf16 %v5939_v18 }
 0x2bd   :  { %655 = vmatpush.bf16.msrb.mxu3 %v587_v43 }
 0x2c1   :  { %v4165_v52 = vpop.permute.xlu1 %4164  ;;  %v5910_v53 = vpop.permute.xlu0 %4179  ;;  %656 = vmatpush.bf16.msrb.mxu3 %v581_v50  ;;  %v558_v50 = vsel %vm240_vm4, %v4137_v12, %v4177_v26 }
 0x2c2   :  { %v4167_v47 = vunpack.i.h.bf16 %v4165_v52  ;;  %v4166_v41 = vunpack.i.l.bf16 %v4165_v52  ;;  %v4182_v46 = vunpack.i.h.bf16 %v5910_v53  ;;  %v4181_v56 = vunpack.i.l.bf16 %v5910_v53 }
 0x2c3   :  { %v4187_v52 = vunpack.i.h.bf16 %v5908_v51 }
 0x2c4   :  { %v578_v55 = vsel %vm259_vm1, %v4166_v41, %v4126_v19  ;;  %v576_v58 = vsel %vm259_vm1, %v4127_v2, %v4167_v47  ;;  %v575_v59 = vsel %vm259_vm1, %v4167_v47, %v4181_v56  ;;  %v579_v38 = vsel %vm259_vm1, %v4182_v46, %v4166_v41  ;;  %3852 = vmatmul.msk.bf16.vlgmr.msrb.gmra.mxu3 %vm301_vm10, %v5917_v57 }
 0x2c5   :  { %v604_v11 = vpack.c.bf16 %v578_v55, %v578_v55  ;;  %v606_v27 = vpack.c.bf16 %v576_v58, %v576_v58  ;;  %v607_v22 = vpack.c.bf16 %v575_v59, %v575_v59  ;;  %v609_v19 = vpack.c.bf16 %v579_v38, %v579_v38 }
 0x2c6   :  { %v4176_v2 = vunpack.i.l.bf16 %v5881_v35  ;;  %v4186_v47 = vunpack.i.l.bf16 %v5908_v51  ;;  %v574_v25 = vsel %vm259_vm1, %v4181_v56, %v4182_v46 }
 0x2c7   :  { %v619_v61 = vsel %vm305_vm2, %v604_v11, 0  ;;  %v625_v0 = vsel %vm305_vm2, %v606_v27, 0  ;;  %v628_v14 = vsel %vm305_vm2, %v607_v22, 0  ;;  %v634_v6 = vsel %vm305_vm2, %v609_v19, 0  ;;  %v5981_v27 = vpop.permute.xlu2 %4214 }
 0x2c8   :  { %639 = vmatpush.bf16.msrb.mxu2 %v619_v61  ;;  %665 = vmatpush.bf16.msra.mxu0 %v625_v0  ;;  %v560_v36 = vsel %vm240_vm4, %v4176_v2, %v4136_v40  ;;  %v4217_v0 = vunpack.i.h.bf16 %v5981_v27 }
 0x2c9   :  { %678 = vmatpush.bf16.msra.mxu1 %v628_v14  ;;  %704 = vmatpush.bf16.msra.mxu3 %v634_v6  ;;  %v4170_v5 = vpop.permute.xlu1 %4169  ;;  %v4190_v17 = vpop.permute.xlu0 %4189  ;;  %v4216_v14 = vunpack.i.l.bf16 %v5981_v27 }
 0x2ca   :  { %v4172_v37 = vunpack.i.h.bf16 %v4170_v5  ;;  %v4171_v29 = vunpack.i.l.bf16 %v4170_v5  ;;  %v4192_v43 = vunpack.i.h.bf16 %v4190_v17  ;;  %v4191_v35 = vunpack.i.l.bf16 %v4190_v17 }
 0x2cc   :  { %v542_v41 = vsel %vm221_vm3, %v4171_v29, %v4131_v39  ;;  %v540_v55 = vsel %vm221_vm3, %v4132_v13, %v4172_v37  ;;  %v524_v63 = vsel %vm202_vm6, %v4191_v35, %v4146_v16  ;;  %v522_v12 = vsel %vm202_vm6, %v4147_v54, %v4192_v43 }
 0x2cd   :  { %v598_v40 = vpack.c.bf16 %v560_v36, %v542_v41  ;;  %v600_v58 = vpack.c.bf16 %v558_v50, %v540_v55  ;;  %v4202_v39 = vunpack.i.h.bf16 %v5939_v18  ;;  %v506_v13 = vsel %vm183_vm5, %v4186_v47, %v4141_v45 }
 0x2ce   :  { %v504_v16 = vsel %vm183_vm5, %v4142_v15, %v4187_v52  ;;  %v592_v54 = vpack.c.bf16 %v524_v63, %v506_v13  ;;  %v557_v15 = vsel %vm240_vm4, %v4177_v26, %v4201_v34  ;;  %v503_v55 = vsel %vm183_vm5, %v4187_v52, %v4216_v14 }
 0x2cf   :  { %640 = vmatpush.bf16.msrb.mxu2 %v598_v40  ;;  %666 = vmatpush.bf16.msra.mxu0 %v600_v58  ;;  %v594_v59 = vpack.c.bf16 %v522_v12, %v504_v16  ;;  %v561_v22 = vsel %vm240_vm4, %v4202_v39, %v4176_v2  ;;  %v507_v40 = vsel %vm183_vm5, %v4217_v0, %v4186_v47  ;;  %v3850_v47 = vld [vmem:[%s9312_s2 + $0x8] sm:$0xff] }
 0x2d0   :  { %612 = vperm.xlu2 %4243, %v3850_v47   ;;  %v502_v18 = vsel %vm183_vm5, %v4216_v14, %v4217_v0 }
 0x2d1   :  { %v5977_v44 = vpop.permute.xlu1 %4194  ;;  %v4205_v51 = vpop.permute.xlu0 %4204 }
 0x2d2   :  { %v4197_v38 = vunpack.i.h.bf16 %v5977_v44  ;;  %v4196_v11 = vunpack.i.l.bf16 %v5977_v44  ;;  %v4207_v6 = vunpack.i.h.bf16 %v4205_v51  ;;  %v4206_v5 = vunpack.i.l.bf16 %v4205_v51 }
 0x2d3   :  { %641 = vmatpush.bf16.msrb.mxu2 %v592_v54  ;;  %667 = vmatpush.bf16.msra.mxu0 %v594_v59 }
 0x2d4   :  { %v539_v62 = vsel %vm221_vm3, %v4172_v37, %v4196_v11  ;;  %v543_v45 = vsel %vm221_vm3, %v4197_v38, %v4171_v29  ;;  %v470_v2 = vsel %vm145_vm8, %v4206_v5, %v4151_v33  ;;  %v468_v41 = vsel %vm145_vm8, %v4152_v21, %v4207_v6 }
 0x2d5   :  { %v601_v19 = vpack.c.bf16 %v557_v15, %v539_v62  ;;  %v603_v61 = vpack.c.bf16 %v561_v22, %v543_v45  ;;  %v608_v22 = vpack.c.bf16 %v574_v25, %v574_v25 }
 0x2d7   :  { %679 = vmatpush.bf16.msra.mxu1 %v601_v19  ;;  %705 = vmatpush.bf16.msra.mxu3 %v603_v61  ;;  %v631_v20 = vsel %vm305_vm2, %v608_v22, 0 }
 0x2d9   :  { %v4210_v26 = vpop.permute.xlu1 %4209  ;;  %v4220_v17 = vpop.permute.xlu0 %4219 }
 0x2da   :  { %v4212_v37 = vunpack.i.h.bf16 %v4210_v26  ;;  %v4211_v36 = vunpack.i.l.bf16 %v4210_v26  ;;  %v4222_v29 = vunpack.i.h.bf16 %v4220_v17  ;;  %v4221_v50 = vunpack.i.l.bf16 %v4220_v17 }
 0x2dc   :  { %v488_v33 = vsel %vm164_vm7, %v4211_v36, %v4156_v31  ;;  %v486_v60 = vsel %vm164_vm7, %v4157_v28, %v4212_v37  ;;  %v521_v21 = vsel %vm202_vm6, %v4192_v43, %v4221_v50  ;;  %v525_v52 = vsel %vm202_vm6, %v4222_v29, %v4191_v35  ;;  %v4230_v31 = vpop.permute.xlu2 %4229 }
 0x2dd   :  { %v586_v58 = vpack.c.bf16 %v488_v33, %v470_v2  ;;  %v588_v63 = vpack.c.bf16 %v486_v60, %v468_v41  ;;  %v595_v12 = vpack.c.bf16 %v521_v21, %v503_v55  ;;  %v597_v13 = vpack.c.bf16 %v525_v52, %v507_v40  ;;  %v5274_v33 = vld [vmem:[%s9310_s0 + $0x8] sm:$0xff] }
 0x2de   :  { %v4232_v28 = vunpack.i.h.bf16 %v4230_v31  ;;  %v4231_v43 = vunpack.i.l.bf16 %v4230_v31 }
 0x2df   :  { %642 = vmatpush.bf16.msrb.mxu2 %v586_v58  ;;  %668 = vmatpush.bf16.msra.mxu0 %v588_v63  ;;  %v5276_v63 = vld [vmem:[%s9310_s0] sm:$0xff] }
 0x2e0   :  { %680 = vmatpush.bf16.msra.mxu1 %v595_v12  ;;  %706 = vmatpush.bf16.msra.mxu3 %v597_v13  ;;  %v467_v15 = vsel %vm145_vm8, %v4207_v6, %v4231_v43  ;;  %v471_v45 = vsel %vm145_vm8, %v4232_v28, %v4206_v5 }
 0x2e1   :  { %v4225_v35 = vpop.permute.xlu1 %4224  ;;  %v4235_v16 = vpop.permute.xlu0 %4234 }
 0x2e2   :  { %v4227_v51 = vunpack.i.h.bf16 %v4225_v35  ;;  %v4226_v54 = vunpack.i.l.bf16 %v4225_v35  ;;  %v4237_v59 = vunpack.i.h.bf16 %v4235_v16  ;;  %v4236_v62 = vunpack.i.l.bf16 %v4235_v16 }
 0x2e4   :  { %v452_v53 = vsel %vm9320_vm9, %v4226_v54, %v4161_v48  ;;  %v450_v46 = vsel %vm9320_vm9, %v4162_v42, %v4227_v51  ;;  %v485_v56 = vsel %vm164_vm7, %v4212_v37, %v4236_v62  ;;  %v489_v19 = vsel %vm164_vm7, %v4237_v59, %v4211_v36 }
 0x2e5   :  { %v580_v61 = vpack.c.bf16 %v452_v53, %v5798_v49  ;;  %v582_v6 = vpack.c.bf16 %v450_v46, %v5780_v32  ;;  %v589_v5 = vpack.c.bf16 %v485_v56, %v467_v15  ;;  %v591_v26 = vpack.c.bf16 %v489_v19, %v471_v45  ;;  %v5278_v46 = vld [vmem:[%s9310_s0 + $0x28] sm:$0xff] }
 0x2e6   :  { %v538_v42 = vsel %vm221_vm3, %v4196_v11, %v4197_v38  ;;  %v556_v32 = vsel %vm240_vm4, %v4201_v34, %v4202_v39  ;;  %v520_v37 = vsel %vm202_vm6, %v4221_v50, %v4222_v29  ;;  %v484_v34 = vsel %vm164_vm7, %v4236_v62, %v4237_v59 }
 0x2e7   :  { %643 = vmatpush.bf16.msrb.mxu2 %v580_v61  ;;  %669 = vmatpush.bf16.msra.mxu0 %v582_v6  ;;  %v602_v44 = vpack.c.bf16 %v556_v32, %v538_v42  ;;  %v596_v39 = vpack.c.bf16 %v520_v37, %v502_v18  ;;  %v5279_v61 = vld [vmem:[%s9310_s0 + $0x20] sm:$0xff] }
 0x2e8   :  { %681 = vmatpush.bf16.msra.mxu1 %v589_v5  ;;  %707 = vmatpush.bf16.msra.mxu3 %v591_v26 }
 0x2e9   :  { %v4240_v48 = vpop.permute.xlu1 %4239 }
 0x2ea   :  { %v4242_v49 = vunpack.i.h.bf16 %v4240_v48  ;;  %v4241_v17 = vunpack.i.l.bf16 %v4240_v48  ;;  %3851 = vmatmul.msk.bf16.vlgmr.msrb.gmra.mxu2 %vm301_vm10, %v5917_v57  ;;  %3853 = vmatmul.msk.bf16.vlgmr.msra.gmra.mxu0 %vm301_vm10, %v5917_v57 }
 0x2eb   :  { %691 = vmatpush.bf16.msra.mxu2 %v631_v20 }
 0x2ec   :  { %v449_v38 = vsel %vm9320_vm9, %v4227_v51, %v4241_v17  ;;  %v453_v11 = vsel %vm9320_vm9, %v4242_v49, %v4226_v54  ;;  %v448_v27 = vsel %vm9320_vm9, %v4241_v17, %v4242_v49 }
 0x2ed   :  { %v583_v36 = vpack.c.bf16 %v449_v38, %v5810_v30  ;;  %v585_v2 = vpack.c.bf16 %v453_v11, %v5802_v23  ;;  %v466_v23 = vsel %vm145_vm8, %v4231_v43, %v4232_v28  ;;  %v584_v0 = vpack.c.bf16 %v448_v27, %v5806_v1  ;;  %v5275_v1 = vld [vmem:[%s9310_s0 + $0x10] sm:$0xff]  ;;  %v5277_v28 = vld [vmem:[%s9310_s0 + $0x18] sm:$0xff] }
 0x2ee   :  { %v590_v30 = vpack.c.bf16 %v484_v34, %v466_v23 }
 0x2ef   :  { %692 = vmatpush.bf16.msra.mxu2 %v602_v44  ;;  %682 = vmatpush.bf16.msra.mxu1 %v583_v36 }
 0x2f0   :  { %708 = vmatpush.bf16.msra.mxu3 %v585_v2 }
 0x2f2   :  { %3854 = vmatmul.msk.bf16.vlgmr.msra.gmra.mxu1 %vm301_vm10, %v5917_v57 }
 0x2f3   :  { %693 = vmatpush.bf16.msra.mxu2 %v596_v39  ;;  %3856 = vmatmul.msk.bf16.vlgmr.msra.gmra.mxu3 %vm301_vm10, %v5917_v57 }
 0x2f7   :  { %694 = vmatpush.bf16.msra.mxu2 %v590_v30 }
 0x2fb   :  { %695 = vmatpush.bf16.msra.mxu2 %v584_v0 }
 0x2fe   :  { %3855 = vmatmul.msk.bf16.vlgmr.msra.gmra.mxu2 %vm301_vm10, %v5917_v57 }
 0x32a   :  { %v613_v50 = vpop.permute.xlu2 %612 }
 0x347   :  { %v658_v14 = vpop.f32.mrf.mxu3 }
 0x348   :  { %v659_v55 = vadd.f32 %v658_v14, %v613_v50 }
 0x34a   :  { %v6103_v60 = vadd.f32 %v5274_v33, %v659_v55 }
 0x34c   :  { %v725_v31 = vmul.f32 %v6103_v60, %v5455_v8 }
 0x34f   :  { %v660_v29 = vpop.f32.mrf.mxu3 }
 0x350   :  { %v3858_v29 = vld [vmem:[%s9312_s2 + $0x10] sm:$0xff] }
 0x367   :  { %v671_v41 = vpop.f32.mrf.mxu0 }
 0x368   :  { %v672_v40 = vadd.f32 %v671_v41, %v613_v50 }
 0x36a   :  { %v6108_v47 = vadd.f32 %v5275_v1, %v672_v40 }
 0x36c   :  { %v726_v35 = vmul.f32 %v6108_v47, %v5457_v9 }
 0x36d   :  { %v645_v21 = vpop.f32.mrf.mxu2 }
 0x36e   :  { %v646_v52 = vadd.f32 %v645_v21, %v613_v50 }
 0x36f   :  { %v673_v57 = vpop.f32.mrf.mxu0  ;;  %v684_v58 = vpop.f32.mrf.mxu1 }
 0x370   :  { %v6113_v12 = vadd.f32 %v5276_v63, %v646_v52  ;;  %v685_v13 = vadd.f32 %v684_v58, %v613_v50 }
 0x372   :  { %v724_v25 = vmul.f32 %v6113_v12, %v5453_v7  ;;  %v6122_v43 = vadd.f32 %v5277_v28, %v685_v13 }
 0x374   :  { %9404 = vst [vmem:[#allocation15_spill] sm:$0xff] %v6122_v43  ;;  %v727_v16 = vmul.f32 %v6122_v43, %v5459_v10  ;;  %v4244_v51 = vpack.i.bf16 %v725_v31, %v724_v25 }
 0x375   :  { %v647_v54 = vpop.f32.mrf.mxu2 }
 0x376   :  { %v710_v59 = vpop.f32.mrf.mxu3  ;;  %4245 = vrot.lane.b32.xlu0 %v4244_v51, %s5362_s10  ;;  %v4249_v62 = vpack.i.bf16 %v727_v16, %v726_v35 }
 0x377   :  { %v686_v15 = vpop.f32.mrf.mxu1  ;;  %v711_v45 = vadd.f32 %v710_v59, %v613_v50 }
 0x378   :  { %4250 = vrot.lane.b32.xlu1 %v4249_v62, %s5362_s10 }
 0x379   :  { %v6133_v56 = vadd.f32 %v5278_v46, %v711_v45 }
 0x37b   :  { %9405 = vst [vmem:[#allocation16_spill] sm:$0xff] %v6133_v56  ;;  %v729_v5 = vmul.f32 %v6133_v56, %v5445_v4 }
 0x37e   :  { %v712_v22 = vpop.f32.mrf.mxu3 }
 0x381   :  { %v697_v53 = vpop.f32.mrf.mxu2 }
 0x382   :  { %v698_v19 = vadd.f32 %v697_v53, %v613_v50 }
 0x384   :  { %v6138_v6 = vadd.f32 %v5279_v61, %v698_v19 }
 0x386   :  { %9406 = vst [vmem:[#allocation17_spill] sm:$0xff] %v6138_v6  ;;  %v728_v26 = vmul.f32 %v6138_v6, %v5443_v3 }
 0x388   :  { %v4254_v20 = vpack.i.bf16 %v728_v26, %v729_v5 }
 0x389   :  { %v699_v42 = vpop.f32.mrf.mxu2 }
 0x38a   :  { %4255 = vrot.lane.b32.xlu2 %v4254_v20, %s5362_s10 }
 0x3e4   :  { %v4256_v2 = vpop.permute.xlu2 %4255 }
 0x3e5   :  { %v4257_v18 = vunpack.i.l.bf16 %v4256_v2  ;;  %v4258_v30 = vunpack.i.h.bf16 %v4256_v2 }
 0x3e7   :  { %v6183_v0 = vsel %vm107_vm0, %v4258_v30, %v4257_v18 }
 0x3e8   :  { %v4246_v48 = vpop.permute.xlu0 %4245 }
 0x3e9   :  { %v4248_v49 = vunpack.i.h.bf16 %v4246_v48  ;;  %v4247_v17 = vunpack.i.l.bf16 %v4246_v48 }
 0x3ea   :  { %v4251_v32 = vpop.permute.xlu1 %4250 }
 0x3eb   :  { %v6147_v44 = vsel %vm107_vm0, %v4247_v17, %v4248_v49  ;;  %v4252_v38 = vunpack.i.l.bf16 %v4251_v32  ;;  %v4253_v36 = vunpack.i.h.bf16 %v4251_v32  ;;  %v6167_v34 = vsel %vm107_vm0, %v4257_v18, %v4247_v17 }
 0x3ed   :  { %v6151_v11 = vsel %vm107_vm0, %v4248_v49, %v4252_v38  ;;  %v6163_v39 = vsel %vm107_vm0, %v4252_v38, %v4253_v36  ;;  %v6179_v27 = vsel %vm107_vm0, %v4253_v36, %v4258_v30 }
 0x3ee   :  { %v4269_v37 = vpack.i.bf16 %v6151_v11, %v6147_v44  ;;  %v4294_v23 = vpack.i.bf16 %v6167_v34, %v6163_v39  ;;  %v4339_v14 = vpack.i.bf16 %v6183_v0, %v6179_v27 }
 0x3f0   :  { %4270 = vrot.lane.b32.xlu1 %v4269_v37, %s5366_s14  ;;  %4265 = vrot.lane.b32.xlu2 %v4269_v37, %s5363_s11 }
 0x3f1   :  { %4260 = vrot.lane.b32.xlu0 %v4269_v37, %s5364_s12 }
 0x3f8   :  { %4285 = vrot.lane.b32.xlu1 %v4269_v37, %s5369_s17  ;;  %4280 = vrot.lane.b32.xlu2 %v4269_v37, %s5367_s15 }
 0x3f9   :  { %4275 = vrot.lane.b32.xlu0 %v4269_v37, %s5365_s13 }
 0x400   :  { %4295 = vrot.lane.b32.xlu1 %v4294_v23, %s5364_s12  ;;  %4305 = vrot.lane.b32.xlu2 %v4294_v23, %s5366_s14 }
 0x401   :  { %4290 = vrot.lane.b32.xlu0 %v4269_v37, %s5368_s16 }
 0x408   :  { %4310 = vrot.lane.b32.xlu1 %v4294_v23, %s5365_s13  ;;  %4325 = vrot.lane.b32.xlu2 %v4294_v23, %s5369_s17 }
 0x409   :  { %4300 = vrot.lane.b32.xlu0 %v4294_v23, %s5363_s11 }
 0x410   :  { %4330 = vrot.lane.b32.xlu1 %v4294_v23, %s5368_s16  ;;  %4340 = vrot.lane.b32.xlu2 %v4339_v14, %s5364_s12 }
 0x411   :  { %4315 = vrot.lane.b32.xlu0 %v4294_v23, %s5367_s15 }
 0x418   :  { %4335 = vrot.lane.b32.xlu1 %v4294_v23, %s5370_s18  ;;  %4345 = vrot.lane.b32.xlu2 %v4339_v14, %s5363_s11 }
 0x419   :  { %4320 = vrot.lane.b32.xlu0 %v4269_v37, %s5370_s18 }
 0x420   :  { %4355 = vrot.lane.b32.xlu1 %v4339_v14, %s5365_s13  ;;  %4360 = vrot.lane.b32.xlu2 %v4339_v14, %s5367_s15 }
 0x421   :  { %4350 = vrot.lane.b32.xlu0 %v4339_v14, %s5366_s14 }
 0x428   :  { %4370 = vrot.lane.b32.xlu1 %v4339_v14, %s5368_s16  ;;  %4375 = vrot.lane.b32.xlu2 %v4339_v14, %s5370_s18 }
 0x429   :  { %4365 = vrot.lane.b32.xlu0 %v4339_v14, %s5369_s17 }
 0x431   :  { %924 = vperm.xlu0 %4107, %v3858_v29  }
 0x44a   :  { %v6202_v50 = vpop.permute.xlu2 %4265 }
 0x44b   :  { %v4268_v13 = vunpack.i.h.bf16 %v6202_v50  ;;  %v4267_v31 = vunpack.i.l.bf16 %v6202_v50 }
 0x44d   :  { %v853_v62 = vsel %vm221_vm3, %v4267_v31, %v4268_v13 }
 0x452   :  { %v6204_v41 = vpop.permute.xlu2 %4280 }
 0x453   :  { %v4283_v16 = vunpack.i.h.bf16 %v6204_v41  ;;  %v4282_v51 = vunpack.i.l.bf16 %v6204_v41 }
 0x455   :  { %v835_v46 = vsel %vm202_vm6, %v4282_v51, %v4283_v16 }
 0x45a   :  { %v6206_v55 = vpop.permute.xlu2 %4305 }
 0x462   :  { %v6208_v40 = vpop.permute.xlu1 %4270  ;;  %v6212_v58 = vpop.permute.xlu2 %4325 }
 0x463   :  { %v4261_v33 = vpop.permute.xlu0 %4260  ;;  %v4273_v1 = vunpack.i.h.bf16 %v6208_v40  ;;  %v4272_v57 = vunpack.i.l.bf16 %v6208_v40 }
 0x464   :  { %v4263_v21 = vunpack.i.h.bf16 %v4261_v33  ;;  %v4262_v52 = vunpack.i.l.bf16 %v4261_v33 }
 0x465   :  { %v871_v35 = vsel %vm240_vm4, %v4272_v57, %v4273_v1 }
 0x466   :  { %v889_v63 = vsel %vm259_vm1, %v4262_v52, %v4263_v21  ;;  %v911_v22 = vpack.c.bf16 %v871_v35, %v853_v62 }
 0x467   :  { %v917_v25 = vpack.c.bf16 %v889_v63, %v889_v63 }
 0x469   :  { %v934_v28 = vsel %vm305_vm2, %v917_v25, 0  ;;  %v4308_v25 = vunpack.i.h.bf16 %v6206_v55 }
 0x46a   :  { %964 = vmatpush.bf16.msrb.mxu1 %v934_v28  ;;  %v6223_v54 = vpop.permute.xlu1 %4285  ;;  %v6239_v61 = vpop.permute.xlu2 %4340  ;;  %v4307_v28 = vunpack.i.l.bf16 %v6206_v55 }
 0x46b   :  { %v6225_v59 = vpop.permute.xlu0 %4275  ;;  %v4288_v5 = vunpack.i.h.bf16 %v6223_v54  ;;  %v4287_v26 = vunpack.i.l.bf16 %v6223_v54  ;;  %v4342_v42 = vunpack.i.l.bf16 %v6239_v61 }
 0x46c   :  { %v4278_v15 = vunpack.i.h.bf16 %v6225_v59  ;;  %v4277_v45 = vunpack.i.l.bf16 %v6225_v59 }
 0x46d   :  { %v781_v37 = vsel %vm145_vm8, %v4287_v26, %v4288_v5 }
 0x46e   :  { %965 = vmatpush.bf16.msrb.mxu1 %v911_v22  ;;  %v817_v53 = vsel %vm183_vm5, %v4277_v45, %v4278_v15  ;;  %v872_v22 = vsel %vm240_vm4, %v4308_v25, %v4272_v57 }
 0x46f   :  { %v905_v19 = vpack.c.bf16 %v835_v46, %v817_v53  ;;  %v870_v46 = vsel %vm240_vm4, %v4273_v1, %v4307_v28 }
 0x472   :  { %966 = vmatpush.bf16.msrb.mxu1 %v905_v19  ;;  %v6243_v20 = vpop.permute.xlu1 %4295  ;;  %v6293_v57 = vpop.permute.xlu2 %4345 }
 0x473   :  { %v4298_v48 = vunpack.i.h.bf16 %v6243_v20  ;;  %v4297_v49 = vunpack.i.l.bf16 %v6243_v20  ;;  %v4291_v17 = vpop.permute.xlu0 %4290 }
 0x474   :  { %v4293_v32 = vunpack.i.h.bf16 %v4291_v17  ;;  %v4292_v38 = vunpack.i.l.bf16 %v4291_v17 }
 0x475   :  { %v890_v36 = vsel %vm259_vm1, %v4298_v48, %v4262_v52  ;;  %v888_v2 = vsel %vm259_vm1, %v4263_v21, %v4297_v49  ;;  %v887_v18 = vsel %vm259_vm1, %v4297_v49, %v4342_v42 }
 0x476   :  { %v799_v23 = vsel %vm164_vm7, %v4292_v38, %v4293_v32  ;;  %v916_v30 = vpack.c.bf16 %v890_v36, %v890_v36  ;;  %v918_v14 = vpack.c.bf16 %v888_v2, %v888_v2  ;;  %v919_v29 = vpack.c.bf16 %v887_v18, %v887_v18 }
 0x477   :  { %v899_v50 = vpack.c.bf16 %v799_v23, %v781_v37  ;;  %v4343_v18 = vunpack.i.h.bf16 %v6239_v61 }
 0x478   :  { %v931_v40 = vsel %vm305_vm2, %v916_v30, 0  ;;  %v937_v33 = vsel %vm305_vm2, %v918_v14, 0  ;;  %v940_v63 = vsel %vm305_vm2, %v919_v29, 0 }
 0x479   :  { %967 = vmatpush.bf16.msrb.mxu1 %v899_v50  ;;  %951 = vmatpush.bf16.msrb.mxu0 %v931_v40  ;;  %v4328_v50 = vunpack.i.h.bf16 %v6212_v58  ;;  %v4327_v40 = vunpack.i.l.bf16 %v6212_v58 }
 0x47a   :  { %977 = vmatpush.bf16.msrb.mxu2 %v937_v33  ;;  %990 = vmatpush.bf16.msrb.mxu3 %v940_v63  ;;  %v6265_v21 = vpop.permute.xlu1 %4310  ;;  %v891_v33 = vsel %vm259_vm1, %v4343_v18, %v4298_v48 }
 0x47b   :  { %v6267_v52 = vpop.permute.xlu0 %4300  ;;  %v4312_v49 = vunpack.i.l.bf16 %v6265_v21 }
 0x47c   :  { %v4303_v35 = vunpack.i.h.bf16 %v6267_v52  ;;  %v4302_v59 = vunpack.i.l.bf16 %v6267_v52 }
 0x47d   :  { %v816_v14 = vsel %vm183_vm5, %v4278_v15, %v4312_v49 }
 0x47e   :  { %v854_v62 = vsel %vm221_vm3, %v4303_v35, %v4267_v31  ;;  %v852_v53 = vsel %vm221_vm3, %v4268_v13, %v4302_v59  ;;  %v4313_v31 = vunpack.i.h.bf16 %v6265_v21 }
 0x47f   :  { %v910_v19 = vpack.c.bf16 %v872_v22, %v854_v62  ;;  %v912_v20 = vpack.c.bf16 %v870_v46, %v852_v53 }
 0x480   :  { %v818_v23 = vsel %vm183_vm5, %v4313_v31, %v4277_v45 }
 0x481   :  { %952 = vmatpush.bf16.msrb.mxu0 %v910_v19  ;;  %978 = vmatpush.bf16.msrb.mxu2 %v912_v20  ;;  %v4361_v20 = vpop.permute.xlu2 %4360 }
 0x482   :  { %v6291_v17 = vpop.permute.xlu1 %4330 }
 0x483   :  { %v6295_v37 = vpop.permute.xlu0 %4315  ;;  %v4333_v13 = vunpack.i.h.bf16 %v6291_v17  ;;  %v4332_v36 = vunpack.i.l.bf16 %v6291_v17 }
 0x484   :  { %v4318_v1 = vunpack.i.h.bf16 %v6295_v37  ;;  %v4317_v2 = vunpack.i.l.bf16 %v6295_v37 }
 0x485   :  { %v798_v15 = vsel %vm164_vm7, %v4293_v32, %v4332_v36  ;;  %v886_v32 = vsel %vm259_vm1, %v4342_v42, %v4343_v18  ;;  %v921_v18 = vpack.c.bf16 %v891_v33, %v891_v33  ;;  %v4362_v33 = vunpack.i.l.bf16 %v4361_v20 }
 0x486   :  { %v836_v30 = vsel %vm202_vm6, %v4318_v1, %v4282_v51  ;;  %v834_v61 = vsel %vm202_vm6, %v4283_v16, %v4317_v2  ;;  %v800_v51 = vsel %vm164_vm7, %v4333_v13, %v4292_v38  ;;  %v782_v16 = vsel %vm145_vm8, %v4328_v50, %v4287_v26 }
 0x487   :  { %v904_v45 = vpack.c.bf16 %v836_v30, %v818_v23  ;;  %v906_v29 = vpack.c.bf16 %v834_v61, %v816_v14  ;;  %v780_v38 = vsel %vm145_vm8, %v4288_v5, %v4327_v40  ;;  %v898_v53 = vpack.c.bf16 %v800_v51, %v782_v16  ;;  %v6371_v51 = vld [vmem:[%s9311_s1 + $0x8] sm:$0xf] }
 0x488   :  { %v900_v26 = vpack.c.bf16 %v798_v15, %v780_v38  ;;  %v920_v54 = vpack.c.bf16 %v886_v32, %v886_v32  ;;  %v4348_v61 = vunpack.i.h.bf16 %v6293_v57  ;;  %v4363_v32 = vunpack.i.h.bf16 %v4361_v20 }
 0x489   :  { %953 = vmatpush.bf16.msrb.mxu0 %v904_v45  ;;  %979 = vmatpush.bf16.msrb.mxu2 %v906_v29  ;;  %v4347_v45 = vunpack.i.l.bf16 %v6293_v57  ;;  %v4376_v20 = vpop.permute.xlu2 %4375 }
 0x48a   :  { %v6332_v41 = vpop.permute.xlu1 %4335  ;;  %v943_v29 = vsel %vm305_vm2, %v920_v54, 0 }
 0x48b   :  { %v4338_v63 = vunpack.i.h.bf16 %v6332_v41  ;;  %v4337_v62 = vunpack.i.l.bf16 %v6332_v41  ;;  %v4321_v22 = vpop.permute.xlu0 %4320 }
 0x48c   :  { %v4323_v46 = vunpack.i.h.bf16 %v4321_v22  ;;  %v4322_v19 = vunpack.i.l.bf16 %v4321_v22  ;;  %v851_v22 = vsel %vm221_vm3, %v4302_v59, %v4347_v45 }
 0x48d   :  { %954 = vmatpush.bf16.msrb.mxu0 %v898_v53  ;;  %980 = vmatpush.bf16.msrb.mxu2 %v900_v26  ;;  %v850_v53 = vsel %vm221_vm3, %v4347_v45, %v4348_v61 }
 0x48e   :  { %v764_v5 = vsel %vm9320_vm9, %v4338_v63, %v4322_v19  ;;  %v763_v42 = vsel %vm9320_vm9, %v4322_v19, %v4323_v46  ;;  %v762_v48 = vsel %vm9320_vm9, %v4323_v46, %v4337_v62  ;;  %v855_v19 = vsel %vm221_vm3, %v4348_v61, %v4303_v35 }
 0x48f   :  { %v892_v23 = vpack.c.bf16 %v764_v5, %v6167_v34  ;;  %v893_v30 = vpack.c.bf16 %v763_v42, %v6147_v44  ;;  %v894_v14 = vpack.c.bf16 %v762_v48, %v6151_v11  ;;  %v946_v34 = vsel %vm305_vm2, %v921_v18, 0 }
 0x490   :  { %v833_v48 = vsel %vm202_vm6, %v4317_v2, %v4362_v33  ;;  %v837_v18 = vsel %vm202_vm6, %v4363_v32, %v4318_v1  ;;  %v4377_v61 = vunpack.i.l.bf16 %v4376_v20 }
 0x491   :  { %955 = vmatpush.bf16.msrb.mxu0 %v892_v23  ;;  %968 = vmatpush.bf16.msrb.mxu1 %v893_v30 }
 0x492   :  { %981 = vmatpush.bf16.msrb.mxu2 %v894_v14  ;;  %v4356_v44 = vpop.permute.xlu1 %4355 }
 0x493   :  { %v4351_v11 = vpop.permute.xlu0 %4350  ;;  %v4358_v15 = vunpack.i.h.bf16 %v4356_v44  ;;  %v4357_v16 = vunpack.i.l.bf16 %v4356_v44 }
 0x494   :  { %v4353_v38 = vunpack.i.h.bf16 %v4351_v11  ;;  %v4352_v57 = vunpack.i.l.bf16 %v4351_v11  ;;  %3859 = vmatmul.msk.bf16.vlgmr.msrb.gmra.mxu0 %vm301_vm10, %v6371_v51  ;;  %3860 = vmatmul.msk.bf16.vlgmr.msrb.gmra.mxu1 %vm301_vm10, %v6371_v51 }
 0x495   :  { %1003 = vmatpush.bf16.msra.mxu0 %v943_v29  ;;  %1016 = vmatpush.bf16.msra.mxu1 %v946_v34  ;;  %v814_v52 = vsel %vm183_vm5, %v4357_v16, %v4358_v15  ;;  %v819_v55 = vsel %vm183_vm5, %v4358_v15, %v4313_v31 }
 0x496   :  { %3861 = vmatmul.msk.bf16.vlgmr.msrb.gmra.mxu2 %vm301_vm10, %v6371_v51  ;;  %v869_v26 = vsel %vm240_vm4, %v4307_v28, %v4352_v57  ;;  %v868_v46 = vsel %vm240_vm4, %v4352_v57, %v4353_v38  ;;  %v873_v59 = vsel %vm240_vm4, %v4353_v38, %v4308_v25  ;;  %v815_v28 = vsel %vm183_vm5, %v4312_v49, %v4357_v16 }
 0x497   :  { %v913_v54 = vpack.c.bf16 %v869_v26, %v851_v22  ;;  %v914_v5 = vpack.c.bf16 %v868_v46, %v850_v53  ;;  %v915_v42 = vpack.c.bf16 %v873_v59, %v855_v19  ;;  %v4378_v25 = vunpack.i.h.bf16 %v4376_v20 }
 0x498   :  { %v832_v49 = vsel %vm202_vm6, %v4362_v33, %v4363_v32  ;;  %v907_v31 = vpack.c.bf16 %v833_v48, %v815_v28  ;;  %v909_v34 = vpack.c.bf16 %v837_v18, %v819_v55 }
 0x499   :  { %991 = vmatpush.bf16.msrb.mxu3 %v913_v54  ;;  %1004 = vmatpush.bf16.msra.mxu0 %v914_v5  ;;  %v908_v14 = vpack.c.bf16 %v832_v49, %v814_v52  ;;  %v760_v38 = vsel %vm9320_vm9, %v4377_v61, %v4378_v25  ;;  %v765_v58 = vsel %vm9320_vm9, %v4378_v25, %v4338_v63 }
 0x49a   :  { %1017 = vmatpush.bf16.msra.mxu1 %v915_v42  ;;  %v4371_v35 = vpop.permute.xlu1 %4370  ;;  %v897_v57 = vpack.c.bf16 %v765_v58, %v6183_v0 }
 0x49b   :  { %v4373_v21 = vunpack.i.h.bf16 %v4371_v35  ;;  %v4372_v23 = vunpack.i.l.bf16 %v4371_v35  ;;  %v4366_v30 = vpop.permute.xlu0 %4365 }
 0x49c   :  { %v4368_v45 = vunpack.i.h.bf16 %v4366_v30  ;;  %v4367_v29 = vunpack.i.l.bf16 %v4366_v30 }
 0x49d   :  { %992 = vmatpush.bf16.msrb.mxu3 %v907_v31  ;;  %1005 = vmatpush.bf16.msra.mxu0 %v908_v14  ;;  %v797_v2 = vsel %vm164_vm7, %v4332_v36, %v4372_v23  ;;  %v796_v37 = vsel %vm164_vm7, %v4372_v23, %v4373_v21  ;;  %v801_v1 = vsel %vm164_vm7, %v4373_v21, %v4333_v13 }
 0x49e   :  { %1018 = vmatpush.bf16.msra.mxu1 %v909_v34  ;;  %v779_v44 = vsel %vm145_vm8, %v4327_v40, %v4367_v29  ;;  %v778_v11 = vsel %vm145_vm8, %v4367_v29, %v4368_v45  ;;  %v783_v36 = vsel %vm145_vm8, %v4368_v45, %v4328_v50  ;;  %v761_v13 = vsel %vm9320_vm9, %v4337_v62, %v4377_v61 }
 0x49f   :  { %v901_v15 = vpack.c.bf16 %v797_v2, %v779_v44  ;;  %v902_v16 = vpack.c.bf16 %v796_v37, %v778_v11  ;;  %v903_v17 = vpack.c.bf16 %v801_v1, %v783_v36  ;;  %v895_v50 = vpack.c.bf16 %v761_v13, %v6163_v39  ;;  %v65_v39 = vld [vmem:[%s9318_s8] sm:$0x3f]  ;;  %s5372_s8 = smov 38  }
 0x4a0   :  { %v896_v40 = vpack.c.bf16 %v760_v38, %v6179_v27  ;;  %v6462_v27 = vperm.slane %v65_v39, 0  ;;  %v6464_v0 = vperm.slane %v65_v39, 1  ;;  %v6477_v42 = vperm.slane %v65_v39, 2 }
 0x4a1   :  { %993 = vmatpush.bf16.msrb.mxu3 %v901_v15  ;;  %1006 = vmatpush.bf16.msra.mxu0 %v902_v16  ;;  %v6479_v52 = vperm.slane %v65_v39, 5  ;;  %v6484_v49 = vperm.slane %v65_v39, 4  ;;  %v6489_v21 = vperm.slane %v65_v39, 3  ;;  %vm1104_vm9 = vcmp.lt.s32.totalorder %v5476_v24, 124 }
 0x4a2   :  { %1019 = vmatpush.bf16.msra.mxu1 %v903_v17 }
 0x4a3   :  { %v925_v41 = vpop.permute.xlu0 %924 }
 0x4a5   :  { %994 = vmatpush.bf16.msrb.mxu3 %v895_v50  ;;  %1007 = vmatpush.bf16.msra.mxu0 %v896_v40 }
 0x4a6   :  { %1020 = vmatpush.bf16.msra.mxu1 %v897_v57 }
 0x4a8   :  { %3862 = vmatmul.msk.bf16.vlgmr.msrb.gmra.mxu3 %vm301_vm10, %v6371_v51  ;;  %3863 = vmatmul.msk.bf16.vlgmr.msra.gmra.mxu0 %vm301_vm10, %v6371_v51 }
 0x4a9   :  { %3864 = vmatmul.msk.bf16.vlgmr.msra.gmra.mxu1 %vm301_vm10, %v6371_v51 }
 0x511   :  { %v957_v63 = vpop.f32.mrf.mxu0  ;;  %v970_v62 = vpop.f32.mrf.mxu1 }
 0x512   :  { %v958_v32 = vadd.f32 %v957_v63, %v925_v41  ;;  %v971_v33 = vadd.f32 %v970_v62, %v925_v41 }
 0x514   :  { %v6467_v22 = vmul.f32 %v6462_v27, %v958_v32  ;;  %v6470_v53 = vmul.f32 %v6464_v0, %v971_v33 }
 0x516   :  { %v1049_v51 = vmul.f32 %v6467_v22, %v5453_v7  ;;  %v1050_v26 = vmul.f32 %v6470_v53, %v5455_v8 }
 0x518   :  { %v4379_v19 = vpack.i.bf16 %v1050_v26, %v1049_v51 }
 0x519   :  { %v983_v46 = vpop.f32.mrf.mxu2  ;;  %v959_v59 = vpop.f32.mrf.mxu0 }
 0x51a   :  { %v972_v20 = vpop.f32.mrf.mxu1  ;;  %4380 = vrot.lane.b32.xlu1 %v4379_v19, %s5372_s8  ;;  %v984_v5 = vadd.f32 %v983_v46, %v925_v41 }
 0x51c   :  { %v6482_v25 = vmul.f32 %v6477_v42, %v984_v5 }
 0x51e   :  { %v1051_v23 = vmul.f32 %v6482_v25, %v5457_v9 }
 0x521   :  { %v985_v54 = vpop.f32.mrf.mxu2 }
 0x525   :  { %v1009_v28 = vpop.f32.mrf.mxu0 }
 0x526   :  { %v1022_v55 = vpop.f32.mrf.mxu1  ;;  %v1010_v48 = vadd.f32 %v1009_v28, %v925_v41 }
 0x527   :  { %v1023_v35 = vadd.f32 %v1022_v55, %v925_v41 }
 0x528   :  { %v6496_v14 = vmul.f32 %v6484_v49, %v1010_v48 }
 0x529   :  { %v6487_v18 = vmul.f32 %v6479_v52, %v1023_v35 }
 0x52a   :  { %v1053_v37 = vmul.f32 %v6496_v14, %v5443_v3 }
 0x52b   :  { %v1054_v30 = vmul.f32 %v6487_v18, %v5445_v4  ;;  %v996_v31 = vpop.f32.mrf.mxu3 }
 0x52c   :  { %v997_v61 = vadd.f32 %v996_v31, %v925_v41 }
 0x52d   :  { %v1011_v45 = vpop.f32.mrf.mxu0  ;;  %v4384_v29 = vpack.i.bf16 %v1054_v30, %v1051_v23 }
 0x52e   :  { %v6499_v34 = vmul.f32 %v6489_v21, %v997_v61  ;;  %v1024_v2 = vpop.f32.mrf.mxu1 }
 0x52f   :  { %4385 = vrot.lane.b32.xlu2 %v4384_v29, %s5372_s8 }
 0x530   :  { %v1052_v1 = vmul.f32 %v6499_v34, %v5459_v10 }
 0x532   :  { %v4389_v44 = vpack.i.bf16 %v1053_v37, %v1052_v1 }
 0x533   :  { %v998_v11 = vpop.f32.mrf.mxu3 }
 0x534   :  { %4390 = vrot.lane.b32.xlu0 %v4389_v44, %s5372_s8 }
 0x589   :  { %v4386_v36 = vpop.permute.xlu2 %4385 }
 0x58a   :  { %v4387_v16 = vunpack.i.l.bf16 %v4386_v36  ;;  %v4388_v57 = vunpack.i.h.bf16 %v4386_v36 }
 0x58c   :  { %v4381_v15 = vpop.permute.xlu1 %4380 }
 0x58d   :  { %v4383_v17 = vunpack.i.h.bf16 %v4381_v15  ;;  %v4382_v13 = vunpack.i.l.bf16 %v4381_v15 }
 0x58f   :  { %v6510_v38 = vsel %vm1067_vm11, %v4383_v17, %v4387_v16  ;;  %v6514_v58 = vsel %vm1067_vm11, %v4382_v13, %v4383_v17  ;;  %v6528_v63 = vsel %vm1067_vm11, %v4388_v57, %v4382_v13 }
 0x590   :  { %v4404_v50 = vpack.i.bf16 %v6510_v38, %v6514_v58 }
 0x592   :  { %4405 = vrot.lane.b32.xlu0 %v4404_v50, %s5373_s28  ;;  %4400 = vrot.lane.b32.xlu2 %v4404_v50, %s5374_s29 }
 0x593   :  { %4395 = vrot.lane.b32.xlu1 %v4404_v50, %s5375_s30 }
 0x59a   :  { %4430 = vrot.lane.b32.xlu0 %v4404_v50, %s5369_s17  ;;  %4415 = vrot.lane.b32.xlu2 %v4404_v50, %s5376_s19 }
 0x59b   :  { %4410 = vrot.lane.b32.xlu1 %v4404_v50, %s5364_s12 }
 0x5a2   :  { %4425 = vrot.lane.b32.xlu2 %v4404_v50, %s5363_s11 }
 0x5a3   :  { %4420 = vrot.lane.b32.xlu1 %v4404_v50, %s5377_s20 }
 0x5a6   :  { %v4391_v40 = vpop.permute.xlu0 %4390 }
 0x5a7   :  { %v4393_v39 = vunpack.i.h.bf16 %v4391_v40  ;;  %v4392_v41 = vunpack.i.l.bf16 %v4391_v40 }
 0x5a9   :  { %v6532_v62 = vsel %vm1067_vm11, %v4393_v39, %v4388_v57  ;;  %v6536_v32 = vsel %vm1067_vm11, %v4392_v41, %v4393_v39  ;;  %v6540_v33 = vsel %vm1067_vm11, %v4387_v16, %v4392_v41 }
 0x5aa   :  { %v4434_v51 = vpack.i.bf16 %v6540_v33, %v6528_v63  ;;  %v4449_v26 = vpack.i.bf16 %v6532_v62, %v6536_v32 }
 0x5ac   :  { %4435 = vrot.lane.b32.xlu0 %v4434_v51, %s5375_s30  ;;  %4450 = vrot.lane.b32.xlu2 %v4449_v26, %s5375_s30 }
 0x5ad   :  { %4445 = vrot.lane.b32.xlu1 %v4434_v51, %s5373_s28 }
 0x5b4   :  { %4440 = vrot.lane.b32.xlu0 %v4434_v51, %s5374_s29  ;;  %4460 = vrot.lane.b32.xlu2 %v4434_v51, %s5376_s19 }
 0x5b5   :  { %4455 = vrot.lane.b32.xlu1 %v4434_v51, %s5364_s12 }
 0x5bc   :  { %4465 = vrot.lane.b32.xlu0 %v4449_v26, %s5374_s29  ;;  %4475 = vrot.lane.b32.xlu2 %v4434_v51, %s5377_s20 }
 0x5bd   :  { %4470 = vrot.lane.b32.xlu1 %v4449_v26, %s5373_s28 }
 0x5c4   :  { %4480 = vrot.lane.b32.xlu0 %v4434_v51, %s5363_s11  ;;  %4490 = vrot.lane.b32.xlu2 %v4449_v26, %s5376_s19 }
 0x5c5   :  { %4485 = vrot.lane.b32.xlu1 %v4449_v26, %s5364_s12 }
 0x5cc   :  { %4495 = vrot.lane.b32.xlu0 %v4434_v51, %s5369_s17  ;;  %4505 = vrot.lane.b32.xlu2 %v4449_v26, %s5363_s11 }
 0x5cd   :  { %4500 = vrot.lane.b32.xlu1 %v4449_v26, %s5377_s20 }
 0x5d4   :  { %4510 = vrot.lane.b32.xlu0 %v4449_v26, %s5369_s17 }
 0x5ec   :  { %v6562_v46 = vpop.permute.xlu2 %4400 }
 0x5ed   :  { %v4403_v48 = vunpack.i.h.bf16 %v6562_v46  ;;  %v4402_v23 = vunpack.i.l.bf16 %v6562_v46 }
 0x5ef   :  { %v1182_v1 = vsel %vm1178_vm14, %v4402_v23, %v4403_v48 }
 0x5f4   :  { %v6564_v19 = vpop.permute.xlu2 %4415 }
 0x5f5   :  { %v9328_v45 = vunpack.i.h.bf16 %v6564_v19  ;;  %v4417_v29 = vunpack.i.l.bf16 %v6564_v19 }
 0x5f7   :  { %v1163_v16 = vsel %vm1159_vm15, %v4417_v29, %v9328_v45 }
 0x5fc   :  { %v6586_v2 = vpop.permute.xlu2 %4425 }
 0x5fd   :  { %v9322_v50 = vunpack.i.h.bf16 %v6586_v2  ;;  %v9325_v40 = vunpack.i.l.bf16 %v6586_v2 }
 0x604   :  { %v6566_v59 = vpop.permute.xlu0 %4405 }
 0x605   :  { %v4396_v20 = vpop.permute.xlu1 %4395  ;;  %v4408_v28 = vunpack.i.h.bf16 %v6566_v59  ;;  %v4407_v55 = vunpack.i.l.bf16 %v6566_v59 }
 0x606   :  { %v4398_v54 = vunpack.i.h.bf16 %v4396_v20  ;;  %v4397_v5 = vunpack.i.l.bf16 %v4396_v20  ;;  %v6615_v57 = vpop.permute.xlu2 %4450 }
 0x607   :  { %v1201_v61 = vsel %vm1197_vm13, %v4407_v55, %v4408_v28 }
 0x608   :  { %v1220_v35 = vsel %vm1216_vm12, %v4397_v5, %v4398_v54  ;;  %v1242_v36 = vpack.c.bf16 %v1201_v61, %v1182_v1 }
 0x609   :  { %v1248_v30 = vpack.c.bf16 %v1220_v35, %v1220_v35 }
 0x60b   :  { %v1265_v31 = vsel %vm305_vm2, %v1248_v30, 0  ;;  %v1126_v30 = vsel %vm221_vm3, %v9325_v40, %v9322_v50 }
 0x60c   :  { %1295 = vmatpush.bf16.msra.mxu3 %v1265_v31  ;;  %v6611_v13 = vpop.permute.xlu0 %4430 }
 0x60d   :  { %v6588_v37 = vpop.permute.xlu1 %4410  ;;  %v9323_v41 = vunpack.i.h.bf16 %v6611_v13  ;;  %v9324_v51 = vunpack.i.l.bf16 %v6611_v13 }
 0x60e   :  { %v4413_v44 = vunpack.i.h.bf16 %v6588_v37  ;;  %v4412_v11 = vunpack.i.l.bf16 %v6588_v37 }
 0x60f   :  { %v1089_v61 = vsel %vm145_vm8, %v9324_v51, %v9323_v41 }
 0x610   :  { %1296 = vmatpush.bf16.msra.mxu3 %v1242_v36  ;;  %v1144_v15 = vsel %vm259_vm1, %v4412_v11, %v4413_v44  ;;  %v1224_v1 = vpack.c.bf16 %v1089_v61, %v6514_v58  ;;  %v6643_v36 = vpop.permute.xlu2 %4460 }
 0x611   :  { %v1236_v17 = vpack.c.bf16 %v1163_v16, %v1144_v15  ;;  %v9329_v16 = vunpack.i.h.bf16 %v6615_v57 }
 0x614   :  { %1297 = vmatpush.bf16.msra.mxu3 %v1236_v17  ;;  %v9327_v17 = vunpack.i.l.bf16 %v6615_v57 }
 0x615   :  { %v6617_v39 = vpop.permute.xlu1 %4420 }
 0x616   :  { %v9321_v26 = vunpack.i.h.bf16 %v6617_v39  ;;  %v9326_v20 = vunpack.i.l.bf16 %v6617_v39 }
 0x618   :  { %v1108_v35 = vsel %vm1104_vm9, %v9326_v20, %v9321_v26 }
 0x619   :  { %v1230_v31 = vpack.c.bf16 %v1126_v30, %v1108_v35  ;;  %v6650_v30 = vld [vmem:[%s9311_s1 + $0xc] sm:$0xf] }
 0x61b   :  { %1298 = vmatpush.bf16.msra.mxu3 %v1230_v31 }
 0x61e   :  { %v4436_v15 = vpop.permute.xlu0 %4435 }
 0x61f   :  { %v4438_v26 = vunpack.i.h.bf16 %v4436_v15  ;;  %v4437_v50 = vunpack.i.l.bf16 %v4436_v15  ;;  %v4446_v35 = vpop.permute.xlu1 %4445  ;;  %1299 = vmatpush.bf16.msra.mxu3 %v1224_v1 }
 0x620   :  { %v4447_v45 = vunpack.i.l.bf16 %v4446_v35 }
 0x621   :  { %v1221_v31 = vsel %vm1216_vm12, %v4437_v50, %v4397_v5  ;;  %v1219_v58 = vsel %vm1216_vm12, %v4398_v54, %v4438_v26  ;;  %v1218_v61 = vsel %vm1216_vm12, %v4438_v26, %v9327_v17  ;;  %v1222_v1 = vsel %vm1216_vm12, %v9329_v16, %v4437_v50  ;;  %v6672_v16 = vpop.permute.xlu2 %4475 }
 0x622   :  { %v1247_v15 = vpack.c.bf16 %v1221_v31, %v1221_v31  ;;  %v1249_v41 = vpack.c.bf16 %v1219_v58, %v1219_v58  ;;  %v1250_v51 = vpack.c.bf16 %v1218_v61, %v1218_v61  ;;  %v1252_v40 = vpack.c.bf16 %v1222_v1, %v1222_v1  ;;  %3868 = vmatmul.msk.bf16.vlgmr.msra.gmra.mxu3 %vm301_vm10, %v6650_v30 }
 0x623   :  { %v4448_v17 = vunpack.i.h.bf16 %v4446_v35  ;;  %v4463_v1 = vunpack.i.h.bf16 %v6643_v36 }
 0x624   :  { %v1262_v5 = vsel %vm305_vm2, %v1247_v15, 0  ;;  %v1268_v54 = vsel %vm305_vm2, %v1249_v41, 0  ;;  %v1271_v20 = vsel %vm305_vm2, %v1250_v51, 0  ;;  %v1277_v26 = vsel %vm305_vm2, %v1252_v40, 0 }
 0x625   :  { %1282 = vmatpush.bf16.msra.mxu2 %v1262_v5  ;;  %1308 = vmatpush.bf16.msrb.mxu0 %v1268_v54  ;;  %v4462_v15 = vunpack.i.l.bf16 %v6643_v36  ;;  %v1200_v36 = vsel %vm1197_vm13, %v4408_v28, %v4448_v17  ;;  %v9407_v28 = vunpack.i.h.bf16 %v6564_v19 }
 0x626   :  { %1321 = vmatpush.bf16.msrb.mxu1 %v1271_v20  ;;  %1347 = vmatpush.bf16.msrb.mxu3 %v1277_v26  ;;  %v4441_v50 = vpop.permute.xlu0 %4440  ;;  %v1202_v20 = vsel %vm1197_vm13, %v4447_v45, %v4407_v55 }
 0x627   :  { %v4443_v31 = vunpack.i.h.bf16 %v4441_v50  ;;  %v4442_v58 = vunpack.i.l.bf16 %v4441_v50  ;;  %v4456_v61 = vpop.permute.xlu1 %4455  ;;  %v1164_v59 = vsel %vm1159_vm15, %v4462_v15, %v4417_v29  ;;  %v1162_v55 = vsel %vm1159_vm15, %v9407_v28, %v4463_v1 }
 0x628   :  { %v4458_v41 = vunpack.i.h.bf16 %v4456_v61  ;;  %v4457_v51 = vunpack.i.l.bf16 %v4456_v61 }
 0x629   :  { %v1183_v40 = vsel %vm1178_vm14, %v4442_v58, %v4402_v23  ;;  %v1181_v35 = vsel %vm1178_vm14, %v4403_v48, %v4443_v31 }
 0x62a   :  { %v1241_v5 = vpack.c.bf16 %v1202_v20, %v1183_v40  ;;  %v1243_v54 = vpack.c.bf16 %v1200_v36, %v1181_v35  ;;  %v1145_v23 = vsel %vm259_vm1, %v4457_v51, %v4412_v11  ;;  %v1143_v46 = vsel %vm259_vm1, %v4413_v44, %v4458_v41  ;;  %v6722_v20 = vpop.permute.xlu2 %4490 }
 0x62b   :  { %v1235_v11 = vpack.c.bf16 %v1164_v59, %v1145_v23  ;;  %v1237_v26 = vpack.c.bf16 %v1162_v55, %v1143_v46  ;;  %v4477_v23 = vunpack.i.l.bf16 %v6672_v16  ;;  %v9330_v46 = vunpack.i.l.bf16 %v6722_v20 }
 0x62c   :  { %1283 = vmatpush.bf16.msra.mxu2 %v1241_v5  ;;  %1309 = vmatpush.bf16.msrb.mxu0 %v1243_v54 }
 0x62e   :  { %v6706_v48 = vpop.permute.xlu0 %4465 }
 0x62f   :  { %v4468_v37 = vunpack.i.h.bf16 %v6706_v48  ;;  %v4467_v44 = vunpack.i.l.bf16 %v6706_v48  ;;  %v6710_v50 = vpop.permute.xlu1 %4470 }
 0x630   :  { %v4473_v61 = vunpack.i.h.bf16 %v6710_v50  ;;  %v4472_v40 = vunpack.i.l.bf16 %v6710_v50  ;;  %1284 = vmatpush.bf16.msra.mxu2 %v1235_v11  ;;  %1310 = vmatpush.bf16.msrb.mxu0 %v1237_v26 }
 0x631   :  { %v1180_v19 = vsel %vm1178_vm14, %v4443_v31, %v4467_v44  ;;  %v1184_v29 = vsel %vm1178_vm14, %v4468_v37, %v4442_v58  ;;  %v4478_v31 = vunpack.i.h.bf16 %v6672_v16  ;;  %v9331_v58 = vunpack.i.h.bf16 %v6722_v20 }
 0x632   :  { %v1199_v35 = vsel %vm1197_vm13, %v4448_v17, %v4472_v40  ;;  %v1203_v36 = vsel %vm1197_vm13, %v4473_v61, %v4447_v45  ;;  %v9408_v45 = vunpack.i.l.bf16 %v6617_v39 }
 0x633   :  { %v1244_v5 = vpack.c.bf16 %v1199_v35, %v1180_v19  ;;  %v1246_v54 = vpack.c.bf16 %v1203_v36, %v1184_v29  ;;  %v9409_v29 = vunpack.i.h.bf16 %v6617_v39  ;;  %v9410_v35 = vunpack.i.l.bf16 %v6586_v2 }
 0x634   :  { %v1109_v19 = vsel %vm1104_vm9, %v4477_v23, %v9408_v45  ;;  %v1165_v39 = vsel %vm1159_vm15, %v9331_v58, %v4462_v15  ;;  %v9412_v15 = vunpack.i.h.bf16 %v6615_v57  ;;  %v9413_v58 = vunpack.i.l.bf16 %v6615_v57 }
 0x635   :  { %1322 = vmatpush.bf16.msrb.mxu1 %v1244_v5  ;;  %1348 = vmatpush.bf16.msrb.mxu3 %v1246_v54  ;;  %v1107_v16 = vsel %vm1104_vm9, %v9409_v29, %v4478_v31  ;;  %v9411_v5 = vunpack.i.h.bf16 %v6586_v2 }
 0x636   :  { %v4481_v59 = vpop.permute.xlu0 %4480 }
 0x637   :  { %v4483_v28 = vunpack.i.h.bf16 %v4481_v59  ;;  %v4482_v17 = vunpack.i.l.bf16 %v4481_v59  ;;  %v4486_v55 = vpop.permute.xlu1 %4485  ;;  %v1161_v59 = vsel %vm1159_vm15, %v4463_v1, %v9330_v46  ;;  %v4506_v46 = vpop.permute.xlu2 %4505 }
 0x638   :  { %v4488_v11 = vunpack.i.h.bf16 %v4486_v55  ;;  %v4487_v26 = vunpack.i.l.bf16 %v4486_v55  ;;  %v3866_v55 = vld [vmem:[%s9312_s2 + $0x18] sm:$0xff] }
 0x639   :  { %v1127_v36 = vsel %vm221_vm3, %v4482_v17, %v9410_v35  ;;  %v1125_v54 = vsel %vm221_vm3, %v9411_v5, %v4483_v28  ;;  %1255 = vperm.xlu1 %4514, %v3866_v55  }
 0x63a   :  { %v1229_v45 = vpack.c.bf16 %v1127_v36, %v1109_v19  ;;  %v1231_v29 = vpack.c.bf16 %v1125_v54, %v1107_v16  ;;  %v1142_v2 = vsel %vm259_vm1, %v4458_v41, %v4487_v26  ;;  %v1146_v35 = vsel %vm259_vm1, %v4488_v11, %v4457_v51 }
 0x63b   :  { %v1238_v5 = vpack.c.bf16 %v1161_v59, %v1142_v2  ;;  %v1240_v1 = vpack.c.bf16 %v1165_v39, %v1146_v35  ;;  %v1217_v19 = vsel %vm1216_vm12, %v9413_v58, %v9412_v15  ;;  %v4508_v41 = vunpack.i.h.bf16 %v4506_v46 }
 0x63c   :  { %1285 = vmatpush.bf16.msra.mxu2 %v1229_v45  ;;  %1311 = vmatpush.bf16.msrb.mxu0 %v1231_v29  ;;  %v4507_v36 = vunpack.i.l.bf16 %v4506_v46  ;;  %v1251_v2 = vpack.c.bf16 %v1217_v19, %v1217_v19  ;;  %v9414_v45 = vunpack.i.l.bf16 %v6611_v13  ;;  %v9415_v35 = vunpack.i.h.bf16 %v6611_v13 }
 0x63d   :  { %1323 = vmatpush.bf16.msrb.mxu1 %v1238_v5  ;;  %1349 = vmatpush.bf16.msrb.mxu3 %v1240_v1  ;;  %v1128_v46 = vsel %vm221_vm3, %v4508_v41, %v4482_v17  ;;  %v1141_v50 = vsel %vm259_vm1, %v4487_v26, %v4488_v11 }
 0x63e   :  { %v4496_v16 = vpop.permute.xlu0 %4495  ;;  %v1124_v58 = vsel %vm221_vm3, %v4483_v28, %v4507_v36  ;;  %v1274_v28 = vsel %vm305_vm2, %v1251_v2, 0  ;;  %v9417_v2 = vunpack.i.l.bf16 %v6722_v20 }
 0x63f   :  { %v4498_v54 = vunpack.i.h.bf16 %v4496_v16  ;;  %v4497_v51 = vunpack.i.l.bf16 %v4496_v16  ;;  %v4501_v55 = vpop.permute.xlu1 %4500 }
 0x640   :  { %v4503_v59 = vunpack.i.h.bf16 %v4501_v55  ;;  %v4502_v39 = vunpack.i.l.bf16 %v4501_v55  ;;  %v9416_v55 = vunpack.i.h.bf16 %v6722_v20 }
 0x641   :  { %v1090_v29 = vsel %vm145_vm8, %v4497_v51, %v9414_v45  ;;  %v1088_v57 = vsel %vm145_vm8, %v9415_v35, %v4498_v54 }
 0x642   :  { %v1223_v5 = vpack.c.bf16 %v1090_v29, %v6528_v63  ;;  %v1225_v1 = vpack.c.bf16 %v1088_v57, %v6510_v38  ;;  %v1106_v15 = vsel %vm1104_vm9, %v4478_v31, %v4502_v39  ;;  %v1110_v19 = vsel %vm1104_vm9, %v4503_v59, %v4477_v23 }
 0x643   :  { %v1232_v13 = vpack.c.bf16 %v1124_v58, %v1106_v15  ;;  %v1234_v16 = vpack.c.bf16 %v1128_v46, %v1110_v19  ;;  %v1179_v38 = vsel %vm1178_vm14, %v4467_v44, %v4468_v37  ;;  %v1198_v63 = vsel %vm1197_vm13, %v4472_v40, %v4473_v61 }
 0x644   :  { %1286 = vmatpush.bf16.msra.mxu2 %v1223_v5  ;;  %1312 = vmatpush.bf16.msrb.mxu0 %v1225_v1  ;;  %v1245_v48 = vpack.c.bf16 %v1198_v63, %v1179_v38  ;;  %v1160_v45 = vsel %vm1159_vm15, %v9417_v2, %v9416_v55 }
 0x645   :  { %1324 = vmatpush.bf16.msrb.mxu1 %v1232_v13  ;;  %1350 = vmatpush.bf16.msrb.mxu3 %v1234_v16 }
 0x646   :  { %v4511_v31 = vpop.permute.xlu0 %4510 }
 0x647   :  { %v4513_v23 = vunpack.i.h.bf16 %v4511_v31  ;;  %v4512_v17 = vunpack.i.l.bf16 %v4511_v31  ;;  %3867 = vmatmul.msk.bf16.vlgmr.msra.gmra.mxu2 %vm301_vm10, %v6650_v30  ;;  %3869 = vmatmul.msk.bf16.vlgmr.msrb.gmra.mxu0 %vm301_vm10, %v6650_v30 }
 0x648   :  { %1334 = vmatpush.bf16.msrb.mxu2 %v1274_v28 }
 0x649   :  { %v1087_v37 = vsel %vm145_vm8, %v4498_v54, %v4512_v17  ;;  %v1091_v44 = vsel %vm145_vm8, %v4513_v23, %v4497_v51  ;;  %v1239_v54 = vpack.c.bf16 %v1160_v45, %v1141_v50  ;;  %v1105_v51 = vsel %vm1104_vm9, %v4502_v39, %v4503_v59 }
 0x64a   :  { %v1226_v61 = vpack.c.bf16 %v1087_v37, %v6540_v33  ;;  %v1228_v40 = vpack.c.bf16 %v1091_v44, %v6532_v62  ;;  %v1123_v62 = vsel %vm221_vm3, %v4507_v36, %v4508_v41  ;;  %v1086_v20 = vsel %vm145_vm8, %v4512_v17, %v4513_v23 }
 0x64b   :  { %v1233_v33 = vpack.c.bf16 %v1123_v62, %v1105_v51  ;;  %v1227_v11 = vpack.c.bf16 %v1086_v20, %v6536_v32 }
 0x64c   :  { %1335 = vmatpush.bf16.msrb.mxu2 %v1245_v48  ;;  %1325 = vmatpush.bf16.msrb.mxu1 %v1226_v61 }
 0x64d   :  { %1351 = vmatpush.bf16.msrb.mxu3 %v1228_v40 }
 0x64f   :  { %3870 = vmatmul.msk.bf16.vlgmr.msrb.gmra.mxu1 %vm301_vm10, %v6650_v30 }
 0x650   :  { %1336 = vmatpush.bf16.msrb.mxu2 %v1239_v54  ;;  %3872 = vmatmul.msk.bf16.vlgmr.msrb.gmra.mxu3 %vm301_vm10, %v6650_v30 }
 0x654   :  { %1337 = vmatpush.bf16.msrb.mxu2 %v1233_v33 }
 0x658   :  { %1338 = vmatpush.bf16.msrb.mxu2 %v1227_v11 }
 0x65b   :  { %3871 = vmatmul.msk.bf16.vlgmr.msrb.gmra.mxu2 %vm301_vm10, %v6650_v30 }
 0x6a5   :  { %v1301_v26 = vpop.f32.mrf.mxu3 }
 0x6ab   :  { %v1256_v39 = vpop.permute.xlu1 %1255 }
 0x6ac   :  { %v1302_v35 = vadd.f32 %v1301_v26, %v1256_v39 }
 0x6ad   :  { %v1303_v59 = vpop.f32.mrf.mxu3 }
 0x6ae   :  { %v1358_v58 = vmax.f32 %v1302_v35, 0.0 }
 0x6b0   :  { %v1368_v32 = vmul.f32 %v1358_v58, %v5455_v8 }
 0x6c4   :  { %v1314_v29 = vpop.f32.mrf.mxu0 }
 0x6c5   :  { %v1315_v57 = vadd.f32 %v1314_v29, %v1256_v39 }
 0x6c7   :  { %v1359_v41 = vmax.f32 %v1315_v57, 0.0 }
 0x6c9   :  { %v1369_v16 = vmul.f32 %v1359_v41, %v5457_v9 }
 0x6ca   :  { %v1288_v46 = vpop.f32.mrf.mxu2 }
 0x6cb   :  { %v1289_v36 = vadd.f32 %v1288_v46, %v1256_v39 }
 0x6cc   :  { %v1316_v5 = vpop.f32.mrf.mxu0  ;;  %v1327_v1 = vpop.f32.mrf.mxu1 }
 0x6cd   :  { %v1328_v15 = vadd.f32 %v1327_v1, %v1256_v39  ;;  %v1357_v19 = vmax.f32 %v1289_v36, 0.0 }
 0x6cf   :  { %v1360_v13 = vmax.f32 %v1328_v15, 0.0  ;;  %v1367_v30 = vmul.f32 %v1357_v19, %v5453_v7  ;;  %v3874_v19 = vld [vmem:[%s9312_s2 + $0x20] sm:$0xff] }
 0x6d1   :  { %v1370_v28 = vmul.f32 %v1360_v13, %v5459_v10  ;;  %v4515_v38 = vpack.i.bf16 %v1368_v32, %v1367_v30 }
 0x6d2   :  { %v1290_v63 = vpop.f32.mrf.mxu2 }
 0x6d3   :  { %v1353_v31 = vpop.f32.mrf.mxu3  ;;  %v4520_v23 = vpack.i.bf16 %v1370_v28, %v1369_v16  ;;  %4516 = vrot.lane.b32.xlu2 %v4515_v38, %s5372_s8 }
 0x6d4   :  { %v1329_v17 = vpop.f32.mrf.mxu1  ;;  %v1354_v48 = vadd.f32 %v1353_v31, %v1256_v39 }
 0x6d5   :  { %4521 = vrot.lane.b32.xlu0 %v4520_v23, %s5372_s8 }
 0x6d6   :  { %v1362_v50 = vmax.f32 %v1354_v48, 0.0 }
 0x6d8   :  { %v1372_v55 = vmul.f32 %v1362_v50, %v5445_v4 }
 0x6db   :  { %v1355_v37 = vpop.f32.mrf.mxu3 }
 0x6de   :  { %v1340_v44 = vpop.f32.mrf.mxu2 }
 0x6df   :  { %v1341_v61 = vadd.f32 %v1340_v44, %v1256_v39 }
 0x6e1   :  { %v1361_v40 = vmax.f32 %v1341_v61, 0.0 }
 0x6e3   :  { %v1371_v2 = vmul.f32 %v1361_v40, %v5443_v3 }
 0x6e5   :  { %v4525_v45 = vpack.i.bf16 %v1371_v2, %v1372_v55 }
 0x6e6   :  { %v1342_v54 = vpop.f32.mrf.mxu2 }
 0x6e7   :  { %4526 = vrot.lane.b32.xlu1 %v4525_v45, %s5372_s8 }
 0x72d   :  { %v4517_v51 = vpop.permute.xlu2 %4516 }
 0x72e   :  { %v4519_v62 = vunpack.i.h.bf16 %v4517_v51  ;;  %v4518_v33 = vunpack.i.l.bf16 %v4517_v51 }
 0x730   :  { %v6846_v26 = vsel %vm1067_vm11, %v4518_v33, %v4519_v62 }
 0x747   :  { %v4522_v20 = vpop.permute.xlu0 %4521 }
 0x748   :  { %v4523_v11 = vunpack.i.l.bf16 %v4522_v20  ;;  %v4524_v29 = vunpack.i.h.bf16 %v4522_v20 }
 0x74a   :  { %v6850_v59 = vsel %vm1067_vm11, %v4519_v62, %v4523_v11  ;;  %v6862_v58 = vsel %vm1067_vm11, %v4523_v11, %v4524_v29 }
 0x74b   :  { %v4540_v39 = vpack.i.bf16 %v6850_v59, %v6846_v26 }
 0x74d   :  { %4541 = vrot.lane.b32.xlu0 %v4540_v39, %s5373_s28  ;;  %4536 = vrot.lane.b32.xlu1 %v4540_v39, %s5374_s29 }
 0x74e   :  { %4531 = vrot.lane.b32.xlu2 %v4540_v39, %s5375_s30 }
 0x755   :  { %4556 = vrot.lane.b32.xlu0 %v4540_v39, %s5377_s20  ;;  %4551 = vrot.lane.b32.xlu1 %v4540_v39, %s5376_s19 }
 0x756   :  { %4546 = vrot.lane.b32.xlu2 %v4540_v39, %s5364_s12 }
 0x759   :  { %v4527_v35 = vpop.permute.xlu1 %4526 }
 0x75a   :  { %v4528_v57 = vunpack.i.l.bf16 %v4527_v35  ;;  %v4529_v36 = vunpack.i.h.bf16 %v4527_v35 }
 0x75c   :  { %v6866_v46 = vsel %vm1067_vm11, %v4528_v57, %v4518_v33  ;;  %v6878_v5 = vsel %vm1067_vm11, %v4524_v29, %v4529_v36  ;;  %v6882_v1 = vsel %vm1067_vm11, %v4529_v36, %v4528_v57 }
 0x75d   :  { %v4565_v41 = vpack.i.bf16 %v6866_v46, %v6862_v58  ;;  %v4610_v15 = vpack.i.bf16 %v6882_v1, %v6878_v5 }
 0x75e   :  { %4561 = vrot.lane.b32.xlu2 %v4540_v39, %s5363_s11 }
 0x75f   :  { %4566 = vrot.lane.b32.xlu0 %v4565_v41, %s5375_s30  ;;  %4576 = vrot.lane.b32.xlu1 %v4565_v41, %s5373_s28 }
 0x766   :  { %4571 = vrot.lane.b32.xlu2 %v4565_v41, %s5374_s29 }
 0x767   :  { %4581 = vrot.lane.b32.xlu0 %v4565_v41, %s5364_s12  ;;  %4596 = vrot.lane.b32.xlu1 %v4565_v41, %s5377_s20 }
 0x76e   :  { %4586 = vrot.lane.b32.xlu2 %v4565_v41, %s5376_s19 }
 0x76f   :  { %4601 = vrot.lane.b32.xlu0 %v4565_v41, %s5363_s11  ;;  %4611 = vrot.lane.b32.xlu1 %v4610_v15, %s5375_s30 }
 0x776   :  { %4591 = vrot.lane.b32.xlu2 %v4540_v39, %s5369_s17 }
 0x777   :  { %4606 = vrot.lane.b32.xlu0 %v4565_v41, %s5369_s17  ;;  %4616 = vrot.lane.b32.xlu1 %v4610_v15, %s5374_s29 }
 0x77e   :  { %4621 = vrot.lane.b32.xlu2 %v4610_v15, %s5373_s28 }
 0x77f   :  { %4626 = vrot.lane.b32.xlu0 %v4610_v15, %s5364_s12  ;;  %4631 = vrot.lane.b32.xlu1 %v4610_v15, %s5376_s19 }
 0x786   :  { %4636 = vrot.lane.b32.xlu2 %v4610_v15, %s5377_s20 }
 0x787   :  { %4641 = vrot.lane.b32.xlu0 %v4610_v15, %s5363_s11  ;;  %4646 = vrot.lane.b32.xlu1 %v4610_v15, %s5369_s17 }
 0x78e   :  { %1567 = vperm.xlu2 %4243, %v3874_v19  }
 0x7a8   :  { %v4532_v32 = vpop.permute.xlu2 %4531 }
 0x7a9   :  { %v4534_v13 = vunpack.i.h.bf16 %v4532_v32  ;;  %v4533_v16 = vunpack.i.l.bf16 %v4532_v32 }
 0x7ab   :  { %v1532_v30 = vsel %vm1216_vm12, %v4533_v16, %v4534_v13 }
 0x7ac   :  { %v1560_v28 = vpack.c.bf16 %v1532_v30, %v1532_v30 }
 0x7ae   :  { %v1577_v38 = vsel %vm305_vm2, %v1560_v28, 0 }
 0x7af   :  { %1607 = vmatpush.bf16.msra.mxu1 %v1577_v38 }
 0x7b0   :  { %v6904_v63 = vpop.permute.xlu2 %4546 }
 0x7b1   :  { %v4549_v45 = vunpack.i.h.bf16 %v6904_v63  ;;  %v4548_v54 = vunpack.i.l.bf16 %v6904_v63 }
 0x7b3   :  { %v1460_v41 = vsel %vm259_vm1, %v4548_v54, %v4549_v45 }
 0x7b8   :  { %v6906_v31 = vpop.permute.xlu2 %4561 }
 0x7b9   :  { %v9332_v35 = vunpack.i.h.bf16 %v6906_v31  ;;  %v9333_v57 = vunpack.i.l.bf16 %v6906_v31 }
 0x7bb   :  { %v1442_v32 = vsel %vm221_vm3, %v9333_v57, %v9332_v35 }
 0x7bf   :  { %v4542_v23 = vpop.permute.xlu0 %4541  ;;  %v6908_v17 = vpop.permute.xlu1 %4536 }
 0x7c0   :  { %v4544_v48 = vunpack.i.h.bf16 %v4542_v23  ;;  %v4543_v37 = vunpack.i.l.bf16 %v4542_v23  ;;  %v4539_v44 = vunpack.i.h.bf16 %v6908_v17  ;;  %v4538_v50 = vunpack.i.l.bf16 %v6908_v17  ;;  %v6912_v61 = vpop.permute.xlu2 %4571 }
 0x7c2   :  { %v1496_v40 = vsel %vm1178_vm14, %v4538_v50, %v4539_v44  ;;  %v1514_v55 = vsel %vm1197_vm13, %v4543_v37, %v4544_v48 }
 0x7c3   :  { %v1554_v2 = vpack.c.bf16 %v1514_v55, %v1496_v40 }
 0x7c5   :  { %1608 = vmatpush.bf16.msra.mxu1 %v1554_v2 }
 0x7c7   :  { %v6920_v51 = vpop.permute.xlu0 %4556  ;;  %v4552_v62 = vpop.permute.xlu1 %4551 }
 0x7c8   :  { %v9334_v33 = vunpack.i.h.bf16 %v6920_v51  ;;  %v9335_v20 = vunpack.i.l.bf16 %v6920_v51  ;;  %v4554_v11 = vunpack.i.h.bf16 %v4552_v62  ;;  %v4553_v39 = vunpack.i.l.bf16 %v4552_v62  ;;  %v6924_v29 = vpop.permute.xlu2 %4586 }
 0x7ca   :  { %v1478_v36 = vsel %vm1159_vm15, %v4553_v39, %v4554_v11  ;;  %v1424_v19 = vsel %vm1104_vm9, %v9335_v20, %v9334_v33  ;;  %v9336_v33 = vunpack.i.h.bf16 %v6924_v29  ;;  %v9341_v20 = vunpack.i.l.bf16 %v6924_v29 }
 0x7cb   :  { %v1548_v15 = vpack.c.bf16 %v1478_v36, %v1460_v41  ;;  %v1542_v38 = vpack.c.bf16 %v1442_v32, %v1424_v19 }
 0x7cd   :  { %1609 = vmatpush.bf16.msra.mxu1 %v1548_v15  ;;  %v9342_v15 = vunpack.i.h.bf16 %v6912_v61 }
 0x7d0   :  { %v6950_v17 = vpop.permute.xlu2 %4591 }
 0x7d1   :  { %v6944_v30 = vpop.permute.xlu0 %4566  ;;  %v6946_v28 = vpop.permute.xlu1 %4576  ;;  %v4594_v55 = vunpack.i.h.bf16 %v6950_v17  ;;  %v4593_v2 = vunpack.i.l.bf16 %v6950_v17  ;;  %1610 = vmatpush.bf16.msra.mxu1 %v1542_v38  ;;  %v9343_v38 = vunpack.i.l.bf16 %v6912_v61 }
 0x7d2   :  { %v4569_v63 = vunpack.i.h.bf16 %v6944_v30  ;;  %v4568_v23 = vunpack.i.l.bf16 %v6944_v30  ;;  %v4579_v40 = vunpack.i.h.bf16 %v6946_v28  ;;  %v4578_v62 = vunpack.i.l.bf16 %v6946_v28 }
 0x7d3   :  { %v1406_v19 = vsel %vm145_vm8, %v4593_v2, %v4594_v55  ;;  %v9422_v28 = vunpack.i.l.bf16 %v6912_v61 }
 0x7d4   :  { %v1533_v41 = vsel %vm1216_vm12, %v4569_v63, %v4533_v16  ;;  %v1531_v36 = vsel %vm1216_vm12, %v4534_v13, %v4568_v23  ;;  %v1536_v35 = vpack.c.bf16 %v1406_v19, %v6846_v26  ;;  %v1515_v13 = vsel %vm1197_vm13, %v4579_v40, %v4543_v37 }
 0x7d5   :  { %v1559_v32 = vpack.c.bf16 %v1533_v41, %v1533_v41  ;;  %v1561_v30 = vpack.c.bf16 %v1531_v36, %v1531_v36  ;;  %v6980_v41 = vld [vmem:[%s9311_s1 + $0x10] sm:$0xf]  ;;  %v1513_v26 = vsel %vm1197_vm13, %v4544_v48, %v4578_v62  ;;  %v1495_v48 = vsel %vm1178_vm14, %v4539_v44, %v9343_v38 }
 0x7d6   :  { %1611 = vmatpush.bf16.msra.mxu1 %v1536_v35  ;;  %v1497_v35 = vsel %vm1178_vm14, %v9342_v15, %v4538_v50 }
 0x7d7   :  { %v1574_v16 = vsel %vm305_vm2, %v1559_v32, 0  ;;  %v1580_v57 = vsel %vm305_vm2, %v1561_v30, 0  ;;  %v1553_v30 = vpack.c.bf16 %v1515_v13, %v1497_v35  ;;  %v1477_v13 = vsel %vm1159_vm15, %v4554_v11, %v9341_v20 }
 0x7d8   :  { %1594 = vmatpush.bf16.msra.mxu0 %v1574_v16  ;;  %1620 = vmatpush.bf16.msra.mxu2 %v1580_v57  ;;  %v1555_v57 = vpack.c.bf16 %v1513_v26, %v1495_v48  ;;  %v1479_v16 = vsel %vm1159_vm15, %v9336_v33, %v4553_v39  ;;  %v9418_v11 = vunpack.i.l.bf16 %v6920_v51 }
 0x7d9   :  { %v6986_v36 = vpop.permute.xlu0 %4581  ;;  %v6988_v37 = vpop.permute.xlu1 %4596  ;;  %3876 = vmatmul.msk.bf16.vlgmr.msra.gmra.mxu1 %vm301_vm10, %v6980_v41 }
 0x7da   :  { %v9337_v19 = vunpack.i.h.bf16 %v6986_v36  ;;  %v9338_v32 = vunpack.i.l.bf16 %v6986_v36 }
 0x7dc   :  { %1595 = vmatpush.bf16.msra.mxu0 %v1553_v30  ;;  %v1461_v50 = vsel %vm259_vm1, %v9337_v19, %v4548_v54  ;;  %v1459_v44 = vsel %vm259_vm1, %v4549_v45, %v9338_v32  ;;  %1621 = vmatpush.bf16.msra.mxu2 %v1555_v57  ;;  %v9339_v54 = vunpack.i.h.bf16 %v6988_v37  ;;  %v9340_v30 = vunpack.i.l.bf16 %v6988_v37 }
 0x7dd   :  { %v1547_v26 = vpack.c.bf16 %v1479_v16, %v1461_v50  ;;  %v1549_v35 = vpack.c.bf16 %v1477_v13, %v1459_v44  ;;  %v9419_v50 = vunpack.i.h.bf16 %v6920_v51  ;;  %v4622_v44 = vpop.permute.xlu2 %4621  ;;  %v9420_v13 = vunpack.i.l.bf16 %v6906_v31 }
 0x7de   :  { %v1425_v57 = vsel %vm1104_vm9, %v9339_v54, %v9418_v11  ;;  %v4624_v15 = vunpack.i.h.bf16 %v4622_v44  ;;  %v4623_v38 = vunpack.i.l.bf16 %v4622_v44 }
 0x7df   :  { %v1423_v16 = vsel %vm1104_vm9, %v9419_v50, %v9340_v30 }
 0x7e0   :  { %1596 = vmatpush.bf16.msra.mxu0 %v1547_v26  ;;  %1622 = vmatpush.bf16.msra.mxu2 %v1549_v35  ;;  %v9421_v35 = vunpack.i.h.bf16 %v6906_v31 }
 0x7e1   :  { %v7020_v39 = vpop.permute.xlu0 %4601  ;;  %v4612_v48 = vpop.permute.xlu1 %4611 }
 0x7e2   :  { %v4604_v33 = vunpack.i.h.bf16 %v7020_v39  ;;  %v4603_v45 = vunpack.i.l.bf16 %v7020_v39  ;;  %v4614_v19 = vunpack.i.h.bf16 %v4612_v48  ;;  %v4613_v32 = vunpack.i.l.bf16 %v4612_v48 }
 0x7e4   :  { %v1443_v26 = vsel %vm221_vm3, %v4604_v33, %v9420_v13  ;;  %v1441_v48 = vsel %vm221_vm3, %v9421_v35, %v4603_v45  ;;  %v1530_v51 = vsel %vm1216_vm12, %v4568_v23, %v4613_v32  ;;  %v1534_v11 = vsel %vm1216_vm12, %v4614_v19, %v4569_v63 }
 0x7e5   :  { %v1541_v50 = vpack.c.bf16 %v1443_v26, %v1425_v57  ;;  %v1543_v54 = vpack.c.bf16 %v1441_v48, %v1423_v16  ;;  %v1562_v30 = vpack.c.bf16 %v1530_v51, %v1530_v51  ;;  %v1564_v20 = vpack.c.bf16 %v1534_v11, %v1534_v11 }
 0x7e6   :  { %v1529_v23 = vsel %vm1216_vm12, %v4613_v32, %v4614_v19 }
 0x7e7   :  { %1597 = vmatpush.bf16.msra.mxu0 %v1541_v50  ;;  %1623 = vmatpush.bf16.msra.mxu2 %v1543_v54  ;;  %v1583_v13 = vsel %vm305_vm2, %v1562_v30, 0  ;;  %v1589_v31 = vsel %vm305_vm2, %v1564_v20, 0  ;;  %v1512_v54 = vsel %vm1197_vm13, %v4578_v62, %v4623_v38  ;;  %v1516_v20 = vsel %vm1197_vm13, %v4624_v15, %v4579_v40 }
 0x7e8   :  { %1633 = vmatpush.bf16.msra.mxu3 %v1583_v13  ;;  %1659 = vmatpush.bf16.msrb.mxu1 %v1589_v31  ;;  %v1563_v19 = vpack.c.bf16 %v1529_v23, %v1529_v23  ;;  %v9423_v30 = vunpack.i.h.bf16 %v6912_v61  ;;  %v1511_v31 = vsel %vm1197_vm13, %v4623_v38, %v4624_v15  ;;  %v9426_v38 = vunpack.i.h.bf16 %v6986_v36 }
 0x7e9   :  { %v7056_v35 = vpop.permute.xlu0 %4606  ;;  %v4617_v63 = vpop.permute.xlu1 %4616 }
 0x7ea   :  { %v4609_v57 = vunpack.i.h.bf16 %v7056_v35  ;;  %v4608_v16 = vunpack.i.l.bf16 %v7056_v35  ;;  %v4619_v26 = vunpack.i.h.bf16 %v4617_v63  ;;  %v4618_v44 = vunpack.i.l.bf16 %v4617_v63 }
 0x7eb   :  { %v1586_v17 = vsel %vm305_vm2, %v1563_v19, 0  ;;  %v9425_v19 = vunpack.i.l.bf16 %v6924_v29 }
 0x7ec   :  { %v1407_v32 = vsel %vm145_vm8, %v4609_v57, %v4593_v2  ;;  %v1405_v62 = vsel %vm145_vm8, %v4594_v55, %v4608_v16  ;;  %v1494_v40 = vsel %vm1178_vm14, %v9422_v28, %v4618_v44  ;;  %v1498_v48 = vsel %vm1178_vm14, %v4619_v26, %v9423_v30 }
 0x7ed   :  { %v1535_v51 = vpack.c.bf16 %v1407_v32, %v6866_v46  ;;  %v1537_v2 = vpack.c.bf16 %v1405_v62, %v6850_v59  ;;  %v1556_v11 = vpack.c.bf16 %v1512_v54, %v1494_v40  ;;  %v1558_v50 = vpack.c.bf16 %v1516_v20, %v1498_v48  ;;  %v4637_v20 = vpop.permute.xlu2 %4636 }
 0x7ee   :  { %v1493_v55 = vsel %vm1178_vm14, %v4618_v44, %v4619_v26  ;;  %v9424_v26 = vunpack.i.l.bf16 %v6986_v36  ;;  %v9427_v62 = vunpack.i.h.bf16 %v6924_v29  ;;  %v4638_v36 = vunpack.i.l.bf16 %v4637_v20 }
 0x7ef   :  { %1598 = vmatpush.bf16.msra.mxu0 %v1535_v51  ;;  %1624 = vmatpush.bf16.msra.mxu2 %v1537_v2  ;;  %v1557_v54 = vpack.c.bf16 %v1511_v31, %v1493_v55  ;;  %v9428_v31 = vunpack.i.l.bf16 %v6988_v37 }
 0x7f0   :  { %1634 = vmatpush.bf16.msra.mxu3 %v1556_v11  ;;  %1660 = vmatpush.bf16.msrb.mxu1 %v1558_v50  ;;  %v4639_v11 = vunpack.i.h.bf16 %v4637_v20 }
 0x7f1   :  { %v4627_v61 = vpop.permute.xlu0 %4626  ;;  %v4632_v13 = vpop.permute.xlu1 %4631 }
 0x7f2   :  { %v4629_v46 = vunpack.i.h.bf16 %v4627_v61  ;;  %v4628_v23 = vunpack.i.l.bf16 %v4627_v61  ;;  %v4634_v59 = vunpack.i.h.bf16 %v4632_v13  ;;  %v4633_v63 = vunpack.i.l.bf16 %v4632_v13  ;;  %3875 = vmatmul.msk.bf16.vlgmr.msra.gmra.mxu0 %vm301_vm10, %v6980_v41  ;;  %3877 = vmatmul.msk.bf16.vlgmr.msra.gmra.mxu2 %vm301_vm10, %v6980_v41 }
 0x7f3   :  { %1646 = vmatpush.bf16.msrb.mxu0 %v1586_v17 }
 0x7f4   :  { %v1458_v44 = vsel %vm259_vm1, %v9424_v26, %v4628_v23  ;;  %v1476_v15 = vsel %vm1159_vm15, %v9425_v19, %v4633_v63  ;;  %v1462_v32 = vsel %vm259_vm1, %v4629_v46, %v9426_v38  ;;  %v1480_v28 = vsel %vm1159_vm15, %v4634_v59, %v9427_v62 }
 0x7f5   :  { %v1550_v40 = vpack.c.bf16 %v1476_v15, %v1458_v44  ;;  %v1552_v30 = vpack.c.bf16 %v1480_v28, %v1462_v32  ;;  %v1457_v48 = vsel %vm259_vm1, %v4628_v23, %v4629_v46  ;;  %v1475_v51 = vsel %vm1159_vm15, %v4633_v63, %v4634_v59 }
 0x7f6   :  { %v1551_v2 = vpack.c.bf16 %v1475_v51, %v1457_v48  ;;  %v1422_v46 = vsel %vm1104_vm9, %v9428_v31, %v4638_v36  ;;  %v1421_v23 = vsel %vm1104_vm9, %v4638_v36, %v4639_v11 }
 0x7f7   :  { %1647 = vmatpush.bf16.msrb.mxu0 %v1557_v54  ;;  %1635 = vmatpush.bf16.msra.mxu3 %v1550_v40  ;;  %v9429_v54 = vunpack.i.h.bf16 %v6988_v37 }
 0x7f8   :  { %1661 = vmatpush.bf16.msrb.mxu1 %v1552_v30 }
 0x7f9   :  { %v4642_v50 = vpop.permute.xlu0 %4641  ;;  %v4647_v29 = vpop.permute.xlu1 %4646  ;;  %v1426_v20 = vsel %vm1104_vm9, %v4639_v11, %v9429_v54 }
 0x7fa   :  { %v4644_v17 = vunpack.i.h.bf16 %v4642_v50  ;;  %v4643_v55 = vunpack.i.l.bf16 %v4642_v50  ;;  %v4649_v61 = vunpack.i.h.bf16 %v4647_v29  ;;  %v4648_v13 = vunpack.i.l.bf16 %v4647_v29 }
 0x7fb   :  { %1648 = vmatpush.bf16.msrb.mxu0 %v1551_v2 }
 0x7fc   :  { %v1440_v59 = vsel %vm221_vm3, %v4603_v45, %v4643_v55  ;;  %v1439_v63 = vsel %vm221_vm3, %v4643_v55, %v4644_v17  ;;  %v1444_v26 = vsel %vm221_vm3, %v4644_v17, %v4604_v33  ;;  %v1404_v45 = vsel %vm145_vm8, %v4608_v16, %v4648_v13  ;;  %v1568_v16 = vpop.permute.xlu2 %1567 }
 0x7fd   :  { %v1544_v44 = vpack.c.bf16 %v1440_v59, %v1422_v46  ;;  %v1545_v19 = vpack.c.bf16 %v1439_v63, %v1421_v23  ;;  %v1546_v15 = vpack.c.bf16 %v1444_v26, %v1426_v20  ;;  %v1403_v38 = vsel %vm145_vm8, %v4648_v13, %v4649_v61 }
 0x7fe   :  { %v1408_v37 = vsel %vm145_vm8, %v4649_v61, %v4609_v57  ;;  %v1538_v33 = vpack.c.bf16 %v1404_v45, %v6862_v58  ;;  %v1539_v39 = vpack.c.bf16 %v1403_v38, %v6878_v5 }
 0x7ff   :  { %1636 = vmatpush.bf16.msra.mxu3 %v1544_v44  ;;  %1649 = vmatpush.bf16.msrb.mxu0 %v1545_v19  ;;  %v1540_v32 = vpack.c.bf16 %v1408_v37, %v6882_v1 }
 0x800   :  { %1662 = vmatpush.bf16.msrb.mxu1 %v1546_v15 }
 0x803   :  { %1637 = vmatpush.bf16.msra.mxu3 %v1538_v33  ;;  %1650 = vmatpush.bf16.msrb.mxu0 %v1539_v39 }
 0x804   :  { %1663 = vmatpush.bf16.msrb.mxu1 %v1540_v32 }
 0x806   :  { %3878 = vmatmul.msk.bf16.vlgmr.msra.gmra.mxu3 %vm301_vm10, %v6980_v41  ;;  %3879 = vmatmul.msk.bf16.vlgmr.msrb.gmra.mxu0 %vm301_vm10, %v6980_v41 }
 0x807   :  { %3880 = vmatmul.msk.bf16.vlgmr.msrb.gmra.mxu1 %vm301_vm10, %v6980_v41 }
 0x856   :  { %v1613_v35 = vpop.f32.mrf.mxu1 }
 0x857   :  { %v1614_v58 = vadd.f32 %v1613_v35, %v1568_v16 }
 0x859   :  { %v7159_v5 = vadd.f32 %v1614_v58, %v6470_v53 }
 0x85b   :  { %v1680_v40 = vmul.f32 %v7159_v5, %v5455_v8 }
 0x85e   :  { %v1615_v57 = vpop.f32.mrf.mxu1 }
 0x86f   :  { %v1600_v62 = vpop.f32.mrf.mxu0 }
 0x870   :  { %v1601_v1 = vadd.f32 %v1600_v62, %v1568_v16 }
 0x872   :  { %v7162_v28 = vadd.f32 %v1601_v1, %v6467_v22 }
 0x874   :  { %v1679_v30 = vmul.f32 %v7162_v28, %v5453_v7 }
 0x875   :  { %v1626_v48 = vpop.f32.mrf.mxu2 }
 0x876   :  { %v4650_v41 = vpack.i.bf16 %v1680_v40, %v1679_v30  ;;  %v1627_v11 = vadd.f32 %v1626_v48, %v1568_v16  ;;  %v3882_v30 = vld [vmem:[%s9312_s2 + $0x28] sm:$0xff] }
 0x877   :  { %v1602_v51 = vpop.f32.mrf.mxu0 }
 0x878   :  { %4651 = vrot.lane.b32.xlu0 %v4650_v41, %s5372_s8  ;;  %v7170_v50 = vadd.f32 %v1627_v11, %v6482_v25 }
 0x87a   :  { %v1681_v55 = vmul.f32 %v7170_v50, %v5457_v9 }
 0x87d   :  { %v1628_v2 = vpop.f32.mrf.mxu2 }
 0x883   :  { %v1652_v36 = vpop.f32.mrf.mxu0 }
 0x884   :  { %v1665_v53 = vpop.f32.mrf.mxu1  ;;  %v1653_v29 = vadd.f32 %v1652_v36, %v1568_v16 }
 0x885   :  { %v1666_v22 = vadd.f32 %v1665_v53, %v1568_v16 }
 0x886   :  { %v7180_v31 = vadd.f32 %v1653_v29, %v6496_v14 }
 0x887   :  { %v7173_v17 = vadd.f32 %v1666_v22, %v6487_v18 }
 0x888   :  { %v1683_v18 = vmul.f32 %v7180_v31, %v5443_v3 }
 0x889   :  { %v1684_v61 = vmul.f32 %v7173_v17, %v5445_v4  ;;  %v1639_v13 = vpop.f32.mrf.mxu3 }
 0x88a   :  { %v1640_v46 = vadd.f32 %v1639_v13, %v1568_v16 }
 0x88b   :  { %v4655_v23 = vpack.i.bf16 %v1684_v61, %v1681_v55  ;;  %v1654_v59 = vpop.f32.mrf.mxu0 }
 0x88c   :  { %v7183_v25 = vadd.f32 %v1640_v46, %v6499_v34  ;;  %v1667_v63 = vpop.f32.mrf.mxu1 }
 0x88d   :  { %4656 = vrot.lane.b32.xlu1 %v4655_v23, %s5372_s8 }
 0x88e   :  { %v1682_v54 = vmul.f32 %v7183_v25, %v5459_v10 }
 0x890   :  { %v4660_v20 = vpack.i.bf16 %v1683_v18, %v1682_v54 }
 0x891   :  { %v1641_v26 = vpop.f32.mrf.mxu3 }
 0x892   :  { %4661 = vrot.lane.b32.xlu2 %v4660_v20, %s5372_s8 }
 0x8ea   :  { %v4652_v14 = vpop.permute.xlu0 %4651 }
 0x8eb   :  { %v4654_v44 = vunpack.i.h.bf16 %v4652_v14  ;;  %v4653_v19 = vunpack.i.l.bf16 %v4652_v14 }
 0x8ec   :  { %v4662_v33 = vpop.permute.xlu2 %4661 }
 0x8ed   :  { %v7193_v34 = vsel %vm1067_vm11, %v4653_v19, %v4654_v44  ;;  %v4663_v32 = vunpack.i.l.bf16 %v4662_v33  ;;  %v4664_v58 = vunpack.i.h.bf16 %v4662_v33 }
 0x8ef   :  { %v7226_v1 = vsel %vm1067_vm11, %v4663_v32, %v4664_v58 }
 0x8ff   :  { %v4657_v15 = vpop.permute.xlu1 %4656 }
 0x900   :  { %v4658_v45 = vunpack.i.l.bf16 %v4657_v15  ;;  %v4659_v39 = vunpack.i.h.bf16 %v4657_v15 }
 0x902   :  { %v7197_v38 = vsel %vm1067_vm11, %v4654_v44, %v4658_v45  ;;  %v7209_v35 = vsel %vm1067_vm11, %v4658_v45, %v4663_v32  ;;  %v7213_v57 = vsel %vm1067_vm11, %v4659_v39, %v4653_v19  ;;  %v7222_v62 = vsel %vm1067_vm11, %v4664_v58, %v4659_v39 }
 0x903   :  { %v4675_v37 = vpack.i.bf16 %v7197_v38, %v7193_v34  ;;  %v4705_v16 = vpack.i.bf16 %v7209_v35, %v7213_v57  ;;  %v4720_v40 = vpack.i.bf16 %v7226_v1, %v7222_v62 }
 0x905   :  { %4676 = vrot.lane.b32.xlu2 %v4675_v37, %s5373_s28  ;;  %4671 = vrot.lane.b32.xlu1 %v4675_v37, %s5374_s29 }
 0x906   :  { %4666 = vrot.lane.b32.xlu0 %v4675_v37, %s5375_s30 }
 0x90d   :  { %4701 = vrot.lane.b32.xlu2 %v4675_v37, %s5369_s17  ;;  %4686 = vrot.lane.b32.xlu1 %v4675_v37, %s5376_s19 }
 0x90e   :  { %4681 = vrot.lane.b32.xlu0 %v4675_v37, %s5364_s12 }
 0x915   :  { %4706 = vrot.lane.b32.xlu2 %v4705_v16, %s5375_s30  ;;  %4696 = vrot.lane.b32.xlu1 %v4675_v37, %s5363_s11 }
 0x916   :  { %4691 = vrot.lane.b32.xlu0 %v4675_v37, %s5377_s20 }
 0x91d   :  { %4711 = vrot.lane.b32.xlu2 %v4705_v16, %s5374_s29  ;;  %4721 = vrot.lane.b32.xlu1 %v4720_v40, %s5375_s30 }
 0x91e   :  { %4716 = vrot.lane.b32.xlu0 %v4705_v16, %s5373_s28 }
 0x925   :  { %4736 = vrot.lane.b32.xlu2 %v4720_v40, %s5374_s29  ;;  %4731 = vrot.lane.b32.xlu1 %v4705_v16, %s5376_s19 }
 0x926   :  { %4726 = vrot.lane.b32.xlu0 %v4705_v16, %s5364_s12 }
 0x92d   :  { %4751 = vrot.lane.b32.xlu2 %v4705_v16, %s5363_s11  ;;  %4746 = vrot.lane.b32.xlu1 %v4705_v16, %s5377_s20 }
 0x92e   :  { %4741 = vrot.lane.b32.xlu0 %v4720_v40, %s5373_s28 }
 0x935   :  { %4756 = vrot.lane.b32.xlu2 %v4705_v16, %s5369_s17  ;;  %1785 = vrot.lane.b32.xlu1 %v7222_v62, %s5376_s19 }
 0x936   :  { %1767 = vrot.lane.b32.xlu0 %v7222_v62, %s5364_s12 }
 0x93d   :  { %1713 = vrot.lane.b32.xlu2 %v7222_v62, %s5369_s17  ;;  %1749 = vrot.lane.b32.xlu1 %v7222_v62, %s5363_s11 }
 0x93e   :  { %1731 = vrot.lane.b32.xlu0 %v7222_v62, %s5377_s20 }
 0x945   :  { %1729 = vrot.lane.b32.xlu2 %v7226_v1, %s5377_s20  ;;  %1783 = vrot.lane.b32.xlu1 %v7226_v1, %s5376_s19 }
 0x946   :  { %1765 = vrot.lane.b32.xlu0 %v7226_v1, %s5364_s12 }
 0x94d   :  { %1879 = vperm.xlu2 %4243, %v3882_v30   ;;  %1711 = vrot.lane.b32.xlu1 %v7226_v1, %s5369_s17 }
 0x94e   :  { %1747 = vrot.lane.b32.xlu0 %v7226_v1, %s5363_s11 }
 0x95f   :  { %v7263_v48 = vpop.permute.xlu2 %4676 }
 0x960   :  { %v4679_v13 = vunpack.i.h.bf16 %v7263_v48  ;;  %v4678_v63 = vunpack.i.l.bf16 %v7263_v48 }
 0x962   :  { %v1826_v32 = vsel %vm1197_vm13, %v4678_v63, %v4679_v13 }
 0x967   :  { %v7265_v41 = vpop.permute.xlu2 %4701 }
 0x96f   :  { %v7267_v51 = vpop.permute.xlu2 %4706 }
 0x970   :  { %v4709_v36 = vunpack.i.h.bf16 %v7267_v51  ;;  %v4708_v53 = vunpack.i.l.bf16 %v7267_v51 }
 0x977   :  { %v7269_v2 = vpop.permute.xlu1 %4671  ;;  %v7292_v15 = vpop.permute.xlu2 %4711 }
 0x978   :  { %v4667_v11 = vpop.permute.xlu0 %4666  ;;  %v4674_v55 = vunpack.i.h.bf16 %v7269_v2  ;;  %v4673_v61 = vunpack.i.l.bf16 %v7269_v2 }
 0x979   :  { %v4669_v22 = vunpack.i.h.bf16 %v4667_v11  ;;  %v4668_v29 = vunpack.i.l.bf16 %v4667_v11 }
 0x97a   :  { %v1808_v19 = vsel %vm1178_vm14, %v4673_v61, %v4674_v55 }
 0x97b   :  { %v1845_v46 = vsel %vm1216_vm12, %v4708_v53, %v4668_v29  ;;  %v1844_v23 = vsel %vm1216_vm12, %v4668_v29, %v4669_v22  ;;  %v1843_v59 = vsel %vm1216_vm12, %v4669_v22, %v4709_v36  ;;  %v1866_v40 = vpack.c.bf16 %v1826_v32, %v1808_v19 }
 0x97c   :  { %v1871_v18 = vpack.c.bf16 %v1845_v46, %v1845_v46  ;;  %v1872_v54 = vpack.c.bf16 %v1844_v23, %v1844_v23  ;;  %v1873_v20 = vpack.c.bf16 %v1843_v59, %v1843_v59  ;;  %v9345_v23 = vunpack.i.h.bf16 %v7265_v41 }
 0x97d   :  { %v9346_v59 = vunpack.i.l.bf16 %v7265_v41  ;;  %v4713_v32 = vunpack.i.l.bf16 %v7292_v15 }
 0x97e   :  { %v1886_v26 = vsel %vm305_vm2, %v1871_v18, 0  ;;  %v1889_v14 = vsel %vm305_vm2, %v1872_v54, 0  ;;  %v1892_v44 = vsel %vm305_vm2, %v1873_v20, 0 }
 0x97f   :  { %1906 = vmatpush.bf16.msrb.mxu2 %v1886_v26  ;;  %1919 = vmatpush.bf16.msrb.mxu3 %v1889_v14  ;;  %v7294_v45 = vpop.permute.xlu1 %4686  ;;  %v7318_v18 = vpop.permute.xlu2 %4736  ;;  %v1718_v19 = vsel %vm145_vm8, %v9346_v59, %v9345_v23  ;;  %v7350_v23 = vld [vmem:[%s9311_s1 + $0x14] sm:$0xf] }
 0x980   :  { %1932 = vmatpush.bf16.msra.mxu0 %v1892_v44  ;;  %v4689_v37 = vunpack.i.h.bf16 %v7294_v45  ;;  %v4688_v33 = vunpack.i.l.bf16 %v7294_v45  ;;  %v7298_v39 = vpop.permute.xlu0 %4681 }
 0x981   :  { %v4684_v16 = vunpack.i.h.bf16 %v7298_v39  ;;  %v4683_v58 = vunpack.i.l.bf16 %v7298_v39  ;;  %v4714_v39 = vunpack.i.h.bf16 %v7292_v15  ;;  %v1809_v15 = vsel %vm1178_vm14, %v4713_v32, %v4673_v61 }
 0x982   :  { %v1790_v30 = vsel %vm1159_vm15, %v4688_v33, %v4689_v37 }
 0x983   :  { %1920 = vmatpush.bf16.msrb.mxu3 %v1866_v40  ;;  %v1772_v48 = vsel %vm259_vm1, %v4683_v58, %v4684_v16 }
 0x984   :  { %v1860_v2 = vpack.c.bf16 %v1790_v30, %v1772_v48 }
 0x987   :  { %1921 = vmatpush.bf16.msrb.mxu3 %v1860_v2  ;;  %v7310_v11 = vpop.permute.xlu1 %4696 }
 0x988   :  { %v9344_v22 = vunpack.i.h.bf16 %v7310_v11  ;;  %v4698_v29 = vunpack.i.l.bf16 %v7310_v11  ;;  %v7314_v46 = vpop.permute.xlu0 %4691 }
 0x989   :  { %v9347_v54 = vunpack.i.h.bf16 %v7314_v46  ;;  %v4693_v20 = vunpack.i.l.bf16 %v7314_v46 }
 0x98a   :  { %v1754_v26 = vsel %vm221_vm3, %v4698_v29, %v9344_v22  ;;  %v1848_v22 = vpack.c.bf16 %v1718_v19, %v7193_v34  ;;  %v7364_v19 = vpop.permute.xlu2 %4751 }
 0x98b   :  { %v1736_v14 = vsel %vm1104_vm9, %v4693_v20, %v9347_v54 }
 0x98c   :  { %v1854_v44 = vpack.c.bf16 %v1754_v26, %v1736_v14 }
 0x98e   :  { %1922 = vmatpush.bf16.msrb.mxu3 %v1854_v44  ;;  %v1807_v44 = vsel %vm1178_vm14, %v4674_v55, %v4714_v39 }
 0x98f   :  { %v4722_v40 = vpop.permute.xlu1 %4721 }
 0x990   :  { %v4724_v30 = vunpack.i.h.bf16 %v4722_v40  ;;  %v4723_v48 = vunpack.i.l.bf16 %v4722_v40  ;;  %v7342_v2 = vpop.permute.xlu0 %4716 }
 0x991   :  { %v4719_v26 = vunpack.i.h.bf16 %v7342_v2  ;;  %v4718_v14 = vunpack.i.l.bf16 %v7342_v2 }
 0x992   :  { %1923 = vmatpush.bf16.msrb.mxu3 %v1848_v22  ;;  %v1842_v34 = vsel %vm1216_vm12, %v4709_v36, %v4724_v30  ;;  %v1846_v22 = vsel %vm1216_vm12, %v4723_v48, %v4708_v53  ;;  %v7399_v45 = vpop.permute.xlu2 %4756 }
 0x993   :  { %v1827_v40 = vsel %vm1197_vm13, %v4718_v14, %v4678_v63  ;;  %v1825_v61 = vsel %vm1197_vm13, %v4679_v13, %v4719_v26  ;;  %v1874_v2 = vpack.c.bf16 %v1842_v34, %v1842_v34  ;;  %v1876_v55 = vpack.c.bf16 %v1846_v22, %v1846_v22 }
 0x994   :  { %v1865_v59 = vpack.c.bf16 %v1827_v40, %v1809_v15  ;;  %v1867_v54 = vpack.c.bf16 %v1825_v61, %v1807_v44 }
 0x995   :  { %3884 = vmatmul.msk.bf16.vlgmr.msrb.gmra.mxu3 %vm301_vm10, %v7350_v23  ;;  %v1895_v51 = vsel %vm305_vm2, %v1874_v2, 0  ;;  %v1901_v36 = vsel %vm305_vm2, %v1876_v55, 0 }
 0x996   :  { %1907 = vmatpush.bf16.msrb.mxu2 %v1865_v59  ;;  %1933 = vmatpush.bf16.msra.mxu0 %v1867_v54  ;;  %v4739_v54 = vunpack.i.h.bf16 %v7318_v18 }
 0x997   :  { %1945 = vmatpush.bf16.msra.mxu1 %v1895_v51  ;;  %1971 = vmatpush.bf16.msra.mxu3 %v1901_v36  ;;  %v7374_v53 = vpop.permute.xlu1 %4731  ;;  %v4753_v51 = vunpack.i.l.bf16 %v7364_v19 }
 0x998   :  { %v9348_v63 = vunpack.i.h.bf16 %v7374_v53  ;;  %v4733_v13 = vunpack.i.l.bf16 %v7374_v53  ;;  %v7378_v34 = vpop.permute.xlu0 %4726 }
 0x999   :  { %v9349_v15 = vunpack.i.h.bf16 %v7378_v34  ;;  %v4728_v44 = vunpack.i.l.bf16 %v7378_v34 }
 0x99a   :  { %v1791_v22 = vsel %vm1159_vm15, %v4733_v13, %v4688_v33  ;;  %v1789_v59 = vsel %vm1159_vm15, %v4689_v37, %v9348_v63  ;;  %v4738_v33 = vunpack.i.l.bf16 %v7318_v18  ;;  %v9354_v37 = vunpack.i.h.bf16 %v7364_v19 }
 0x99b   :  { %v1773_v40 = vsel %vm259_vm1, %v4728_v44, %v4683_v58  ;;  %v1771_v61 = vsel %vm259_vm1, %v4684_v16, %v9349_v15  ;;  %v1806_v58 = vsel %vm1178_vm14, %v4714_v39, %v4739_v54  ;;  %v4758_v16 = vunpack.i.l.bf16 %v7399_v45 }
 0x99c   :  { %v1859_v2 = vpack.c.bf16 %v1791_v22, %v1773_v40  ;;  %v1861_v55 = vpack.c.bf16 %v1789_v59, %v1771_v61  ;;  %v9430_v15 = vunpack.i.h.bf16 %v7314_v46  ;;  %v9431_v63 = vunpack.i.h.bf16 %v7310_v11 }
 0x99e   :  { %1908 = vmatpush.bf16.msrb.mxu2 %v1859_v2  ;;  %1934 = vmatpush.bf16.msra.mxu0 %v1861_v55  ;;  %v1755_v2 = vsel %vm221_vm3, %v4753_v51, %v4698_v29  ;;  %v1810_v55 = vsel %vm1178_vm14, %v4738_v33, %v4713_v32  ;;  %v1753_v29 = vsel %vm221_vm3, %v9431_v63, %v9354_v37  ;;  %v9433_v63 = vunpack.i.h.bf16 %v7399_v45 }
 0x99f   :  { %v7402_v36 = vpop.permute.xlu1 %4746  ;;  %v1841_v32 = vsel %vm1216_vm12, %v4724_v30, %v4723_v48  ;;  %v9434_v37 = vunpack.i.h.bf16 %v7265_v41 }
 0x9a0   :  { %v9353_v22 = vunpack.i.h.bf16 %v7402_v36  ;;  %v4748_v18 = vunpack.i.l.bf16 %v7402_v36  ;;  %v4742_v59 = vpop.permute.xlu0 %4741  ;;  %v1875_v48 = vpack.c.bf16 %v1841_v32, %v1841_v32 }
 0x9a1   :  { %v4744_v40 = vunpack.i.h.bf16 %v4742_v59  ;;  %v4743_v61 = vunpack.i.l.bf16 %v4742_v59  ;;  %v1717_v30 = vsel %vm145_vm8, %v9434_v37, %v9433_v63 }
 0x9a2   :  { %v1737_v39 = vsel %vm1104_vm9, %v4748_v18, %v4693_v20  ;;  %v1735_v59 = vsel %vm1104_vm9, %v9430_v15, %v9353_v22  ;;  %v9432_v22 = vunpack.i.l.bf16 %v7265_v41 }
 0x9a3   :  { %v1853_v6 = vpack.c.bf16 %v1755_v2, %v1737_v39  ;;  %v1855_v43 = vpack.c.bf16 %v1753_v29, %v1735_v59  ;;  %v1824_v20 = vsel %vm1197_vm13, %v4719_v26, %v4744_v40  ;;  %v1828_v46 = vsel %vm1197_vm13, %v4743_v61, %v4718_v14 }
 0x9a4   :  { %v1868_v56 = vpack.c.bf16 %v1824_v20, %v1806_v58  ;;  %v1870_v15 = vpack.c.bf16 %v1828_v46, %v1810_v55  ;;  %v1719_v11 = vsel %vm145_vm8, %v4758_v16, %v9432_v22  ;;  %v1849_v58 = vpack.c.bf16 %v1717_v30, %v7197_v38 }
 0x9a5   :  { %1909 = vmatpush.bf16.msrb.mxu2 %v1853_v6  ;;  %1935 = vmatpush.bf16.msra.mxu0 %v1855_v43  ;;  %v1847_v14 = vpack.c.bf16 %v1719_v11, %v7213_v57  ;;  %v1898_v6 = vsel %vm305_vm2, %v1875_v48, 0  ;;  %v1823_v43 = vsel %vm1197_vm13, %v4744_v40, %v4743_v61  ;;  %v1805_v57 = vsel %vm1178_vm14, %v4739_v54, %v4738_v33 }
 0x9a6   :  { %1946 = vmatpush.bf16.msra.mxu1 %v1868_v56  ;;  %1972 = vmatpush.bf16.msra.mxu3 %v1870_v15  ;;  %v1869_v38 = vpack.c.bf16 %v1823_v43, %v1805_v57  ;;  %v9435_v29 = vunpack.i.h.bf16 %v7374_v53  ;;  %v9436_v20 = vunpack.i.h.bf16 %v7378_v34  ;;  %v9437_v30 = vunpack.i.h.bf16 %v7402_v36 }
 0x9a7   :  { %v1786_v26 = vpop.permute.xlu1 %1785 }
 0x9a8   :  { %v1792_v22 = vsel %vm1159_vm15, %v1786_v26, %v4733_v13  ;;  %v1768_v2 = vpop.permute.xlu0 %1767 }
 0x9a9   :  { %v1774_v41 = vsel %vm259_vm1, %v1768_v2, %v4728_v44  ;;  %1910 = vmatpush.bf16.msrb.mxu2 %v1847_v14  ;;  %1936 = vmatpush.bf16.msra.mxu0 %v1849_v58  ;;  %v1714_v44 = vpop.permute.xlu2 %1713 }
 0x9aa   :  { %v1864_v56 = vpack.c.bf16 %v1792_v22, %v1774_v41  ;;  %v1720_v54 = vsel %vm145_vm8, %v1714_v44, %v4758_v16  ;;  %v9439_v41 = vunpack.i.h.bf16 %v7399_v45 }
 0x9ab   :  { %v1852_v33 = vpack.c.bf16 %v1720_v54, %v7222_v62 }
 0x9ac   :  { %1973 = vmatpush.bf16.msra.mxu3 %v1864_v56  ;;  %3883 = vmatmul.msk.bf16.vlgmr.msrb.gmra.mxu2 %vm301_vm10, %v7350_v23 }
 0x9ad   :  { %1958 = vmatpush.bf16.msra.mxu2 %v1898_v6  ;;  %3885 = vmatmul.msk.bf16.vlgmr.msra.gmra.mxu0 %vm301_vm10, %v7350_v23 }
 0x9af   :  { %v1750_v13 = vpop.permute.xlu1 %1749 }
 0x9b0   :  { %v1756_v37 = vsel %vm221_vm3, %v1750_v13, %v4753_v51  ;;  %v1732_v40 = vpop.permute.xlu0 %1731 }
 0x9b1   :  { %1959 = vmatpush.bf16.msra.mxu2 %v1869_v38  ;;  %v1738_v61 = vsel %vm1104_vm9, %v1732_v40, %v4748_v18  ;;  %v1730_v53 = vpop.permute.xlu2 %1729 }
 0x9b2   :  { %v1858_v55 = vpack.c.bf16 %v1756_v37, %v1738_v61  ;;  %v1733_v63 = vsel %vm1104_vm9, %v1730_v53, %v1732_v40  ;;  %v1734_v34 = vsel %vm1104_vm9, %v9437_v30, %v1730_v53 }
 0x9b4   :  { %1974 = vmatpush.bf16.msra.mxu3 %v1858_v55 }
 0x9b7   :  { %v1784_v39 = vpop.permute.xlu1 %1783 }
 0x9b8   :  { %v1787_v59 = vsel %vm1159_vm15, %v1784_v39, %v1786_v26  ;;  %v1788_v51 = vsel %vm1159_vm15, %v9435_v29, %v1784_v39  ;;  %v1766_v32 = vpop.permute.xlu0 %1765  ;;  %1975 = vmatpush.bf16.msra.mxu3 %v1852_v33  ;;  %v9438_v26 = vunpack.i.h.bf16 %v7364_v19 }
 0x9b9   :  { %v1769_v18 = vsel %vm259_vm1, %v1766_v32, %v1768_v2  ;;  %v1770_v16 = vsel %vm259_vm1, %v9436_v20, %v1766_v32  ;;  %v1880_v57 = vpop.permute.xlu2 %1879 }
 0x9ba   :  { %v1862_v62 = vpack.c.bf16 %v1788_v51, %v1770_v16  ;;  %v1863_v46 = vpack.c.bf16 %v1787_v59, %v1769_v18 }
 0x9bb   :  { %3888 = vmatmul.msk.bf16.vlgmr.msra.gmra.mxu3 %vm301_vm10, %v7350_v23 }
 0x9bc   :  { %1947 = vmatpush.bf16.msra.mxu1 %v1862_v62  ;;  %1960 = vmatpush.bf16.msra.mxu2 %v1863_v46 }
 0x9bf   :  { %v1712_v15 = vpop.permute.xlu1 %1711 }
 0x9c0   :  { %v1748_v11 = vpop.permute.xlu0 %1747  ;;  %v1715_v2 = vsel %vm145_vm8, %v1712_v15, %v1714_v44  ;;  %v1716_v36 = vsel %vm145_vm8, %v9439_v41, %v1712_v15 }
 0x9c1   :  { %v1751_v48 = vsel %vm221_vm3, %v1748_v11, %v1750_v13  ;;  %v1752_v14 = vsel %vm221_vm3, %v9438_v26, %v1748_v11  ;;  %v1850_v6 = vpack.c.bf16 %v1716_v36, %v7209_v35  ;;  %v1851_v43 = vpack.c.bf16 %v1715_v2, %v7226_v1 }
 0x9c2   :  { %v1856_v58 = vpack.c.bf16 %v1752_v14, %v1734_v34  ;;  %v1857_v22 = vpack.c.bf16 %v1751_v48, %v1733_v63 }
 0x9c4   :  { %1948 = vmatpush.bf16.msra.mxu1 %v1856_v58  ;;  %1961 = vmatpush.bf16.msra.mxu2 %v1857_v22 }
 0x9c8   :  { %1949 = vmatpush.bf16.msra.mxu1 %v1850_v6  ;;  %1962 = vmatpush.bf16.msra.mxu2 %v1851_v43 }
 0x9cb   :  { %3886 = vmatmul.msk.bf16.vlgmr.msra.gmra.mxu1 %vm301_vm10, %v7350_v23  ;;  %3887 = vmatmul.msk.bf16.vlgmr.msra.gmra.mxu2 %vm301_vm10, %v7350_v23 }
 0xa18   :  { %v1925_v19 = vpop.f32.mrf.mxu3 }
 0xa19   :  { %v1926_v38 = vadd.f32 %v1925_v19, %v1880_v57 }
 0xa1b   :  { %v1982_v44 = vmax.f32 %v1926_v38, 0.0 }
 0xa1d   :  { %v1992_v1 = vmul.f32 %v1982_v44, %v5455_v8 }
 0xa20   :  { %v1927_v56 = vpop.f32.mrf.mxu3 }
 0xa2a   :  { %v1938_v45 = vpop.f32.mrf.mxu0 }
 0xa2b   :  { %v1939_v33 = vadd.f32 %v1938_v45, %v1880_v57 }
 0xa2d   :  { %v1983_v39 = vmax.f32 %v1939_v33, 0.0 }
 0xa2f   :  { %v1912_v13 = vpop.f32.mrf.mxu2  ;;  %v1993_v51 = vmul.f32 %v1983_v39, %v5457_v9 }
 0xa30   :  { %v1913_v37 = vadd.f32 %v1912_v13, %v1880_v57 }
 0xa32   :  { %v1981_v40 = vmax.f32 %v1913_v37, 0.0  ;;  %v1940_v35 = vpop.f32.mrf.mxu0 }
 0xa34   :  { %v1991_v61 = vmul.f32 %v1981_v40, %v5453_v7 }
 0xa36   :  { %v4760_v55 = vpack.i.bf16 %v1992_v1, %v1991_v61  ;;  %v3890_v61 = vld [vmem:[%s9312_s2 + $0x30] sm:$0xff] }
 0xa37   :  { %v1914_v54 = vpop.f32.mrf.mxu2 }
 0xa38   :  { %4761 = vrot.lane.b32.xlu0 %v4760_v55, %s5372_s8 }
 0xa3e   :  { %v1977_v23 = vpop.f32.mrf.mxu3 }
 0xa3f   :  { %v1978_v59 = vadd.f32 %v1977_v23, %v1880_v57 }
 0xa41   :  { %v1986_v29 = vmax.f32 %v1978_v59, 0.0 }
 0xa43   :  { %v1996_v32 = vmul.f32 %v1986_v29, %v5445_v4 }
 0xa45   :  { %v4765_v18 = vpack.i.bf16 %v1996_v32, %v1993_v51 }
 0xa46   :  { %v1979_v20 = vpop.f32.mrf.mxu3 }
 0xa47   :  { %4766 = vrot.lane.b32.xlu1 %v4765_v18, %s5372_s8 }
 0xa48   :  { %v1951_v16 = vpop.f32.mrf.mxu1 }
 0xa49   :  { %v1952_v62 = vadd.f32 %v1951_v16, %v1880_v57 }
 0xa4b   :  { %v1984_v53 = vmax.f32 %v1952_v62, 0.0 }
 0xa4d   :  { %v1994_v30 = vmul.f32 %v1984_v53, %v5459_v10 }
 0xa4e   :  { %v1964_v46 = vpop.f32.mrf.mxu2 }
 0xa4f   :  { %v1965_v15 = vadd.f32 %v1964_v46, %v1880_v57 }
 0xa50   :  { %v1953_v11 = vpop.f32.mrf.mxu1 }
 0xa51   :  { %v1985_v63 = vmax.f32 %v1965_v15, 0.0 }
 0xa53   :  { %v1995_v34 = vmul.f32 %v1985_v63, %v5443_v3 }
 0xa55   :  { %v4770_v48 = vpack.i.bf16 %v1995_v34, %v1994_v30 }
 0xa56   :  { %v1966_v26 = vpop.f32.mrf.mxu2 }
 0xa57   :  { %4771 = vrot.lane.b32.xlu2 %v4770_v48, %s5372_s8 }
 0xaaa   :  { %v4762_v14 = vpop.permute.xlu0 %4761 }
 0xaab   :  { %v4764_v58 = vunpack.i.h.bf16 %v4762_v14  ;;  %v4763_v22 = vunpack.i.l.bf16 %v4762_v14 }
 0xaad   :  { %v7519_v36 = vsel %vm1067_vm11, %v4763_v22, %v4764_v58 }
 0xab1   :  { %v4772_v19 = vpop.permute.xlu2 %4771 }
 0xab2   :  { %v4773_v45 = vunpack.i.l.bf16 %v4772_v19  ;;  %v4774_v44 = vunpack.i.h.bf16 %v4772_v19 }
 0xab4   :  { %v7558_v40 = vsel %vm1067_vm11, %v4773_v45, %v4774_v44 }
 0xab9   :  { %v4767_v2 = vpop.permute.xlu1 %4766 }
 0xaba   :  { %v4768_v41 = vunpack.i.l.bf16 %v4767_v2  ;;  %v4769_v56 = vunpack.i.h.bf16 %v4767_v2 }
 0xabc   :  { %v7523_v6 = vsel %vm1067_vm11, %v4764_v58, %v4768_v41  ;;  %v7535_v57 = vsel %vm1067_vm11, %v4768_v41, %v4773_v45  ;;  %v7539_v38 = vsel %vm1067_vm11, %v4769_v56, %v4763_v22  ;;  %v7554_v37 = vsel %vm1067_vm11, %v4774_v44, %v4769_v56 }
 0xabd   :  { %v4785_v43 = vpack.i.bf16 %v7523_v6, %v7519_v36  ;;  %v4815_v13 = vpack.i.bf16 %v7535_v57, %v7539_v38  ;;  %v4860_v35 = vpack.i.bf16 %v7554_v37, %v7558_v40  ;;  %v4885_v1 = vpack.i.bf16 %v7558_v40, %v7535_v57 }
 0xabf   :  { %4786 = vrot.lane.b32.xlu2 %v4785_v43, %s5373_s28  ;;  %4781 = vrot.lane.b32.xlu1 %v4785_v43, %s5374_s29 }
 0xac0   :  { %4776 = vrot.lane.b32.xlu0 %v4785_v43, %s5375_s30 }
 0xac7   :  { %4796 = vrot.lane.b32.xlu2 %v4785_v43, %s5376_s19  ;;  %4791 = vrot.lane.b32.xlu1 %v4785_v43, %s5364_s12 }
 0xac8   :  { %4806 = vrot.lane.b32.xlu0 %v4785_v43, %s5363_s11 }
 0xacf   :  { %4801 = vrot.lane.b32.xlu2 %v4785_v43, %s5377_s20  ;;  %4811 = vrot.lane.b32.xlu1 %v4785_v43, %s5369_s17 }
 0xad0   :  { %4816 = vrot.lane.b32.xlu0 %v4815_v13, %s5375_s30 }
 0xad7   :  { %4836 = vrot.lane.b32.xlu2 %v4815_v13, %s5376_s19  ;;  %4826 = vrot.lane.b32.xlu1 %v4815_v13, %s5373_s28 }
 0xad8   :  { %4821 = vrot.lane.b32.xlu0 %v4815_v13, %s5374_s29 }
 0xadf   :  { %4841 = vrot.lane.b32.xlu2 %v4815_v13, %s5377_s20  ;;  %4831 = vrot.lane.b32.xlu1 %v4815_v13, %s5364_s12 }
 0xae0   :  { %4846 = vrot.lane.b32.xlu0 %v4815_v13, %s5363_s11 }
 0xae7   :  { %4861 = vrot.lane.b32.xlu2 %v4860_v35, %s5373_s28  ;;  %4856 = vrot.lane.b32.xlu1 %v4860_v35, %s5374_s29 }
 0xae8   :  { %4851 = vrot.lane.b32.xlu0 %v4860_v35, %s5375_s30 }
 0xaef   :  { %4871 = vrot.lane.b32.xlu2 %v4860_v35, %s5376_s19  ;;  %4866 = vrot.lane.b32.xlu1 %v4860_v35, %s5364_s12 }
 0xaf0   :  { %2015 = vrot.lane.b32.xlu0 %v7539_v38, %s5369_s17 }
 0xaf7   :  { %4886 = vrot.lane.b32.xlu2 %v4885_v1, %s5369_s17  ;;  %4881 = vrot.lane.b32.xlu1 %v4860_v35, %s5363_s11 }
 0xaf8   :  { %4876 = vrot.lane.b32.xlu0 %v4860_v35, %s5377_s20 }
 0xaff   :  { %2191 = vperm.xlu1 %4514, %v3890_v61  }
 0xb00   :  { %2025 = vrot.lane.b32.xlu0 %v7554_v37, %s5369_s17 }
 0xb19   :  { %v7579_v55 = vpop.permute.xlu2 %4786 }
 0xb1a   :  { %v4789_v16 = vunpack.i.h.bf16 %v7579_v55  ;;  %v4788_v62 = vunpack.i.l.bf16 %v7579_v55 }
 0xb1c   :  { %v2138_v58 = vsel %vm1197_vm13, %v4788_v62, %v4789_v16 }
 0xb21   :  { %v7581_v54 = vpop.permute.xlu2 %4796 }
 0xb22   :  { %v4799_v53 = vunpack.i.h.bf16 %v7581_v54  ;;  %v4798_v15 = vunpack.i.l.bf16 %v7581_v54 }
 0xb24   :  { %v2102_v19 = vsel %vm1159_vm15, %v4798_v15, %v4799_v53 }
 0xb29   :  { %v7583_v33 = vpop.permute.xlu2 %4801 }
 0xb2a   :  { %v4804_v45 = vunpack.i.h.bf16 %v7583_v33  ;;  %v4803_v13 = vunpack.i.l.bf16 %v7583_v33 }
 0xb31   :  { %v7585_v23 = vpop.permute.xlu2 %4836  ;;  %v7587_v39 = vpop.permute.xlu1 %4781 }
 0xb32   :  { %v4777_v59 = vpop.permute.xlu0 %4776  ;;  %v4784_v32 = vunpack.i.h.bf16 %v7587_v39  ;;  %v4783_v18 = vunpack.i.l.bf16 %v7587_v39 }
 0xb33   :  { %v4779_v29 = vunpack.i.h.bf16 %v4777_v59  ;;  %v4778_v51 = vunpack.i.l.bf16 %v4777_v59  ;;  %v2048_v59 = vsel %vm1104_vm9, %v4803_v13, %v4804_v45 }
 0xb34   :  { %v2120_v63 = vsel %vm1178_vm14, %v4783_v18, %v4784_v32 }
 0xb35   :  { %v2156_v20 = vsel %vm1216_vm12, %v4778_v51, %v4779_v29  ;;  %v2178_v22 = vpack.c.bf16 %v2138_v58, %v2120_v63 }
 0xb36   :  { %v2184_v46 = vpack.c.bf16 %v2156_v20, %v2156_v20 }
 0xb38   :  { %v2201_v11 = vsel %vm305_vm2, %v2184_v46, 0 }
 0xb39   :  { %2231 = vmatpush.bf16.msrb.mxu1 %v2201_v11  ;;  %v7600_v30 = vpop.permute.xlu2 %4841  ;;  %v7602_v34 = vpop.permute.xlu1 %4791 }
 0xb3a   :  { %v4794_v48 = vunpack.i.h.bf16 %v7602_v34  ;;  %v4793_v26 = vunpack.i.l.bf16 %v7602_v34  ;;  %v7606_v14 = vpop.permute.xlu0 %4806 }
 0xb3b   :  { %v4809_v2 = vunpack.i.h.bf16 %v7606_v14  ;;  %v4808_v41 = vunpack.i.l.bf16 %v7606_v14 }
 0xb3c   :  { %v2084_v43 = vsel %vm259_vm1, %v4793_v26, %v4794_v48 }
 0xb3d   :  { %2232 = vmatpush.bf16.msrb.mxu1 %v2178_v22  ;;  %v2172_v56 = vpack.c.bf16 %v2102_v19, %v2084_v43  ;;  %v2066_v44 = vsel %vm221_vm3, %v4808_v41, %v4809_v2 }
 0xb3e   :  { %v2166_v11 = vpack.c.bf16 %v2066_v44, %v2048_v59 }
 0xb41   :  { %2233 = vmatpush.bf16.msrb.mxu1 %v2172_v56  ;;  %v7632_v35 = vpop.permute.xlu2 %4861  ;;  %v7634_v1 = vpop.permute.xlu1 %4811 }
 0xb42   :  { %v4814_v61 = vunpack.i.h.bf16 %v7634_v1  ;;  %v9355_v55 = vunpack.i.l.bf16 %v7634_v1  ;;  %v7638_v39 = vpop.permute.xlu0 %4816 }
 0xb43   :  { %v9357_v20 = vunpack.i.h.bf16 %v7638_v39  ;;  %v9356_v46 = vunpack.i.l.bf16 %v7638_v39 }
 0xb44   :  { %v2030_v63 = vsel %vm145_vm8, %v9355_v55, %v4814_v61 }
 0xb45   :  { %2234 = vmatpush.bf16.msrb.mxu1 %v2166_v11  ;;  %v2157_v58 = vsel %vm1216_vm12, %v9356_v46, %v4778_v51  ;;  %v2160_v22 = vpack.c.bf16 %v2030_v63, %v7519_v36  ;;  %v2155_v43 = vsel %vm1216_vm12, %v4779_v29, %v9357_v20  ;;  %v7672_v36 = vld [vmem:[%s9311_s1 + $0x18] sm:$0xf]  ;;  %v9361_v46 = vunpack.i.h.bf16 %v7585_v23 }
 0xb46   :  { %v2183_v19 = vpack.c.bf16 %v2157_v58, %v2157_v58  ;;  %v2185_v56 = vpack.c.bf16 %v2155_v43, %v2155_v43  ;;  %v9360_v20 = vunpack.i.l.bf16 %v7585_v23 }
 0xb48   :  { %v2198_v44 = vsel %vm305_vm2, %v2183_v19, 0  ;;  %v2204_v59 = vsel %vm305_vm2, %v2185_v56, 0 }
 0xb49   :  { %2218 = vmatpush.bf16.msrb.mxu0 %v2198_v44  ;;  %2235 = vmatpush.bf16.msrb.mxu1 %v2160_v22  ;;  %v7665_v11 = vpop.permute.xlu2 %4871  ;;  %v7667_v55 = vpop.permute.xlu1 %4826 }
 0xb4a   :  { %2244 = vmatpush.bf16.msrb.mxu2 %v2204_v59  ;;  %v9359_v29 = vunpack.i.h.bf16 %v7667_v55  ;;  %v9358_v51 = vunpack.i.l.bf16 %v7667_v55  ;;  %v4822_v63 = vpop.permute.xlu0 %4821 }
 0xb4b   :  { %v4824_v58 = vunpack.i.h.bf16 %v4822_v63  ;;  %v4823_v43 = vunpack.i.l.bf16 %v4822_v63 }
 0xb4c   :  { %3892 = vmatmul.msk.bf16.vlgmr.msrb.gmra.mxu1 %vm301_vm10, %v7672_v36  ;;  %v2139_v22 = vsel %vm1197_vm13, %v9358_v51, %v4788_v62  ;;  %v2137_v19 = vsel %vm1197_vm13, %v4789_v16, %v9359_v29 }
 0xb4d   :  { %v2121_v56 = vsel %vm1178_vm14, %v4823_v43, %v4783_v18  ;;  %v2119_v44 = vsel %vm1178_vm14, %v4784_v32, %v4824_v58 }
 0xb4e   :  { %v2177_v59 = vpack.c.bf16 %v2139_v22, %v2121_v56  ;;  %v2179_v63 = vpack.c.bf16 %v2137_v19, %v2119_v44  ;;  %v2103_v19 = vsel %vm1159_vm15, %v9360_v20, %v4798_v15  ;;  %v2101_v56 = vsel %vm1159_vm15, %v4799_v53, %v9361_v46 }
 0xb4f   :  { %v4844_v44 = vunpack.i.h.bf16 %v7600_v30 }
 0xb50   :  { %2219 = vmatpush.bf16.msrb.mxu0 %v2177_v59  ;;  %2245 = vmatpush.bf16.msrb.mxu2 %v2179_v63  ;;  %v4843_v59 = vunpack.i.l.bf16 %v7600_v30 }
 0xb51   :  { %v7692_v62 = vpop.permute.xlu1 %4831  ;;  %v7698_v18 = vpop.permute.xlu2 %4886 }
 0xb52   :  { %v4834_v51 = vunpack.i.h.bf16 %v7692_v62  ;;  %v4833_v16 = vunpack.i.l.bf16 %v7692_v62  ;;  %v7696_v29 = vpop.permute.xlu0 %4846  ;;  %v4888_v53 = vunpack.i.l.bf16 %v7698_v18 }
 0xb53   :  { %v4849_v32 = vunpack.i.h.bf16 %v7696_v29  ;;  %v4848_v22 = vunpack.i.l.bf16 %v7696_v29 }
 0xb54   :  { %v2085_v63 = vsel %vm259_vm1, %v4833_v16, %v4793_v26  ;;  %v2083_v15 = vsel %vm259_vm1, %v4794_v48, %v4834_v51  ;;  %v2049_v48 = vsel %vm1104_vm9, %v4843_v59, %v4803_v13  ;;  %v2047_v26 = vsel %vm1104_vm9, %v4804_v45, %v4844_v44 }
 0xb55   :  { %v2171_v54 = vpack.c.bf16 %v2103_v19, %v2085_v63  ;;  %v2173_v20 = vpack.c.bf16 %v2101_v56, %v2083_v15  ;;  %v2067_v46 = vsel %vm221_vm3, %v4848_v22, %v4808_v41  ;;  %v2065_v34 = vsel %vm221_vm3, %v4809_v2, %v4849_v32 }
 0xb56   :  { %v2165_v41 = vpack.c.bf16 %v2067_v46, %v2049_v48  ;;  %v2167_v19 = vpack.c.bf16 %v2065_v34, %v2047_v26  ;;  %v9440_v45 = vunpack.i.h.bf16 %v7638_v39  ;;  %v4864_v26 = vunpack.i.h.bf16 %v7632_v35 }
 0xb57   :  { %2220 = vmatpush.bf16.msrb.mxu0 %v2171_v54  ;;  %2246 = vmatpush.bf16.msrb.mxu2 %v2173_v20  ;;  %v2029_v20 = vsel %vm145_vm8, %v4814_v61, %v4888_v53  ;;  %v9441_v54 = vunpack.i.l.bf16 %v7638_v39 }
 0xb58   :  { %v2161_v15 = vpack.c.bf16 %v2029_v20, %v7523_v6 }
 0xb59   :  { %v4857_v14 = vpop.permute.xlu1 %4856 }
 0xb5a   :  { %v4852_v2 = vpop.permute.xlu0 %4851  ;;  %v4859_v63 = vunpack.i.h.bf16 %v4857_v14  ;;  %v4858_v33 = vunpack.i.l.bf16 %v4857_v14  ;;  %v4873_v14 = vunpack.i.l.bf16 %v7665_v11 }
 0xb5b   :  { %v4854_v56 = vunpack.i.h.bf16 %v4852_v2  ;;  %v4853_v13 = vunpack.i.l.bf16 %v4852_v2  ;;  %2221 = vmatpush.bf16.msrb.mxu0 %v2165_v41  ;;  %2247 = vmatpush.bf16.msrb.mxu2 %v2167_v19  ;;  %v4863_v41 = vunpack.i.l.bf16 %v7632_v35 }
 0xb5c   :  { %v2118_v39 = vsel %vm1178_vm14, %v4824_v58, %v4858_v33  ;;  %v2122_v20 = vsel %vm1178_vm14, %v4859_v63, %v4823_v43  ;;  %v9443_v58 = vunpack.i.l.bf16 %v7667_v55 }
 0xb5d   :  { %v2154_v46 = vsel %vm1216_vm12, %v9440_v45, %v4853_v13  ;;  %v2158_v34 = vsel %vm1216_vm12, %v4854_v56, %v9441_v54  ;;  %v2153_v6 = vsel %vm1216_vm12, %v4853_v13, %v4854_v56  ;;  %v4874_v45 = vunpack.i.h.bf16 %v7665_v11 }
 0xb5e   :  { %v2186_v48 = vpack.c.bf16 %v2154_v46, %v2154_v46  ;;  %v2188_v61 = vpack.c.bf16 %v2158_v34, %v2158_v34  ;;  %v2140_v43 = vsel %vm1197_vm13, %v4864_v26, %v9443_v58  ;;  %v2187_v11 = vpack.c.bf16 %v2153_v6, %v2153_v6 }
 0xb5f   :  { %2248 = vmatpush.bf16.msrb.mxu2 %v2161_v15  ;;  %v9442_v15 = vunpack.i.h.bf16 %v7667_v55  ;;  %v9444_v34 = vunpack.i.l.bf16 %v7634_v1  ;;  %v2135_v62 = vsel %vm1197_vm13, %v4863_v41, %v4864_v26  ;;  %v2099_v26 = vsel %vm1159_vm15, %v4873_v14, %v4874_v45 }
 0xb60   :  { %v2207_v19 = vsel %vm305_vm2, %v2186_v48, 0  ;;  %v2213_v2 = vsel %vm305_vm2, %v2188_v61, 0 }
 0xb61   :  { %2257 = vmatpush.bf16.msrb.mxu3 %v2207_v19  ;;  %2283 = vmatpush.bf16.msra.mxu1 %v2213_v2  ;;  %v4867_v35 = vpop.permute.xlu1 %4866  ;;  %v2136_v56 = vsel %vm1197_vm13, %v9442_v15, %v4863_v41  ;;  %v2182_v19 = vpack.c.bf16 %v2140_v43, %v2122_v20  ;;  %v9445_v15 = vunpack.i.h.bf16 %v7585_v23 }
 0xb62   :  { %v4869_v13 = vunpack.i.h.bf16 %v4867_v35  ;;  %v4868_v46 = vunpack.i.l.bf16 %v4867_v35  ;;  %v2016_v54 = vpop.permute.xlu0 %2015  ;;  %3893 = vmatmul.msk.bf16.vlgmr.msrb.gmra.mxu2 %vm301_vm10, %v7672_v36  ;;  %v2180_v61 = vpack.c.bf16 %v2136_v56, %v2118_v39  ;;  %v9446_v39 = vunpack.i.l.bf16 %v7585_v23 }
 0xb63   :  { %v2031_v48 = vsel %vm145_vm8, %v2016_v54, %v9444_v34  ;;  %v2100_v55 = vsel %vm1159_vm15, %v9445_v15, %v4873_v14  ;;  %v2117_v56 = vsel %vm1178_vm14, %v4858_v33, %v4859_v63 }
 0xb64   :  { %v2159_v2 = vpack.c.bf16 %v2031_v48, %v7539_v38  ;;  %v2082_v35 = vsel %vm259_vm1, %v4834_v51, %v4868_v46  ;;  %v2086_v1 = vsel %vm259_vm1, %v4869_v13, %v4833_v16  ;;  %v2104_v38 = vsel %vm1159_vm15, %v4874_v45, %v9446_v39 }
 0xb65   :  { %2258 = vmatpush.bf16.msrb.mxu3 %v2180_v61  ;;  %2284 = vmatpush.bf16.msra.mxu1 %v2182_v19  ;;  %v2174_v6 = vpack.c.bf16 %v2100_v55, %v2082_v35  ;;  %v2210_v51 = vsel %vm305_vm2, %v2187_v11, 0  ;;  %v2176_v20 = vpack.c.bf16 %v2104_v38, %v2086_v1  ;;  %v2181_v23 = vpack.c.bf16 %v2135_v62, %v2117_v56 }
 0xb66   :  { %2222 = vmatpush.bf16.msrb.mxu0 %v2159_v2  ;;  %v2081_v11 = vsel %vm259_vm1, %v4868_v46, %v4869_v13  ;;  %v4889_v48 = vunpack.i.h.bf16 %v7698_v18 }
 0xb67   :  { %v2175_v19 = vpack.c.bf16 %v2099_v26, %v2081_v11 }
 0xb69   :  { %3891 = vmatmul.msk.bf16.vlgmr.msrb.gmra.mxu0 %vm301_vm10, %v7672_v36  ;;  %2259 = vmatpush.bf16.msrb.mxu3 %v2174_v6  ;;  %v4882_v16 = vpop.permute.xlu1 %4881 }
 0xb6a   :  { %2270 = vmatpush.bf16.msra.mxu0 %v2210_v51  ;;  %2285 = vmatpush.bf16.msra.mxu1 %v2176_v20  ;;  %v4884_v58 = vunpack.i.h.bf16 %v4882_v16  ;;  %v4883_v43 = vunpack.i.l.bf16 %v4882_v16  ;;  %v4877_v34 = vpop.permute.xlu0 %4876 }
 0xb6b   :  { %v4879_v63 = vunpack.i.h.bf16 %v4877_v34  ;;  %v4878_v33 = vunpack.i.l.bf16 %v4877_v34 }
 0xb6c   :  { %v2064_v41 = vsel %vm221_vm3, %v4849_v32, %v4883_v43  ;;  %v2068_v61 = vsel %vm221_vm3, %v4884_v58, %v4848_v22  ;;  %v2063_v29 = vsel %vm221_vm3, %v4883_v43, %v4884_v58  ;;  %v2028_v22 = vsel %vm145_vm8, %v4888_v53, %v4889_v48 }
 0xb6d   :  { %v2046_v13 = vsel %vm1104_vm9, %v4844_v44, %v4878_v33  ;;  %v2050_v14 = vsel %vm1104_vm9, %v4879_v63, %v4843_v59  ;;  %v2045_v32 = vsel %vm1104_vm9, %v4878_v33, %v4879_v63  ;;  %v2162_v59 = vpack.c.bf16 %v2028_v22, %v7535_v57 }
 0xb6e   :  { %2271 = vmatpush.bf16.msra.mxu0 %v2181_v23  ;;  %v2168_v45 = vpack.c.bf16 %v2064_v41, %v2046_v13  ;;  %v2170_v46 = vpack.c.bf16 %v2068_v61, %v2050_v14  ;;  %v2169_v30 = vpack.c.bf16 %v2063_v29, %v2045_v32 }
 0xb70   :  { %2260 = vmatpush.bf16.msrb.mxu3 %v2168_v45  ;;  %2286 = vmatpush.bf16.msra.mxu1 %v2170_v46 }
 0xb72   :  { %2272 = vmatpush.bf16.msra.mxu0 %v2175_v19  ;;  %v2026_v44 = vpop.permute.xlu0 %2025 }
 0xb73   :  { %v2027_v2 = vsel %vm145_vm8, %v4889_v48, %v2026_v44  ;;  %v2032_v35 = vsel %vm145_vm8, %v2026_v44, %v2016_v54  ;;  %v2192_v54 = vpop.permute.xlu1 %2191 }
 0xb74   :  { %v2163_v15 = vpack.c.bf16 %v2027_v2, %v7558_v40  ;;  %v2164_v18 = vpack.c.bf16 %v2032_v35, %v7554_v37  ;;  %2261 = vmatpush.bf16.msrb.mxu3 %v2162_v59 }
 0xb76   :  { %2273 = vmatpush.bf16.msra.mxu0 %v2169_v30  ;;  %2287 = vmatpush.bf16.msra.mxu1 %v2164_v18 }
 0xb77   :  { %3894 = vmatmul.msk.bf16.vlgmr.msrb.gmra.mxu3 %vm301_vm10, %v7672_v36 }
 0xb79   :  { %3896 = vmatmul.msk.bf16.vlgmr.msra.gmra.mxu1 %vm301_vm10, %v7672_v36 }
 0xb7a   :  { %2274 = vmatpush.bf16.msra.mxu0 %v2163_v15 }
 0xb7d   :  { %3895 = vmatmul.msk.bf16.vlgmr.msra.gmra.mxu0 %vm301_vm10, %v7672_v36 }
 0xbc9   :  { %v2237_v57 = vpop.f32.mrf.mxu1 }
 0xbca   :  { %v2238_v55 = vadd.f32 %v2237_v57, %v2192_v54 }
 0xbcc   :  { %v2294_v37 = vadd.f32 %v2238_v55, %v7159_v5 }
 0xbce   :  { %v2301_v38 = vmul.f32 %v2294_v37, %v5455_v8 }
 0xbd1   :  { %v2239_v53 = vpop.f32.mrf.mxu1 }
 0xbe5   :  { %v2250_v1 = vpop.f32.mrf.mxu2 }
 0xbe6   :  { %v2224_v40 = vpop.f32.mrf.mxu0  ;;  %v2251_v36 = vadd.f32 %v2250_v1, %v2192_v54  ;;  %v2950_v1 = vld [vmem:[%s9314_s4] sm:$0xff]  ;;  %s5378_s4 = smov 1  }
 0xbe7   :  { %v2225_v6 = vadd.f32 %v2224_v40, %v2192_v54 }
 0xbe8   :  { %v2295_v23 = vadd.f32 %v2251_v36, %v7170_v50 }
 0xbe9   :  { %v2293_v39 = vadd.f32 %v2225_v6, %v7162_v28 }
 0xbea   :  { %v2302_v28 = vmul.f32 %v2295_v23, %v5457_v9 }
 0xbeb   :  { %v2300_v51 = vmul.f32 %v2293_v39, %v5453_v7 }
 0xbed   :  { %v4890_v20 = vpack.i.bf16 %v2301_v38, %v2300_v51  ;;  %v2252_v56 = vpop.f32.mrf.mxu2 }
 0xbee   :  { %v2226_v62 = vpop.f32.mrf.mxu0 }
 0xbef   :  { %4891 = vrot.lane.b32.xlu2 %v4890_v20, %s5372_s8 }
 0xbf6   :  { %v2289_v16 = vpop.f32.mrf.mxu1 }
 0xbf7   :  { %v2290_v58 = vadd.f32 %v2289_v16, %v2192_v54 }
 0xbf9   :  { %v2298_v5 = vadd.f32 %v2290_v58, %v7173_v17 }
 0xbfa   :  { %v2276_v43 = vpop.f32.mrf.mxu0  ;;  %v2263_v11 = vpop.f32.mrf.mxu3 }
 0xbfb   :  { %v2277_v34 = vadd.f32 %v2276_v43, %v2192_v54  ;;  %v2305_v48 = vmul.f32 %v2298_v5, %v5445_v4  ;;  %v2264_v33 = vadd.f32 %v2263_v11, %v2192_v54 }
 0xbfd   :  { %v2297_v63 = vadd.f32 %v2277_v34, %v7180_v31  ;;  %v4895_v26 = vpack.i.bf16 %v2302_v28, %v2305_v48  ;;  %v2296_v41 = vadd.f32 %v2264_v33, %v7183_v25 }
 0xbfe   :  { %v2291_v61 = vpop.f32.mrf.mxu1 }
 0xbff   :  { %v2304_v19 = vmul.f32 %v2297_v63, %v5443_v3  ;;  %v2303_v50 = vmul.f32 %v2296_v41, %v5459_v10  ;;  %4896 = vrot.lane.b32.xlu0 %v4895_v26, %s5372_s8 }
 0xc01   :  { %v4900_v17 = vpack.i.bf16 %v2304_v19, %v2303_v50 }
 0xc02   :  { %v2278_v13 = vpop.f32.mrf.mxu0  ;;  %v2265_v14 = vpop.f32.mrf.mxu3 }
 0xc03   :  { %4901 = vrot.lane.b32.xlu1 %v4900_v17, %s5372_s8 }
 0xc49   :  { %v4892_v45 = vpop.permute.xlu2 %4891 }
 0xc4a   :  { %v4894_v46 = vunpack.i.h.bf16 %v4892_v45  ;;  %v4893_v32 = vunpack.i.l.bf16 %v4892_v45 }
 0xc4c   :  { %v7873_v25 = vsel %vm1067_vm11, %v4893_v32, %v4894_v46 }
 0xc71   :  { %v4897_v31 = vpop.permute.xlu0 %4896 }
 0xc72   :  { %v4898_v29 = vunpack.i.l.bf16 %v4897_v31  ;;  %v4899_v35 = vunpack.i.h.bf16 %v4897_v31 }
 0xc74   :  { %v7877_v22 = vsel %vm1067_vm11, %v4898_v29, %v4893_v32  ;;  %v7909_v54 = vsel %vm1067_vm11, %v4894_v46, %v4899_v35 }
 0xc75   :  { %v4915_v30 = vpack.i.bf16 %v7873_v25, %v7877_v22  ;;  %v4902_v44 = vpop.permute.xlu1 %4901 }
 0xc76   :  { %v4904_v59 = vunpack.i.h.bf16 %v4902_v44  ;;  %v4903_v2 = vunpack.i.l.bf16 %v4902_v44 }
 0xc77   :  { %4916 = vrot.lane.b32.xlu1 %v4915_v30, %s5373_s28  ;;  %4911 = vrot.lane.b32.xlu0 %v4915_v30, %s5374_s29 }
 0xc78   :  { %4906 = vrot.lane.b32.xlu2 %v4915_v30, %s5375_s30  ;;  %v7889_v15 = vsel %vm1067_vm11, %v4903_v2, %v4904_v59  ;;  %v7893_v18 = vsel %vm1067_vm11, %v4899_v35, %v4903_v2  ;;  %v7905_v53 = vsel %vm1067_vm11, %v4904_v59, %v4898_v29  ;;  %vm2824_vm11 = vcmp.lt.s32.totalorder %v5476_v24, 18 }
 0xc79   :  { %v4945_v57 = vpack.i.bf16 %v7889_v15, %v7893_v18  ;;  %v4960_v55 = vpack.i.bf16 %v7905_v53, %v7909_v54 }
 0xc7f   :  { %4926 = vrot.lane.b32.xlu1 %v4915_v30, %s5376_s19  ;;  %4921 = vrot.lane.b32.xlu0 %v4915_v30, %s5364_s12 }
 0xc80   :  { %4936 = vrot.lane.b32.xlu2 %v4915_v30, %s5363_s11 }
 0xc87   :  { %4931 = vrot.lane.b32.xlu1 %v4915_v30, %s5377_s20  ;;  %4941 = vrot.lane.b32.xlu0 %v4915_v30, %s5369_s17 }
 0xc88   :  { %4946 = vrot.lane.b32.xlu2 %v4945_v57, %s5375_s30 }
 0xc8f   :  { %4966 = vrot.lane.b32.xlu1 %v4945_v57, %s5364_s12  ;;  %4956 = vrot.lane.b32.xlu0 %v4945_v57, %s5373_s28 }
 0xc90   :  { %4951 = vrot.lane.b32.xlu2 %v4945_v57, %s5374_s29 }
 0xc97   :  { %4976 = vrot.lane.b32.xlu1 %v4945_v57, %s5377_s20  ;;  %4961 = vrot.lane.b32.xlu0 %v4960_v55, %s5375_s30 }
 0xc98   :  { %4971 = vrot.lane.b32.xlu2 %v4945_v57, %s5376_s19 }
 0xc9f   :  { %4991 = vrot.lane.b32.xlu1 %v4960_v55, %s5373_s28  ;;  %4986 = vrot.lane.b32.xlu0 %v4960_v55, %s5374_s29  ;;  %s5379_s28 = smov 18  }
 0xca0   :  { %4981 = vrot.lane.b32.xlu2 %v4945_v57, %s5363_s11 }
 0xca7   :  { %5006 = vrot.lane.b32.xlu1 %v4960_v55, %s5376_s19  ;;  %5001 = vrot.lane.b32.xlu0 %v4960_v55, %s5364_s12 }
 0xca8   :  { %4996 = vrot.lane.b32.xlu2 %v4945_v57, %s5369_s17 }
 0xcaf   :  { %5021 = vrot.lane.b32.xlu1 %v4960_v55, %s5369_s17  ;;  %5016 = vrot.lane.b32.xlu0 %v4960_v55, %s5363_s11 }
 0xcb0   :  { %5011 = vrot.lane.b32.xlu2 %v4960_v55, %s5377_s20 }
 0xcb8   :  { %2953 = vperm.xlu2 %4243, %v2950_v1  }
 0xcd2   :  { %v7928_v40 = vpop.permute.xlu2 %4906 }
 0xcd3   :  { %v4909_v37 = vunpack.i.h.bf16 %v7928_v40  ;;  %v9364_v6 = vunpack.i.l.bf16 %v7928_v40 }
 0xcd5   :  { %v2466_v39 = vsel %vm1216_vm12, %v9364_v6, %v4909_v37 }
 0xcd6   :  { %v2492_v38 = vpack.c.bf16 %v2466_v39, %v2466_v39 }
 0xcd8   :  { %v7939_v51 = vsel %vm305_vm2, %v2492_v38, 0 }
 0xcd9   :  { %2522 = vmatpush.bf16.msra.mxu2 %v7939_v51 }
 0xcda   :  { %v7942_v20 = vpop.permute.xlu2 %4936 }
 0xcdb   :  { %v9367_v29 = vunpack.i.h.bf16 %v7942_v20  ;;  %v9363_v30 = vunpack.i.l.bf16 %v7942_v20 }
 0xcdd   :  { %v2376_v1 = vsel %vm221_vm3, %v9363_v30, %v9367_v29 }
 0xce2   :  { %v7944_v56 = vpop.permute.xlu2 %4946 }
 0xce3   :  { %v4949_v62 = vunpack.i.h.bf16 %v7944_v56  ;;  %v4948_v36 = vunpack.i.l.bf16 %v7944_v56 }
 0xce5   :  { %v2463_v16 = vsel %vm1216_vm12, %v4948_v36, %v4949_v62 }
 0xce6   :  { %v2495_v23 = vpack.c.bf16 %v2463_v16, %v2463_v16 }
 0xce8   :  { %v7955_v58 = vsel %vm305_vm2, %v2495_v23, 0 }
 0xce9   :  { %2561 = vmatpush.bf16.msrb.mxu1 %v7955_v58  ;;  %v7958_v43 = vpop.permute.xlu1 %4916  ;;  %v7960_v34 = vpop.permute.xlu0 %4911 }
 0xcea   :  { %v9386_v5 = vunpack.i.h.bf16 %v7958_v43  ;;  %v9379_v11 = vunpack.i.l.bf16 %v7958_v43  ;;  %v9376_v28 = vunpack.i.h.bf16 %v7960_v34  ;;  %v9375_v48 = vunpack.i.l.bf16 %v7960_v34  ;;  %v7966_v63 = vpop.permute.xlu2 %4951 }
 0xcec   :  { %v2448_v33 = vsel %vm1197_vm13, %v9379_v11, %v9386_v5  ;;  %v2430_v26 = vsel %vm1178_vm14, %v9375_v48, %v9376_v28 }
 0xced   :  { %v7980_v41 = vpack.c.bf16 %v2448_v33, %v2430_v26  ;;  %v9378_v33 = vunpack.i.h.bf16 %v7966_v63  ;;  %v9377_v26 = vunpack.i.l.bf16 %v7966_v63 }
 0xcef   :  { %2523 = vmatpush.bf16.msra.mxu2 %v7980_v41 }
 0xcf1   :  { %v7983_v61 = vpop.permute.xlu1 %4926  ;;  %v7985_v19 = vpop.permute.xlu0 %4921 }
 0xcf2   :  { %v9374_v50 = vunpack.i.h.bf16 %v7983_v61  ;;  %v9371_v13 = vunpack.i.l.bf16 %v7983_v61  ;;  %v9370_v17 = vunpack.i.h.bf16 %v7985_v19  ;;  %v9369_v14 = vunpack.i.l.bf16 %v7985_v19  ;;  %v7991_v45 = vpop.permute.xlu2 %4971 }
 0xcf4   :  { %v2412_v46 = vsel %vm1159_vm15, %v9371_v13, %v9374_v50  ;;  %v2394_v32 = vsel %vm259_vm1, %v9369_v14, %v9370_v17 }
 0xcf5   :  { %v8005_v31 = vpack.c.bf16 %v2412_v46, %v2394_v32 }
 0xcf7   :  { %2524 = vmatpush.bf16.msra.mxu2 %v8005_v31 }
 0xcf9   :  { %v8010_v44 = vpop.permute.xlu1 %4931  ;;  %v8012_v59 = vpop.permute.xlu0 %4941 }
 0xcfa   :  { %v9368_v2 = vunpack.i.h.bf16 %v8010_v44  ;;  %v9362_v35 = vunpack.i.l.bf16 %v8010_v44  ;;  %v9366_v57 = vunpack.i.h.bf16 %v8012_v59  ;;  %v9365_v55 = vunpack.i.l.bf16 %v8012_v59  ;;  %v8030_v38 = vpop.permute.xlu2 %4981 }
 0xcfb   :  { %v9383_v17 = vunpack.i.h.bf16 %v8030_v38  ;;  %v9382_v13 = vunpack.i.l.bf16 %v8030_v38  ;;  %v9465_v10 = vunpack.i.l.bf16 %v8030_v38 }
 0xcfc   :  { %v2358_v39 = vsel %vm1104_vm9, %v9362_v35, %v9368_v2  ;;  %v2340_v23 = vsel %vm145_vm8, %v9365_v55, %v9366_v57  ;;  %v8051_v55 = vld [vmem:[#allocation2] sm:$0xf]  ;;  %v9380_v57 = vunpack.i.l.bf16 %v7991_v45 }
 0xcfd   :  { %v8032_v16 = vpack.c.bf16 %v2376_v1, %v2358_v39  ;;  %v8044_v46 = vpack.c.bf16 %v2340_v23, %v7877_v22  ;;  %v2427_v22 = vsel %vm1178_vm14, %v9377_v26, %v9378_v33  ;;  %v9381_v23 = vunpack.i.h.bf16 %v7991_v45 }
 0xcff   :  { %2525 = vmatpush.bf16.msra.mxu2 %v8032_v16 }
 0xd01   :  { %v8046_v32 = vpop.permute.xlu1 %4966  ;;  %v4957_v1 = vpop.permute.xlu0 %4956 }
 0xd02   :  { %v9373_v39 = vunpack.i.h.bf16 %v8046_v32  ;;  %v9372_v35 = vunpack.i.l.bf16 %v8046_v32  ;;  %v4959_v30 = vunpack.i.h.bf16 %v4957_v1  ;;  %v4958_v6 = vunpack.i.l.bf16 %v4957_v1  ;;  %v8071_v14 = vpop.permute.xlu2 %4996 }
 0xd03   :  { %2526 = vmatpush.bf16.msra.mxu2 %v8044_v46 }
 0xd04   :  { %v2445_v29 = vsel %vm1197_vm13, %v4958_v6, %v4959_v30  ;;  %v2391_v1 = vsel %vm259_vm1, %v9372_v35, %v9373_v39  ;;  %v9387_v35 = vunpack.i.h.bf16 %v8071_v14  ;;  %v9388_v39 = vunpack.i.l.bf16 %v8071_v14 }
 0xd05   :  { %v8063_v2 = vpack.c.bf16 %v2445_v29, %v2427_v22  ;;  %v2409_v29 = vsel %vm1159_vm15, %v9380_v57, %v9381_v23 }
 0xd06   :  { %3897 = vmatmul.msk.bf16.vlgmr.msra.gmra.mxu2 %vm301_vm10, %v8051_v55  ;;  %v8084_v22 = vpack.c.bf16 %v2409_v29, %v2391_v1  ;;  %v2373_v1 = vsel %vm221_vm3, %v9382_v13, %v9383_v17 }
 0xd07   :  { %2562 = vmatpush.bf16.msrb.mxu1 %v8063_v2 }
 0xd09   :  { %v8088_v50 = vpop.permute.xlu1 %4976  ;;  %v8090_v48 = vpop.permute.xlu0 %4961 }
 0xd0a   :  { %v9385_v28 = vunpack.i.h.bf16 %v8088_v50  ;;  %v9384_v26 = vunpack.i.l.bf16 %v8088_v50  ;;  %v9389_v33 = vunpack.i.h.bf16 %v8090_v48  ;;  %v4963_v11 = vunpack.i.l.bf16 %v8090_v48 }
 0xd0b   :  { %2563 = vmatpush.bf16.msrb.mxu1 %v8084_v22 }
 0xd0c   :  { %v2355_v29 = vsel %vm1104_vm9, %v9384_v26, %v9385_v28  ;;  %v2465_v57 = vsel %vm1216_vm12, %v4909_v37, %v4963_v11  ;;  %v2464_v23 = vsel %vm1216_vm12, %v4963_v11, %v4948_v36  ;;  %v2462_v13 = vsel %vm1216_vm12, %v4949_v62, %v9389_v33 }
 0xd0d   :  { %v8123_v17 = vpack.c.bf16 %v2373_v1, %v2355_v29  ;;  %v2337_v37 = vsel %vm145_vm8, %v9388_v39, %v9387_v35  ;;  %v2493_v26 = vpack.c.bf16 %v2465_v57, %v2465_v57  ;;  %v2494_v28 = vpack.c.bf16 %v2464_v23, %v2464_v23 }
 0xd0e   :  { %v2496_v5 = vpack.c.bf16 %v2462_v13, %v2462_v13  ;;  %v8142_v11 = vpack.c.bf16 %v2337_v37, %v7893_v18  ;;  %v9448_v35 = vunpack.i.l.bf16 %v7958_v43  ;;  %v9450_v39 = vunpack.i.l.bf16 %v7966_v63 }
 0xd0f   :  { %2564 = vmatpush.bf16.msrb.mxu1 %v8123_v17  ;;  %v8133_v36 = vsel %vm305_vm2, %v2493_v26, 0  ;;  %v8136_v56 = vsel %vm305_vm2, %v2494_v28, 0  ;;  %v9447_v28 = vunpack.i.h.bf16 %v7958_v43  ;;  %v9451_v33 = vunpack.i.h.bf16 %v7960_v34 }
 0xd10   :  { %v8139_v62 = vsel %vm305_vm2, %v2496_v5, 0  ;;  %2535 = vmatpush.bf16.msra.mxu3 %v8133_v36  ;;  %2548 = vmatpush.bf16.msrb.mxu0 %v8136_v56 }
 0xd11   :  { %v4992_v57 = vpop.permute.xlu1 %4991  ;;  %v4987_v13 = vpop.permute.xlu0 %4986  ;;  %2574 = vmatpush.bf16.msrb.mxu2 %v8139_v62 }
 0xd12   :  { %v4994_v23 = vunpack.i.h.bf16 %v4992_v57  ;;  %v4993_v26 = vunpack.i.l.bf16 %v4992_v57  ;;  %v4989_v1 = vunpack.i.h.bf16 %v4987_v13  ;;  %v4988_v29 = vunpack.i.l.bf16 %v4987_v13 }
 0xd13   :  { %2565 = vmatpush.bf16.msrb.mxu1 %v8142_v11  ;;  %v9449_v13 = vunpack.i.h.bf16 %v7966_v63 }
 0xd14   :  { %v2444_v5 = vsel %vm1197_vm13, %v4959_v30, %v4994_v23  ;;  %v2446_v18 = vsel %vm1197_vm13, %v4993_v26, %v4958_v6  ;;  %v2447_v37 = vsel %vm1197_vm13, %v9447_v28, %v4993_v26  ;;  %v2449_v57 = vsel %vm1197_vm13, %v4994_v23, %v9448_v35 }
 0xd15   :  { %v2426_v30 = vsel %vm1178_vm14, %v9449_v13, %v4989_v1  ;;  %v2428_v6 = vsel %vm1178_vm14, %v4988_v29, %v9450_v39  ;;  %v2429_v43 = vsel %vm1178_vm14, %v9451_v33, %v4988_v29  ;;  %v9452_v26 = vunpack.i.l.bf16 %v7960_v34 }
 0xd16   :  { %v8177_v23 = vpack.c.bf16 %v2447_v37, %v2429_v43  ;;  %v8179_v28 = vpack.c.bf16 %v2446_v18, %v2428_v6  ;;  %v8181_v13 = vpack.c.bf16 %v2444_v5, %v2426_v30  ;;  %3900 = vmatmul.msk.bf16.vlgmr.msrb.gmra.mxu1 %vm301_vm10, %v8051_v55  ;;  %v9453_v18 = vunpack.i.h.bf16 %v7991_v45 }
 0xd17   :  { %2630 = vmatpush.bf16.msra.mxu1 %v8133_v36  ;;  %v2431_v35 = vsel %vm1178_vm14, %v4989_v1, %v9452_v26  ;;  %v9455_v6 = vunpack.i.h.bf16 %v7983_v61  ;;  %v9456_v26 = vunpack.i.l.bf16 %v7983_v61  ;;  %v9460_v61 = vunpack.i.l.bf16 %v7985_v19 }
 0xd18   :  { %v8183_v63 = vpack.c.bf16 %v2449_v57, %v2431_v35  ;;  %2536 = vmatpush.bf16.msra.mxu3 %v8177_v23  ;;  %2549 = vmatpush.bf16.msrb.mxu0 %v8179_v28  ;;  %v9454_v57 = vunpack.i.l.bf16 %v7991_v45  ;;  %v9458_v45 = vunpack.i.l.bf16 %v8046_v32 }
 0xd19   :  { %2575 = vmatpush.bf16.msrb.mxu2 %v8181_v13  ;;  %v5007_v34 = vpop.permute.xlu1 %5006  ;;  %v5002_v33 = vpop.permute.xlu0 %5001 }
 0xd1a   :  { %v5009_v39 = vunpack.i.h.bf16 %v5007_v34  ;;  %v5008_v1 = vunpack.i.l.bf16 %v5007_v34  ;;  %v5004_v29 = vunpack.i.h.bf16 %v5002_v33  ;;  %v5003_v5 = vunpack.i.l.bf16 %v5002_v33 }
 0xd1b   :  { %2631 = vmatpush.bf16.msra.mxu1 %v8177_v23  ;;  %v9457_v34 = vunpack.i.h.bf16 %v8046_v32 }
 0xd1c   :  { %v2408_v37 = vsel %vm1159_vm15, %v9453_v18, %v5009_v39  ;;  %v2410_v30 = vsel %vm1159_vm15, %v5008_v1, %v9454_v57  ;;  %v2411_v43 = vsel %vm1159_vm15, %v9455_v6, %v5008_v1  ;;  %v2413_v35 = vsel %vm1159_vm15, %v5009_v39, %v9456_v26  ;;  %v5012_v6 = vpop.permute.xlu2 %5011 }
 0xd1d   :  { %v2390_v33 = vsel %vm259_vm1, %v9457_v34, %v5004_v29  ;;  %v2392_v18 = vsel %vm259_vm1, %v5003_v5, %v9458_v45  ;;  %v9459_v57 = vunpack.i.h.bf16 %v7985_v19  ;;  %v2395_v39 = vsel %vm259_vm1, %v5004_v29, %v9460_v61 }
 0xd1e   :  { %v8225_v3 = vpack.c.bf16 %v2410_v30, %v2392_v18  ;;  %v8227_v34 = vpack.c.bf16 %v2408_v37, %v2390_v33  ;;  %v8229_v32 = vpack.c.bf16 %v2413_v35, %v2395_v39  ;;  %v5014_v45 = vunpack.i.h.bf16 %v5012_v6 }
 0xd1f   :  { %v2393_v1 = vsel %vm259_vm1, %v9459_v57, %v5003_v5  ;;  %v5013_v5 = vunpack.i.l.bf16 %v5012_v6  ;;  %v9461_v37 = vunpack.i.h.bf16 %v8088_v50  ;;  %v9462_v33 = vunpack.i.l.bf16 %v8088_v50 }
 0xd20   :  { %v8223_v26 = vpack.c.bf16 %v2411_v43, %v2393_v1  ;;  %2550 = vmatpush.bf16.msrb.mxu0 %v8225_v3  ;;  %2576 = vmatpush.bf16.msrb.mxu2 %v8227_v34  ;;  %v9463_v61 = vunpack.i.h.bf16 %v8010_v44  ;;  %v9464_v6 = vunpack.i.h.bf16 %v8030_v38  ;;  %v9466_v50 = vunpack.i.h.bf16 %v7942_v20 }
 0xd21   :  { %v5022_v19 = vpop.permute.xlu1 %5021  ;;  %v5017_v29 = vpop.permute.xlu0 %5016  ;;  %v2354_v35 = vsel %vm1104_vm9, %v9461_v37, %v5014_v45  ;;  %v2356_v18 = vsel %vm1104_vm9, %v5013_v5, %v9462_v33 }
 0xd22   :  { %2537 = vmatpush.bf16.msra.mxu3 %v8223_v26  ;;  %2632 = vmatpush.bf16.msra.mxu1 %v8223_v26  ;;  %v5019_v43 = vunpack.i.h.bf16 %v5017_v29  ;;  %v5018_v57 = vunpack.i.l.bf16 %v5017_v29  ;;  %v5023_v30 = vunpack.i.l.bf16 %v5022_v19  ;;  %v5024_v1 = vunpack.i.h.bf16 %v5022_v19 }
 0xd23   :  { %v2357_v39 = vsel %vm1104_vm9, %v9463_v61, %v5013_v5  ;;  %v9467_v61 = vunpack.i.l.bf16 %v7928_v40 }
 0xd24   :  { %v2372_v29 = vsel %vm221_vm3, %v9464_v6, %v5019_v43  ;;  %v2374_v37 = vsel %vm221_vm3, %v5018_v57, %v9465_v10  ;;  %v2375_v19 = vsel %vm221_vm3, %v9466_v50, %v5018_v57  ;;  %v9468_v6 = vunpack.i.h.bf16 %v8090_v48 }
 0xd25   :  { %v8259_v33 = vpack.c.bf16 %v2375_v19, %v2357_v39  ;;  %v8261_v4 = vpack.c.bf16 %v2374_v37, %v2356_v18  ;;  %v8263_v5 = vpack.c.bf16 %v2372_v29, %v2354_v35  ;;  %v9469_v10 = vunpack.i.l.bf16 %v8071_v14  ;;  %v2610_v37 = vld [vmem:[#allocation2 + $0x4] sm:$0xf] }
 0xd26   :  { %v2467_v38 = vsel %vm1216_vm12, %v9468_v6, %v9467_v61  ;;  %v9470_v57 = vunpack.i.h.bf16 %v8012_v59  ;;  %v9471_v35 = vunpack.i.h.bf16 %v8071_v14  ;;  %vm9482_vm12 = vcmp.lt.s32.totalorder %v5476_v24, 127 }
 0xd27   :  { %v2338_v9 = vsel %vm145_vm8, %v5023_v30, %v9469_v10  ;;  %2538 = vmatpush.bf16.msra.mxu3 %v8259_v33  ;;  %2551 = vmatpush.bf16.msrb.mxu0 %v8261_v4  ;;  %v2497_v48 = vpack.c.bf16 %v2467_v38, %v2467_v38  ;;  %vm9483_vm13 = vmmov %vm9482_vm12 }
 0xd28   :  { %v2339_v18 = vsel %vm145_vm8, %v9470_v57, %v5023_v30  ;;  %v2336_v40 = vsel %vm145_vm8, %v9471_v35, %v5024_v1  ;;  %2577 = vmatpush.bf16.msrb.mxu2 %v8263_v5  ;;  %2633 = vmatpush.bf16.msra.mxu1 %v8259_v33  ;;  %v8291_v29 = vpack.c.bf16 %v2338_v9, %v7909_v54  ;;  %v9472_v9 = vunpack.i.l.bf16 %v7942_v20  ;;  %vm9484_vm14 = vmmov %vm9482_vm12 }
 0xd29   :  { %v8288_v39 = vpack.c.bf16 %v2339_v18, %v7873_v25  ;;  %v8294_v14 = vpack.c.bf16 %v2336_v40, %v7889_v15  ;;  %v8301_v30 = vsel %vm305_vm2, %v2497_v48, 0  ;;  %v9473_v15 = vunpack.i.l.bf16 %v8010_v44  ;;  %vm9486_vm15 = vmmov %vm9482_vm12 }
 0xd2a   :  { %v2377_v25 = vsel %vm221_vm3, %v5019_v43, %v9472_v9  ;;  %v9474_v20 = vunpack.i.l.bf16 %v8012_v59  ;;  %v2838_v59 = vld [vmem:[#allocation2 + $0xc] sm:$0xf] }
 0xd2b   :  { %2539 = vmatpush.bf16.msra.mxu3 %v8288_v39  ;;  %2552 = vmatpush.bf16.msrb.mxu0 %v8291_v29  ;;  %v2359_v54 = vsel %vm1104_vm9, %v5014_v45, %v9473_v15  ;;  %vm2710_vm9 = vcmp.lt.s32.totalorder %v5476_v24, 1 }
 0xd2c   :  { %2578 = vmatpush.bf16.msrb.mxu2 %v8294_v14  ;;  %2634 = vmatpush.bf16.msra.mxu1 %v8288_v39  ;;  %v8330_v50 = vpack.c.bf16 %v2377_v25, %v2359_v54  ;;  %v2341_v43 = vsel %vm145_vm8, %v5024_v1, %v9474_v20 }
 0xd2d   :  { %v8341_v44 = vpack.c.bf16 %v2341_v43, %v7905_v53  ;;  %v2724_v53 = vld [vmem:[#allocation2 + $0x8] sm:$0xf] }
 0xd2e   :  { %3898 = vmatmul.msk.bf16.vlgmr.msra.gmra.mxu3 %vm301_vm10, %v8051_v55  ;;  %3899 = vmatmul.msk.bf16.vlgmr.msrb.gmra.mxu0 %vm301_vm10, %v8051_v55 }
 0xd2f   :  { %2587 = vmatpush.bf16.msrb.mxu3 %v8301_v30  ;;  %2617 = vmatpush.bf16.msra.mxu0 %v7939_v51 }
 0xd30   :  { %2643 = vmatpush.bf16.msra.mxu2 %v8136_v56  ;;  %2682 = vmatpush.bf16.msrb.mxu1 %v8301_v30 }
 0xd31   :  { %3904 = vmatmul.msk.bf16.vlgmr.msra.gmra.mxu1 %vm301_vm10, %v2610_v37  ;;  %3901 = vmatmul.msk.bf16.vlgmr.msrb.gmra.mxu2 %vm301_vm10, %v8051_v55 }
 0xd33   :  { %2588 = vmatpush.bf16.msrb.mxu3 %v8183_v63  ;;  %2618 = vmatpush.bf16.msra.mxu0 %v7980_v41 }
 0xd34   :  { %2644 = vmatpush.bf16.msra.mxu2 %v8179_v28  ;;  %2683 = vmatpush.bf16.msrb.mxu1 %v8183_v63 }
 0xd37   :  { %2589 = vmatpush.bf16.msrb.mxu3 %v8229_v32  ;;  %2619 = vmatpush.bf16.msra.mxu0 %v8005_v31 }
 0xd38   :  { %2645 = vmatpush.bf16.msra.mxu2 %v8225_v3  ;;  %2684 = vmatpush.bf16.msrb.mxu1 %v8229_v32 }
 0xd3b   :  { %2590 = vmatpush.bf16.msrb.mxu3 %v8330_v50  ;;  %2620 = vmatpush.bf16.msra.mxu0 %v8032_v16 }
 0xd3c   :  { %2646 = vmatpush.bf16.msra.mxu2 %v8261_v4  ;;  %2685 = vmatpush.bf16.msrb.mxu1 %v8330_v50 }
 0xd3f   :  { %2591 = vmatpush.bf16.msrb.mxu3 %v8341_v44  ;;  %2621 = vmatpush.bf16.msra.mxu0 %v8044_v46 }
 0xd40   :  { %2647 = vmatpush.bf16.msra.mxu2 %v8291_v29  ;;  %2686 = vmatpush.bf16.msrb.mxu1 %v8341_v44 }
 0xd42   :  { %3902 = vmatmul.msk.bf16.vlgmr.msrb.gmra.mxu3 %vm301_vm10, %v8051_v55  ;;  %3903 = vmatmul.msk.bf16.vlgmr.msra.gmra.mxu0 %vm301_vm10, %v2610_v37 }
 0xd43   :  { %2656 = vmatpush.bf16.msra.mxu3 %v7955_v58  ;;  %2669 = vmatpush.bf16.msrb.mxu0 %v8139_v62 }
 0xd44   :  { %2731 = vmatpush.bf16.msrb.mxu2 %v7939_v51  ;;  %2770 = vmatpush.bf16.msra.mxu1 %v7955_v58 }
 0xd45   :  { %3905 = vmatmul.msk.bf16.vlgmr.msra.gmra.mxu2 %vm301_vm10, %v2610_v37  ;;  %3908 = vmatmul.msk.bf16.vlgmr.msrb.gmra.mxu1 %vm301_vm10, %v2610_v37 }
 0xd47   :  { %2657 = vmatpush.bf16.msra.mxu3 %v8063_v2  ;;  %2670 = vmatpush.bf16.msrb.mxu0 %v8181_v13 }
 0xd48   :  { %2732 = vmatpush.bf16.msrb.mxu2 %v7980_v41  ;;  %2771 = vmatpush.bf16.msra.mxu1 %v8063_v2 }
 0xd4b   :  { %2658 = vmatpush.bf16.msra.mxu3 %v8084_v22  ;;  %2671 = vmatpush.bf16.msrb.mxu0 %v8227_v34 }
 0xd4c   :  { %2733 = vmatpush.bf16.msrb.mxu2 %v8005_v31  ;;  %2772 = vmatpush.bf16.msra.mxu1 %v8084_v22 }
 0xd4f   :  { %2659 = vmatpush.bf16.msra.mxu3 %v8123_v17  ;;  %2672 = vmatpush.bf16.msrb.mxu0 %v8263_v5 }
 0xd50   :  { %2734 = vmatpush.bf16.msrb.mxu2 %v8032_v16  ;;  %2773 = vmatpush.bf16.msra.mxu1 %v8123_v17 }
 0xd53   :  { %2660 = vmatpush.bf16.msra.mxu3 %v8142_v11  ;;  %2673 = vmatpush.bf16.msrb.mxu0 %v8294_v14 }
 0xd54   :  { %2735 = vmatpush.bf16.msrb.mxu2 %v8044_v46  ;;  %2774 = vmatpush.bf16.msra.mxu1 %v8142_v11 }
 0xd56   :  { %3906 = vmatmul.msk.bf16.vlgmr.msra.gmra.mxu3 %vm301_vm10, %v2610_v37  ;;  %3907 = vmatmul.msk.bf16.vlgmr.msrb.gmra.mxu0 %vm301_vm10, %v2610_v37 }
 0xd57   :  { %2744 = vmatpush.bf16.msrb.mxu3 %v8133_v36  ;;  %2757 = vmatpush.bf16.msra.mxu0 %v8136_v56 }
 0xd58   :  { %2783 = vmatpush.bf16.msra.mxu2 %v8139_v62  ;;  %2858 = vmatpush.bf16.msrb.mxu1 %v8133_v36 }
 0xd59   :  { %3909 = vmatmul.msk.bf16.vlgmr.msrb.gmra.mxu2 %vm301_vm10, %v2724_v53  ;;  %3912 = vmatmul.msk.bf16.vlgmr.msra.gmra.mxu1 %vm301_vm10, %v2724_v53 }
 0xd5b   :  { %2745 = vmatpush.bf16.msrb.mxu3 %v8177_v23  ;;  %2758 = vmatpush.bf16.msra.mxu0 %v8179_v28 }
 0xd5c   :  { %2784 = vmatpush.bf16.msra.mxu2 %v8181_v13  ;;  %2859 = vmatpush.bf16.msrb.mxu1 %v8177_v23 }
 0xd5f   :  { %2746 = vmatpush.bf16.msrb.mxu3 %v8223_v26  ;;  %2759 = vmatpush.bf16.msra.mxu0 %v8225_v3 }
 0xd60   :  { %2785 = vmatpush.bf16.msra.mxu2 %v8227_v34  ;;  %2860 = vmatpush.bf16.msrb.mxu1 %v8223_v26 }
 0xd63   :  { %2747 = vmatpush.bf16.msrb.mxu3 %v8259_v33  ;;  %2760 = vmatpush.bf16.msra.mxu0 %v8261_v4 }
 0xd64   :  { %2786 = vmatpush.bf16.msra.mxu2 %v8263_v5  ;;  %2861 = vmatpush.bf16.msrb.mxu1 %v8259_v33 }
 0xd67   :  { %2748 = vmatpush.bf16.msrb.mxu3 %v8288_v39  ;;  %2761 = vmatpush.bf16.msra.mxu0 %v8291_v29 }
 0xd68   :  { %2787 = vmatpush.bf16.msra.mxu2 %v8294_v14  ;;  %2862 = vmatpush.bf16.msrb.mxu1 %v8288_v39 }
 0xd6a   :  { %3910 = vmatmul.msk.bf16.vlgmr.msrb.gmra.mxu3 %vm301_vm10, %v2724_v53  ;;  %3911 = vmatmul.msk.bf16.vlgmr.msra.gmra.mxu0 %vm301_vm10, %v2724_v53 }
 0xd6b   :  { %2796 = vmatpush.bf16.msra.mxu3 %v8301_v30  ;;  %2845 = vmatpush.bf16.msrb.mxu0 %v7939_v51 }
 0xd6c   :  { %2871 = vmatpush.bf16.msrb.mxu2 %v8136_v56  ;;  %2910 = vmatpush.bf16.msra.mxu1 %v8301_v30 }
 0xd6d   :  { %3913 = vmatmul.msk.bf16.vlgmr.msra.gmra.mxu2 %vm301_vm10, %v2724_v53  ;;  %3916 = vmatmul.msk.bf16.vlgmr.msrb.gmra.mxu1 %vm301_vm10, %v2838_v59 }
 0xd6f   :  { %2797 = vmatpush.bf16.msra.mxu3 %v8183_v63  ;;  %2846 = vmatpush.bf16.msrb.mxu0 %v7980_v41 }
 0xd70   :  { %2872 = vmatpush.bf16.msrb.mxu2 %v8179_v28  ;;  %2911 = vmatpush.bf16.msra.mxu1 %v8183_v63 }
 0xd73   :  { %2798 = vmatpush.bf16.msra.mxu3 %v8229_v32  ;;  %2847 = vmatpush.bf16.msrb.mxu0 %v8005_v31 }
 0xd74   :  { %2873 = vmatpush.bf16.msrb.mxu2 %v8225_v3  ;;  %2912 = vmatpush.bf16.msra.mxu1 %v8229_v32 }
 0xd77   :  { %2799 = vmatpush.bf16.msra.mxu3 %v8330_v50  ;;  %2848 = vmatpush.bf16.msrb.mxu0 %v8032_v16 }
 0xd78   :  { %2874 = vmatpush.bf16.msrb.mxu2 %v8261_v4  ;;  %2913 = vmatpush.bf16.msra.mxu1 %v8330_v50 }
 0xd7b   :  { %2800 = vmatpush.bf16.msra.mxu3 %v8341_v44  ;;  %2849 = vmatpush.bf16.msrb.mxu0 %v8044_v46 }
 0xd7c   :  { %2875 = vmatpush.bf16.msrb.mxu2 %v8291_v29  ;;  %2914 = vmatpush.bf16.msra.mxu1 %v8341_v44 }
 0xd7e   :  { %3914 = vmatmul.msk.bf16.vlgmr.msra.gmra.mxu3 %vm301_vm10, %v2724_v53  ;;  %3915 = vmatmul.msk.bf16.vlgmr.msrb.gmra.mxu0 %vm301_vm10, %v2838_v59 }
 0xd7f   :  { %2884 = vmatpush.bf16.msrb.mxu3 %v7955_v58  ;;  %2897 = vmatpush.bf16.msra.mxu0 %v8139_v62 }
 0xd80   :  { %3917 = vmatmul.msk.bf16.vlgmr.msrb.gmra.mxu2 %vm301_vm10, %v2838_v59  ;;  %3920 = vmatmul.msk.bf16.vlgmr.msra.gmra.mxu1 %vm301_vm10, %v2838_v59 }
 0xd83   :  { %2885 = vmatpush.bf16.msrb.mxu3 %v8063_v2  ;;  %2898 = vmatpush.bf16.msra.mxu0 %v8181_v13 }
 0xd87   :  { %2886 = vmatpush.bf16.msrb.mxu3 %v8084_v22  ;;  %2899 = vmatpush.bf16.msra.mxu0 %v8227_v34 }
 0xd89   :  { %v8434_v3 = vpop.f32.mrf.mxu2 }
 0xd8b   :  { %2887 = vmatpush.bf16.msrb.mxu3 %v8123_v17  ;;  %2900 = vmatpush.bf16.msra.mxu0 %v8263_v5 }
 0xd8f   :  { %2888 = vmatpush.bf16.msrb.mxu3 %v8142_v11  ;;  %2901 = vmatpush.bf16.msra.mxu0 %v8294_v14 }
 0xd91   :  { %v2530_v4 = vpop.f32.mrf.mxu2 }
 0xd92   :  { %3919 = vmatmul.msk.bf16.vlgmr.msra.gmra.mxu0 %vm301_vm10, %v2838_v59  ;;  %3918 = vmatmul.msk.bf16.vlgmr.msrb.gmra.mxu3 %vm301_vm10, %v2838_v59 }
 0xd93   :  { %v8438_v51 = vpop.f32.mrf.mxu1 }
 0xd9b   :  { %v2569_v58 = vpop.f32.mrf.mxu1 }
 0xdab   :  { %v8441_v17 = vpop.f32.mrf.mxu0 }
 0xdae   :  { %v2636_v41 = vpop.f32.mrf.mxu1 }
 0xdaf   :  { %v2693_v31 = vmul.f32 %v2636_v41, %v6464_v0 }
 0xdb1   :  { %2700 = vrot.lane.b32.xlu0 %v2693_v31, %s5378_s4  ;;  %v8444_v2 = vpop.f32.mrf.mxu3 }
 0xdb3   :  { %v2556_v46 = vpop.f32.mrf.mxu0 }
 0xdb4   :  { %v8446_v55 = vpop.f32.mrf.mxu2 }
 0xdb6   :  { %v2638_v16 = vpop.f32.mrf.mxu1 }
 0xdb9   :  { %v2543_v22 = vpop.f32.mrf.mxu3 }
 0xdbc   :  { %v2582_v36 = vpop.f32.mrf.mxu2 }
 0xdbf   :  { %v2623_v56 = vpop.f32.mrf.mxu0 }
 0xdc0   :  { %v2692_v62 = vmul.f32 %v2623_v56, %v6462_v27 }
 0xdc2   :  { %v2688_v11 = vpop.f32.mrf.mxu1  ;;  %2698 = vrot.lane.b32.xlu2 %v2692_v62, %s5378_s4 }
 0xdc3   :  { %v2697_v13 = vmul.f32 %v2688_v11, %v6479_v52 }
 0xdc5   :  { %v8450_v23 = vpop.f32.mrf.mxu3 }
 0xdc7   :  { %v2625_v26 = vpop.f32.mrf.mxu0 }
 0xdc8   :  { %v2649_v28 = vpop.f32.mrf.mxu2  ;;  %v8484_v26 = vpop.permute.xlu2 %2953 }
 0xdc9   :  { %v2694_v63 = vmul.f32 %v2649_v28, %v6477_v42 }
 0xdca   :  { %v2690_v34 = vpop.f32.mrf.mxu1  ;;  %2708 = vrot.lane.b32.xlu2 %v2697_v13, %s5378_s4 }
 0xdcb   :  { %2702 = vrot.lane.b32.xlu1 %v2694_v63, %s5378_s4 }
 0xdcd   :  { %v2595_v32 = vpop.f32.mrf.mxu3 }
 0xdd0   :  { %v2651_v45 = vpop.f32.mrf.mxu2 }
 0xdd3   :  { %v2675_v1 = vpop.f32.mrf.mxu0 }
 0xdd4   :  { %v2696_v36 = vmul.f32 %v2675_v1, %v6484_v49 }
 0xdd6   :  { %v2776_v19 = vpop.f32.mrf.mxu1 }
 0xdd7   :  { %v2809_v62 = vmul.f32 %v2776_v19, %v6489_v21 }
 0xdd9   :  { %v2662_v33 = vpop.f32.mrf.mxu3 }
 0xdda   :  { %v2695_v13 = vmul.f32 %v2662_v33, %v6489_v21  ;;  %v2598_v33 = vmul.f32 %v8444_v2, %v6464_v0 }
 0xddb   :  { %v2677_v6 = vpop.f32.mrf.mxu0 }
 0xddc   :  { %v2737_v5 = vpop.f32.mrf.mxu2 }
 0xddd   :  { %v2806_v61 = vmul.f32 %v2737_v5, %v6462_v27 }
 0xdde   :  { %v2778_v38 = vpop.f32.mrf.mxu1 }
 0xddf   :  { %2812 = vrot.lane.b32.xlu0 %v2806_v61, %s5379_s28 }
 0xde1   :  { %v2664_v10 = vpop.f32.mrf.mxu3 }
 0xde4   :  { %v2739_v57 = vpop.f32.mrf.mxu2 }
 0xde7   :  { %v2763_v18 = vpop.f32.mrf.mxu0 }
 0xde8   :  { %v2808_v35 = vmul.f32 %v2763_v18, %v6477_v42 }
 0xdea   :  { %v2864_v40 = vpop.f32.mrf.mxu1  ;;  %2816 = vrot.lane.b32.xlu2 %v2808_v35, %s5379_s28 }
 0xdeb   :  { %v2921_v14 = vmul.f32 %v2864_v40, %v6464_v0 }
 0xded   :  { %v2750_v48 = vpop.f32.mrf.mxu3 }
 0xdee   :  { %v2807_v39 = vmul.f32 %v2750_v48, %v6464_v0 }
 0xdef   :  { %v2765_v30 = vpop.f32.mrf.mxu0 }
 0xdf0   :  { %v2789_v29 = vpop.f32.mrf.mxu2  ;;  %2814 = vrot.lane.b32.xlu1 %v2807_v39, %s5379_s28  ;;  %v2597_v39 = vmul.f32 %v8434_v3, %v6462_v27 }
 0xdf1   :  { %v2810_v16 = vmul.f32 %v2789_v29, %v6484_v49 }
 0xdf2   :  { %v2866_v37 = vpop.f32.mrf.mxu1  ;;  %2928 = vrot.lane.b32.xlu2 %v2921_v14, %s5362_s10 }
 0xdf5   :  { %v2752_v9 = vpop.f32.mrf.mxu3 }
 0xdf8   :  { %v2791_v25 = vpop.f32.mrf.mxu2 }
 0xdfb   :  { %v2851_v15 = vpop.f32.mrf.mxu0 }
 0xdfc   :  { %v2920_v54 = vmul.f32 %v2851_v15, %v6462_v27 }
 0xdfd   :  { %v2916_v50 = vpop.f32.mrf.mxu1 }
 0xdfe   :  { %2926 = vrot.lane.b32.xlu1 %v2920_v54, %s5362_s10  ;;  %v2925_v53 = vmul.f32 %v2916_v50, %v6479_v52 }
 0xe01   :  { %v2802_v20 = vpop.f32.mrf.mxu3 }
 0xe02   :  { %v2811_v43 = vmul.f32 %v2802_v20, %v6479_v52 }
 0xe03   :  { %v2877_v44 = vpop.f32.mrf.mxu2  ;;  %v2853_v59 = vpop.f32.mrf.mxu0 }
 0xe04   :  { %2822 = vrot.lane.b32.xlu0 %v2811_v43, %s5379_s28  ;;  %v2922_v58 = vmul.f32 %v2877_v44, %v6477_v42  ;;  %v2599_v43 = vmul.f32 %v8441_v17, %v6477_v42  ;;  %v2602_v42 = vmul.f32 %v8450_v23, %v6479_v52  ;;  %v2600_v52 = vmul.f32 %v8438_v51, %v6489_v21 }
 0xe05   :  { %v2918_v4 = vpop.f32.mrf.mxu1  ;;  %v2601_v23 = vmul.f32 %v8446_v55, %v6484_v49  ;;  %v9476_v55 = vld [vmem:[#allocation13_spill] sm:$0xff] }
 0xe06   :  { %2936 = vrot.lane.b32.xlu1 %v2925_v53, %s5362_s10 }
 0xe09   :  { %v2804_v41 = vpop.f32.mrf.mxu3 }
 0xe0b   :  { %v2879_v31 = vpop.f32.mrf.mxu2 }
 0xe0c   :  { %2930 = vrot.lane.b32.xlu0 %v2922_v58, %s5362_s10 }
 0xe0e   :  { %2820 = vrot.lane.b32.xlu1 %v2810_v16, %s5379_s28 }
 0xe0f   :  { %v2903_v46 = vpop.f32.mrf.mxu0 }
 0xe10   :  { %v2924_v22 = vmul.f32 %v2903_v46, %v6484_v49 }
 0xe12   :  { %2934 = vrot.lane.b32.xlu2 %v2924_v22, %s5362_s10 }
 0xe14   :  { %2706 = vrot.lane.b32.xlu0 %v2696_v36, %s5378_s4 }
 0xe15   :  { %v2890_v56 = vpop.f32.mrf.mxu3 }
 0xe16   :  { %v2923_v11 = vmul.f32 %v2890_v56, %v6489_v21  ;;  %2818 = vrot.lane.b32.xlu1 %v2809_v62, %s5379_s28 }
 0xe17   :  { %v2905_v28 = vpop.f32.mrf.mxu0 }
 0xe1a   :  { %2932 = vrot.lane.b32.xlu2 %v2923_v11, %s5362_s10 }
 0xe1c   :  { %2704 = vrot.lane.b32.xlu0 %v2695_v13, %s5378_s4  ;;  %v2699_v34 = vpop.permute.xlu2 %2698 }
 0xe1d   :  { %v2892_v63 = vpop.f32.mrf.mxu3 }
 0xe23   :  { %v2701_v1 = vpop.permute.xlu0 %2700 }
 0xe24   :  { %v2709_v32 = vpop.permute.xlu2 %2708  ;;  %v2715_v61 = vsel %vm2710_vm9, %v2699_v34, %v2701_v1 }
 0xe25   :  { %v2718_v10 = vadd.f32 %v2715_v61, %v2598_v33  ;;  %v2716_v48 = vsel %vm2710_vm9, %v2709_v32, %v2699_v34  ;;  %v9475_v33 = vld [vmem:[#allocation16_spill] sm:$0xff] }
 0xe26   :  { %v2717_v14 = vadd.f32 %v2716_v48, %v2597_v39 }
 0xe3d   :  { %v2703_v45 = vpop.permute.xlu1 %2702 }
 0xe3e   :  { %v2714_v20 = vsel %vm2710_vm9, %v2701_v1, %v2703_v45 }
 0xe3f   :  { %v2719_v59 = vadd.f32 %v2714_v20, %v2599_v43 }
 0xe44   :  { %v8486_v19 = vpop.permute.xlu2 %2816 }
 0xe4c   :  { %v2929_v57 = vpop.permute.xlu2 %2928 }
 0xe51   :  { %v2813_v6 = vpop.permute.xlu0 %2812 }
 0xe62   :  { %v2815_v5 = vpop.permute.xlu1 %2814 }
 0xe63   :  { %v2829_v38 = vsel %vm2824_vm11, %v2813_v6, %v2815_v5 }
 0xe64   :  { %v2832_v40 = vadd.f32 %v2829_v38, %v2718_v10 }
 0xe6c   :  { %v2935_v17 = vpop.permute.xlu2 %2934 }
 0xe70   :  { %v2927_v18 = vpop.permute.xlu1 %2926 }
 0xe71   :  { %v2942_v35 = vsel %vm107_vm0, %v2927_v18, %v2929_v57 }
 0xe72   :  { %v2945_v29 = vadd.f32 %v2942_v35, %v2832_v40 }
 0xe74   :  { %v2957_v30 = vadd.f32 %v8484_v26, %v2945_v29  ;;  %v2933_v61 = vpop.permute.xlu2 %2932 }
 0xe75   :  { %v2939_v35 = vsel %vm107_vm0, %v2933_v61, %v2935_v17 }
 0xe76   :  { %v2823_v0 = vpop.permute.xlu0 %2822  ;;  %v8508_v54 = vadd.f32 %v2957_v30, %v6103_v60  ;;  %v2828_v60 = vsel %vm2824_vm11, %v2815_v5, %v8486_v19  ;;  %v9479_v30 = vld [vmem:[#allocation17_spill] sm:$0xff] }
 0xe77   :  { %v2830_v2 = vsel %vm2824_vm11, %v2823_v0, %v2813_v6  ;;  %v2833_v58 = vadd.f32 %v2828_v60, %v2719_v59 }
 0xe78   :  { %v2831_v37 = vadd.f32 %v2830_v2, %v2717_v14  ;;  %v2937_v9 = vpop.permute.xlu1 %2936  ;;  %v2973_v44 = vmul.f32 %v8508_v54, %v5455_v8 }
 0xe79   :  { %v2943_v25 = vsel %vm107_vm0, %v2937_v9, %v2927_v18  ;;  %v2938_v11 = vsel %vm107_vm0, %v2935_v17, %v2937_v9  ;;  %v9477_v18 = vld [vmem:[#allocation12_spill] sm:$0xff]  ;;  %v9480_v9 = vld [vmem:[#allocation14_spill] sm:$0xff] }
 0xe7a   :  { %v2944_v15 = vadd.f32 %v2943_v25, %v2831_v37 }
 0xe7c   :  { %v2956_v50 = vadd.f32 %v8484_v26, %v2944_v15  ;;  %v9481_v15 = vld [vmem:[#allocation11_spill] sm:$0xff] }
 0xe7e   :  { %v8512_v27 = vadd.f32 %v2956_v50, %v6113_v12  ;;  %v2931_v3 = vpop.permute.xlu0 %2930 }
 0xe7f   :  { %v2941_v4 = vsel %vm107_vm0, %v2929_v57, %v2931_v3  ;;  %v2940_v40 = vsel %vm107_vm0, %v2931_v3, %v2933_v61 }
 0xe80   :  { %v2972_v53 = vmul.f32 %v8512_v27, %v5453_v7  ;;  %v2821_v41 = vpop.permute.xlu1 %2820  ;;  %v2946_v31 = vadd.f32 %v2941_v4, %v2833_v58 }
 0xe81   :  { %v2825_v36 = vsel %vm2824_vm11, %v2821_v41, %v2823_v0  ;;  %v9478_v0 = vld [vmem:[#allocation15_spill] sm:$0xff] }
 0xe82   :  { %v5025_v12 = vpack.i.bf16 %v2973_v44, %v2972_v53  ;;  %v2958_v56 = vadd.f32 %v8484_v26, %v2946_v31 }
 0xe84   :  { %5026 = vrot.lane.b32.xlu0 %v5025_v12, %s5362_s10  ;;  %v8542_v13 = vadd.f32 %v2958_v56, %v6108_v47  ;;  %v3922_v56 = vld [vmem:[%s9312_s2 + $0x38] sm:$0xff] }
 0xe86   :  { %v2707_v16 = vpop.permute.xlu0 %2706  ;;  %v2974_v38 = vmul.f32 %v8542_v13, %v9476_v55 }
 0xe87   :  { %v2711_v46 = vsel %vm2710_vm9, %v2707_v16, %v2709_v32 }
 0xe88   :  { %v2722_v22 = vadd.f32 %v2711_v46, %v2602_v42  ;;  %v2819_v34 = vpop.permute.xlu1 %2818 }
 0xe89   :  { %v2826_v47 = vsel %vm2824_vm11, %v2819_v34, %v2821_v41  ;;  %v2827_v49 = vsel %vm2824_vm11, %v8486_v19, %v2819_v34 }
 0xe8a   :  { %v2836_v62 = vadd.f32 %v2825_v36, %v2722_v22 }
 0xe8c   :  { %v2949_v28 = vadd.f32 %v2938_v11, %v2836_v62 }
 0xe8e   :  { %v2961_v63 = vadd.f32 %v8484_v26, %v2949_v28  ;;  %v2705_v32 = vpop.permute.xlu0 %2704 }
 0xe8f   :  { %v2712_v1 = vsel %vm2710_vm9, %v2705_v32, %v2707_v16  ;;  %v2713_v5 = vsel %vm2710_vm9, %v2703_v45, %v2705_v32  ;;  %vm9488_vm9 = vmmov %vm9482_vm12 }
 0xe90   :  { %v8550_v6 = vadd.f32 %v2961_v63, %v9475_v33  ;;  %v2720_v21 = vadd.f32 %v2713_v5, %v2600_v52  ;;  %v2721_v51 = vadd.f32 %v2712_v1, %v2601_v23  ;;  %vm9489_vm11 = vmmov %vm9488_vm9 }
 0xe92   :  { %v2834_v10 = vadd.f32 %v2827_v49, %v2720_v21  ;;  %v2835_v57 = vadd.f32 %v2826_v47, %v2721_v51  ;;  %v2977_v45 = vmul.f32 %v8550_v6, %v9477_v18 }
 0xe94   :  { %v2947_v48 = vadd.f32 %v2940_v40, %v2834_v10  ;;  %v2948_v39 = vadd.f32 %v2939_v35, %v2835_v57  ;;  %v5030_v29 = vpack.i.bf16 %v2977_v45, %v2974_v38 }
 0xe96   :  { %v2959_v14 = vadd.f32 %v8484_v26, %v2947_v48  ;;  %v2960_v19 = vadd.f32 %v8484_v26, %v2948_v39  ;;  %5031 = vrot.lane.b32.xlu1 %v5030_v29, %s5362_s10 }
 0xe98   :  { %v8569_v2 = vadd.f32 %v2959_v14, %v9478_v0  ;;  %v8572_v37 = vadd.f32 %v2960_v19, %v9479_v30 }
 0xe9a   :  { %v2975_v25 = vmul.f32 %v8569_v2, %v9480_v9  ;;  %v2976_v50 = vmul.f32 %v8572_v37, %v9481_v15 }
 0xe9c   :  { %v5035_v3 = vpack.i.bf16 %v2975_v25, %v2976_v50 }
 0xe9e   :  { %5036 = vrot.lane.b32.xlu2 %v5035_v3, %s5362_s10 }
 0xef6   :  { %v5027_v20 = vpop.permute.xlu0 %5026 }
 0xef7   :  { %v5029_v43 = vunpack.i.h.bf16 %v5027_v20  ;;  %v5028_v26 = vunpack.i.l.bf16 %v5027_v20 }
 0xef8   :  { %v5037_v12 = vpop.permute.xlu2 %5036 }
 0xef9   :  { %v8581_v60 = vsel %vm107_vm0, %v5028_v26, %v5029_v43  ;;  %v5038_v41 = vunpack.i.l.bf16 %v5037_v12  ;;  %v5039_v16 = vunpack.i.h.bf16 %v5037_v12 }
 0xefb   :  { %v8617_v22 = vsel %vm107_vm0, %v5039_v16, %v5038_v41 }
 0xf08   :  { %v5032_v44 = vpop.permute.xlu1 %5031 }
 0xf09   :  { %v5033_v53 = vunpack.i.l.bf16 %v5032_v44  ;;  %v5034_v58 = vunpack.i.h.bf16 %v5032_v44 }
 0xf0b   :  { %v8585_v59 = vsel %vm107_vm0, %v5029_v43, %v5033_v53  ;;  %v8594_v42 = vsel %vm107_vm0, %v5038_v41, %v5034_v58  ;;  %v8598_v17 = vsel %vm107_vm0, %v5034_v58, %v5028_v26  ;;  %v8613_v46 = vsel %vm107_vm0, %v5033_v53, %v5039_v16 }
 0xf0c   :  { %v5050_v4 = vpack.i.bf16 %v8585_v59, %v8581_v60  ;;  %v5065_v31 = vpack.i.bf16 %v8594_v42, %v8598_v17  ;;  %v5105_v36 = vpack.i.bf16 %v8617_v22, %v8613_v46 }
 0xf0e   :  { %5051 = vrot.lane.b32.xlu2 %v5050_v4, %s5366_s14  ;;  %5046 = vrot.lane.b32.xlu1 %v5050_v4, %s5363_s11 }
 0xf0f   :  { %5041 = vrot.lane.b32.xlu0 %v5050_v4, %s5364_s12 }
 0xf16   :  { %5066 = vrot.lane.b32.xlu2 %v5065_v31, %s5364_s12  ;;  %5061 = vrot.lane.b32.xlu1 %v5050_v4, %s5367_s15 }
 0xf17   :  { %5056 = vrot.lane.b32.xlu0 %v5050_v4, %s5365_s13 }
 0xf1e   :  { %5081 = vrot.lane.b32.xlu2 %v5065_v31, %s5363_s11  ;;  %5076 = vrot.lane.b32.xlu1 %v5050_v4, %s5368_s16 }
 0xf1f   :  { %5071 = vrot.lane.b32.xlu0 %v5050_v4, %s5369_s17 }
 0xf26   :  { %5096 = vrot.lane.b32.xlu2 %v5065_v31, %s5365_s13  ;;  %5091 = vrot.lane.b32.xlu1 %v5050_v4, %s5370_s18 }
 0xf27   :  { %5086 = vrot.lane.b32.xlu0 %v5065_v31, %s5366_s14 }
 0xf2e   :  { %5111 = vrot.lane.b32.xlu2 %v5065_v31, %s5369_s17  ;;  %5106 = vrot.lane.b32.xlu1 %v5105_v36, %s5364_s12 }
 0xf2f   :  { %5101 = vrot.lane.b32.xlu0 %v5065_v31, %s5367_s15 }
 0xf36   :  { %5126 = vrot.lane.b32.xlu2 %v5105_v36, %s5363_s11  ;;  %5121 = vrot.lane.b32.xlu1 %v5065_v31, %s5370_s18 }
 0xf37   :  { %5116 = vrot.lane.b32.xlu0 %v5065_v31, %s5368_s16 }
 0xf3e   :  { %5141 = vrot.lane.b32.xlu2 %v5105_v36, %s5367_s15  ;;  %5136 = vrot.lane.b32.xlu1 %v5105_v36, %s5365_s13 }
 0xf3f   :  { %5131 = vrot.lane.b32.xlu0 %v5105_v36, %s5366_s14 }
 0xf46   :  { %3002 = vrot.lane.b32.xlu2 %v8613_v46, %s5370_s18  ;;  %3038 = vrot.lane.b32.xlu1 %v8613_v46, %s5368_s16 }
 0xf47   :  { %5146 = vrot.lane.b32.xlu0 %v5105_v36, %s5369_s17 }
 0xf4e   :  { %3172 = vperm.xlu2 %4243, %v3922_v56   ;;  %3004 = vrot.lane.b32.xlu1 %v8617_v22, %s5370_s18 }
 0xf4f   :  { %3040 = vrot.lane.b32.xlu0 %v8617_v22, %s5368_s16 }
 0xf68   :  { %v8642_v62 = vpop.permute.xlu2 %5051 }
 0xf69   :  { %v5054_v33 = vunpack.i.h.bf16 %v8642_v62  ;;  %v5053_v21 = vunpack.i.l.bf16 %v8642_v62 }
 0xf6b   :  { %v3119_v39 = vsel %vm240_vm4, %v5053_v21, %v5054_v33 }
 0xf70   :  { %v8644_v11 = vpop.permute.xlu2 %5066 }
 0xf71   :  { %v5068_v23 = vunpack.i.l.bf16 %v8644_v11  ;;  %v5069_v12 = vunpack.i.h.bf16 %v8644_v11 }
 0xf73   :  { %v3139_v31 = vsel %vm259_vm1, %v5069_v12, %v5068_v23 }
 0xf78   :  { %v8669_v57 = vpop.permute.xlu2 %5081 }
 0xf80   :  { %v8646_v28 = vpop.permute.xlu1 %5046  ;;  %v8697_v26 = vpop.permute.xlu2 %5096 }
 0xf81   :  { %v8648_v52 = vpop.permute.xlu0 %5041  ;;  %v5049_v32 = vunpack.i.h.bf16 %v8646_v28  ;;  %v5048_v1 = vunpack.i.l.bf16 %v8646_v28 }
 0xf82   :  { %v5044_v63 = vunpack.i.h.bf16 %v8648_v52  ;;  %v5043_v34 = vunpack.i.l.bf16 %v8648_v52 }
 0xf83   :  { %v3101_v10 = vsel %vm221_vm3, %v5048_v1, %v5049_v32 }
 0xf84   :  { %v3138_v5 = vsel %vm259_vm1, %v5068_v23, %v5043_v34  ;;  %v3137_v61 = vsel %vm259_vm1, %v5043_v34, %v5044_v63  ;;  %v3159_v19 = vpack.c.bf16 %v3119_v39, %v3101_v10 }
 0xf85   :  { %v3164_v51 = vpack.c.bf16 %v3138_v5, %v3138_v5  ;;  %v3165_v47 = vpack.c.bf16 %v3137_v61, %v3137_v61  ;;  %v5083_v5 = vunpack.i.l.bf16 %v8669_v57 }
 0xf87   :  { %v3179_v49 = vsel %vm305_vm2, %v3164_v51, 0  ;;  %v3182_v38 = vsel %vm305_vm2, %v3165_v47, 0  ;;  %v3169_v47 = vpack.c.bf16 %v3139_v31, %v3139_v31  ;;  %v3102_v10 = vsel %vm221_vm3, %v5083_v5, %v5048_v1 }
 0xf88   :  { %3199 = vmatpush.bf16.msra.mxu2 %v3179_v49  ;;  %3212 = vmatpush.bf16.msra.mxu3 %v3182_v38  ;;  %v8671_v45 = vpop.permute.xlu1 %5061  ;;  %v5084_v49 = vunpack.i.h.bf16 %v8669_v57  ;;  %v8734_v38 = vpop.permute.xlu2 %5111  ;;  %v5099_v1 = vunpack.i.h.bf16 %v8697_v26 }
 0xf89   :  { %v5064_v35 = vunpack.i.h.bf16 %v8671_v45  ;;  %v5063_v40 = vunpack.i.l.bf16 %v8671_v45  ;;  %v8675_v48 = vpop.permute.xlu0 %5056 }
 0xf8a   :  { %v5059_v29 = vunpack.i.h.bf16 %v8675_v48  ;;  %v5058_v14 = vunpack.i.l.bf16 %v8675_v48 }
 0xf8b   :  { %v3083_v0 = vsel %vm202_vm6, %v5063_v40, %v5064_v35 }
 0xf8c   :  { %3213 = vmatpush.bf16.msra.mxu3 %v3159_v19  ;;  %v3065_v30 = vsel %vm183_vm5, %v5058_v14, %v5059_v29 }
 0xf8d   :  { %v3153_v25 = vpack.c.bf16 %v3083_v0, %v3065_v30  ;;  %v3194_v30 = vsel %vm305_vm2, %v3169_v47, 0 }
 0xf90   :  { %3214 = vmatpush.bf16.msra.mxu3 %v3153_v25  ;;  %v8691_v50 = vpop.permute.xlu1 %5076  ;;  %v8745_v25 = vld [vmem:[%s9311_s1 + $0x1c] sm:$0xf] }
 0xf91   :  { %v5079_v3 = vunpack.i.h.bf16 %v8691_v50  ;;  %v5078_v20 = vunpack.i.l.bf16 %v8691_v50  ;;  %v8695_v43 = vpop.permute.xlu0 %5071 }
 0xf92   :  { %v5074_v44 = vunpack.i.h.bf16 %v8695_v43  ;;  %v5073_v53 = vunpack.i.l.bf16 %v8695_v43 }
 0xf93   :  { %v3047_v4 = vsel %vm164_vm7, %v5078_v20, %v5079_v3 }
 0xf94   :  { %v3029_v58 = vsel %vm145_vm8, %v5073_v53, %v5074_v44 }
 0xf95   :  { %v3147_v41 = vpack.c.bf16 %v3047_v4, %v3029_v58  ;;  %v3103_v58 = vsel %vm221_vm3, %v5084_v49, %v5083_v5 }
 0xf97   :  { %3215 = vmatpush.bf16.msra.mxu3 %v3147_v41 }
 0xf98   :  { %v8718_v16 = vpop.permute.xlu1 %5091 }
 0xf99   :  { %v9398_v36 = vunpack.i.h.bf16 %v8718_v16  ;;  %v5093_v56 = vunpack.i.l.bf16 %v8718_v16  ;;  %v8722_v34 = vpop.permute.xlu0 %5086 }
 0xf9a   :  { %v5089_v61 = vunpack.i.h.bf16 %v8722_v34  ;;  %v5088_v51 = vunpack.i.l.bf16 %v8722_v34 }
 0xf9b   :  { %v3011_v23 = vsel %vm9482_vm12, %v5093_v56, %v9398_v36  ;;  %v5114_v36 = vunpack.i.h.bf16 %v8734_v38 }
 0xf9c   :  { %v3120_v39 = vsel %vm240_vm4, %v5088_v51, %v5053_v21  ;;  %v3141_v19 = vpack.c.bf16 %v3011_v23, %v8581_v60  ;;  %v3121_v4 = vsel %vm240_vm4, %v5089_v61, %v5088_v51  ;;  %v5098_v21 = vunpack.i.l.bf16 %v8697_v26 }
 0xf9d   :  { %v3158_v0 = vpack.c.bf16 %v3120_v39, %v3102_v10  ;;  %v3163_v51 = vpack.c.bf16 %v3121_v4, %v3103_v58  ;;  %v5127_v58 = vpop.permute.xlu2 %5126 }
 0xf9e   :  { %3216 = vmatpush.bf16.msra.mxu3 %v3141_v19  ;;  %v3066_v39 = vsel %vm183_vm5, %v5098_v21, %v5058_v14 }
 0xf9f   :  { %3200 = vmatpush.bf16.msra.mxu2 %v3158_v0  ;;  %v3067_v0 = vsel %vm183_vm5, %v5099_v1, %v5098_v21  ;;  %v5113_v21 = vunpack.i.l.bf16 %v8734_v38 }
 0xfa0   :  { %v5107_v60 = vpop.permute.xlu1 %5106 }
 0xfa1   :  { %v5109_v41 = vunpack.i.h.bf16 %v5107_v60  ;;  %v5108_v31 = vunpack.i.l.bf16 %v5107_v60  ;;  %v8757_v47 = vpop.permute.xlu0 %5101  ;;  %3924 = vmatmul.msk.bf16.vlgmr.msra.gmra.mxu3 %vm301_vm10, %v8745_v25 }
 0xfa2   :  { %3264 = vmatpush.bf16.msrb.mxu3 %v3194_v30  ;;  %v5104_v23 = vunpack.i.h.bf16 %v8757_v47  ;;  %v5103_v10 = vunpack.i.l.bf16 %v8757_v47 }
 0xfa3   :  { %v3136_v5 = vsel %vm259_vm1, %v5044_v63, %v5108_v31  ;;  %v3135_v19 = vsel %vm259_vm1, %v5108_v31, %v5109_v41 }
 0xfa4   :  { %v3084_v30 = vsel %vm202_vm6, %v5103_v10, %v5063_v40  ;;  %v3166_v4 = vpack.c.bf16 %v3136_v5, %v3136_v5  ;;  %v3167_v60 = vpack.c.bf16 %v3135_v19, %v3135_v19  ;;  %v3085_v52 = vsel %vm202_vm6, %v5104_v23, %v5103_v10 }
 0xfa5   :  { %v3152_v14 = vpack.c.bf16 %v3084_v30, %v3066_v39  ;;  %v3157_v63 = vpack.c.bf16 %v3085_v52, %v3067_v0  ;;  %v3031_v30 = vsel %vm145_vm8, %v5114_v36, %v5113_v21 }
 0xfa6   :  { %3265 = vmatpush.bf16.msrb.mxu3 %v3163_v51  ;;  %v3185_v31 = vsel %vm305_vm2, %v3166_v4, 0  ;;  %v3188_v51 = vsel %vm305_vm2, %v3167_v60, 0  ;;  %v3030_v4 = vsel %vm145_vm8, %v5113_v21, %v5073_v53  ;;  %v5129_v21 = vunpack.i.h.bf16 %v5127_v58 }
 0xfa7   :  { %3201 = vmatpush.bf16.msra.mxu2 %v3152_v14  ;;  %3225 = vmatpush.bf16.msrb.mxu0 %v3185_v31  ;;  %v3134_v14 = vsel %vm259_vm1, %v5109_v41, %v5069_v12 }
 0xfa8   :  { %3238 = vmatpush.bf16.msrb.mxu1 %v3188_v51  ;;  %v8785_v40 = vpop.permute.xlu1 %5121  ;;  %v3168_v11 = vpack.c.bf16 %v3134_v14, %v3134_v14 }
 0xfa9   :  { %v8787_v5 = vpop.permute.xlu0 %5116  ;;  %v5124_v10 = vunpack.i.h.bf16 %v8785_v40  ;;  %v5123_v39 = vunpack.i.l.bf16 %v8785_v40 }
 0xfaa   :  { %3266 = vmatpush.bf16.msrb.mxu3 %v3157_v63  ;;  %v9399_v19 = vunpack.i.h.bf16 %v8787_v5  ;;  %v5118_v0 = vunpack.i.l.bf16 %v8787_v5  ;;  %v5128_v63 = vunpack.i.l.bf16 %v5127_v58  ;;  %v3191_v14 = vsel %vm305_vm2, %v3168_v11, 0 }
 0xfab   :  { %v3012_v53 = vsel %vm9483_vm13, %v5123_v39, %v5093_v56 }
 0xfac   :  { %v3048_v60 = vsel %vm164_vm7, %v5118_v0, %v5078_v20  ;;  %v3049_v52 = vsel %vm164_vm7, %v9399_v19, %v5118_v0  ;;  %v3013_v20 = vsel %vm9484_vm14, %v5124_v10, %v5123_v39  ;;  %v5142_v0 = vpop.permute.xlu2 %5141  ;;  %v3140_v41 = vpack.c.bf16 %v3012_v53, %v8598_v17 }
 0xfad   :  { %v3146_v31 = vpack.c.bf16 %v3048_v60, %v3030_v4  ;;  %v3151_v51 = vpack.c.bf16 %v3049_v52, %v3031_v30  ;;  %v3145_v30 = vpack.c.bf16 %v3013_v20, %v8594_v42  ;;  %v3100_v56 = vsel %vm221_vm3, %v5049_v32, %v5128_v63 }
 0xfae   :  { %v5144_v58 = vunpack.i.h.bf16 %v5142_v0  ;;  %v3098_v42 = vsel %vm221_vm3, %v5129_v21, %v5084_v49  ;;  %v5143_v17 = vunpack.i.l.bf16 %v5142_v0  ;;  %v9485_v0 = vunpack.i.h.bf16 %v8718_v16 }
 0xfaf   :  { %3202 = vmatpush.bf16.msra.mxu2 %v3146_v31  ;;  %3267 = vmatpush.bf16.msrb.mxu3 %v3151_v51  ;;  %v3099_v31 = vsel %vm221_vm3, %v5128_v63, %v5129_v21 }
 0xfb0   :  { %v5137_v19 = vpop.permute.xlu1 %5136  ;;  %v3082_v48 = vsel %vm202_vm6, %v5064_v35, %v5143_v17  ;;  %v3080_v26 = vsel %vm202_vm6, %v5144_v58, %v5104_v23 }
 0xfb1   :  { %v5132_v12 = vpop.permute.xlu0 %5131  ;;  %v5139_v4 = vunpack.i.h.bf16 %v5137_v19  ;;  %v5138_v60 = vunpack.i.l.bf16 %v5137_v19 }
 0xfb2   :  { %v5134_v52 = vunpack.i.h.bf16 %v5132_v12  ;;  %v5133_v39 = vunpack.i.l.bf16 %v5132_v12 }
 0xfb3   :  { %3203 = vmatpush.bf16.msra.mxu2 %v3140_v41  ;;  %3268 = vmatpush.bf16.msrb.mxu3 %v3145_v30  ;;  %v3064_v62 = vsel %vm183_vm5, %v5059_v29, %v5138_v60  ;;  %v3062_v34 = vsel %vm183_vm5, %v5139_v4, %v5099_v1  ;;  %v3081_v29 = vsel %vm202_vm6, %v5143_v17, %v5144_v58 }
 0xfb4   :  { %v3118_v28 = vsel %vm240_vm4, %v5054_v33, %v5133_v39  ;;  %v3117_v32 = vsel %vm240_vm4, %v5133_v39, %v5134_v52  ;;  %v3116_v19 = vsel %vm240_vm4, %v5134_v52, %v5089_v61  ;;  %v3063_v33 = vsel %vm183_vm5, %v5138_v60, %v5139_v4  ;;  %v3003_v11 = vpop.permute.xlu2 %3002 }
 0xfb5   :  { %v3160_v63 = vpack.c.bf16 %v3118_v28, %v3100_v56  ;;  %v3161_v57 = vpack.c.bf16 %v3117_v32, %v3099_v31  ;;  %v3162_v51 = vpack.c.bf16 %v3116_v19, %v3098_v42  ;;  %v3154_v53 = vpack.c.bf16 %v3082_v48, %v3064_v62 }
 0xfb6   :  { %3923 = vmatmul.msk.bf16.vlgmr.msra.gmra.mxu2 %vm301_vm10, %v8745_v25  ;;  %3928 = vmatmul.msk.bf16.vlgmr.msrb.gmra.mxu3 %vm301_vm10, %v8745_v25  ;;  %v3155_v20 = vpack.c.bf16 %v3081_v29, %v3063_v33  ;;  %v3156_v1 = vpack.c.bf16 %v3080_v26, %v3062_v34  ;;  %v3010_v23 = vsel %vm9486_vm15, %v9485_v0, %v3003_v11 }
 0xfb7   :  { %3251 = vmatpush.bf16.msrb.mxu2 %v3191_v14  ;;  %3226 = vmatpush.bf16.msrb.mxu0 %v3160_v63  ;;  %v3142_v41 = vpack.c.bf16 %v3010_v23, %v8585_v59 }
 0xfb8   :  { %3239 = vmatpush.bf16.msrb.mxu1 %v3161_v57  ;;  %v3039_v61 = vpop.permute.xlu1 %3038 }
 0xfb9   :  { %v5147_v49 = vpop.permute.xlu0 %5146  ;;  %v3046_v45 = vsel %vm164_vm7, %v5079_v3, %v3039_v61 }
 0xfba   :  { %v5148_v21 = vunpack.i.l.bf16 %v5147_v49  ;;  %v5149_v12 = vunpack.i.h.bf16 %v5147_v49 }
 0xfbb   :  { %3252 = vmatpush.bf16.msrb.mxu2 %v3162_v51  ;;  %3227 = vmatpush.bf16.msrb.mxu0 %v3154_v53 }
 0xfbc   :  { %3240 = vmatpush.bf16.msrb.mxu1 %v3155_v20  ;;  %v3028_v35 = vsel %vm145_vm8, %v5074_v44, %v5148_v21  ;;  %v3026_v3 = vsel %vm145_vm8, %v5149_v12, %v5114_v36  ;;  %v3027_v43 = vsel %vm145_vm8, %v5148_v21, %v5149_v12  ;;  %v9487_v44 = vunpack.i.h.bf16 %v8787_v5  ;;  %v3173_v52 = vpop.permute.xlu2 %3172 }
 0xfbd   :  { %v3148_v47 = vpack.c.bf16 %v3046_v45, %v3028_v35 }
 0xfbf   :  { %3253 = vmatpush.bf16.msrb.mxu2 %v3156_v1  ;;  %3228 = vmatpush.bf16.msrb.mxu0 %v3148_v47 }
 0xfc0   :  { %v3005_v50 = vpop.permute.xlu1 %3004 }
 0xfc1   :  { %v3041_v30 = vpop.permute.xlu0 %3040  ;;  %v3008_v38 = vsel %vm9488_vm9, %v3005_v50, %v5124_v10  ;;  %v3009_v36 = vsel %vm9489_vm11, %v3003_v11, %v3005_v50 }
 0xfc2   :  { %v3044_v16 = vsel %vm164_vm7, %v3041_v30, %v9487_v44  ;;  %v3045_v56 = vsel %vm164_vm7, %v3039_v61, %v3041_v30  ;;  %v3143_v5 = vpack.c.bf16 %v3009_v36, %v8613_v46  ;;  %v3144_v60 = vpack.c.bf16 %v3008_v38, %v8617_v22  ;;  %v3930_v38 = vld [vmem:[%s9312_s2 + $0x40] sm:$0xff] }
 0xfc3   :  { %v3149_v4 = vpack.c.bf16 %v3045_v56, %v3027_v43  ;;  %v3150_v59 = vpack.c.bf16 %v3044_v16, %v3026_v3  ;;  %3229 = vmatpush.bf16.msrb.mxu0 %v3142_v41 }
 0xfc5   :  { %3241 = vmatpush.bf16.msrb.mxu1 %v3149_v4  ;;  %3254 = vmatpush.bf16.msrb.mxu2 %v3150_v59  ;;  %v3599_v59 = vld [vmem:[%s9316_s6] sm:$0xff] }
 0xfc6   :  { %3925 = vmatmul.msk.bf16.vlgmr.msrb.gmra.mxu0 %vm301_vm10, %v8745_v25 }
 0xfc9   :  { %3242 = vmatpush.bf16.msrb.mxu1 %v3143_v5  ;;  %3255 = vmatpush.bf16.msrb.mxu2 %v3144_v60 }
 0xfcc   :  { %3926 = vmatmul.msk.bf16.vlgmr.msrb.gmra.mxu1 %vm301_vm10, %v8745_v25  ;;  %3927 = vmatmul.msk.bf16.vlgmr.msrb.gmra.mxu2 %vm301_vm10, %v8745_v25 }
0x1024   :  { %v3218_v40 = vpop.f32.mrf.mxu3 }
0x1025   :  { %v3219_v39 = vadd.f32 %v3218_v40, %v3173_v52 }
0x1027   :  { %v3275_v31 = vmax.f32 %v3219_v39, 0.0 }
0x1029   :  { %v3285_v46 = vmul.f32 %v3275_v31, %v5455_v8 }
0x102c   :  { %v3220_v10 = vpop.f32.mrf.mxu3 }
0x1039   :  { %v3205_v58 = vpop.f32.mrf.mxu2  ;;  %v3270_v14 = vpop.f32.mrf.mxu3 }
0x103a   :  { %v3206_v42 = vadd.f32 %v3205_v58, %v3173_v52  ;;  %v3271_v32 = vadd.f32 %v3270_v14, %v3173_v52 }
0x103c   :  { %v3274_v17 = vmax.f32 %v3206_v42, 0.0  ;;  %v3279_v57 = vmax.f32 %v3271_v32, 0.0 }
0x103e   :  { %v3284_v22 = vmul.f32 %v3274_v17, %v5453_v7  ;;  %v3289_v33 = vmul.f32 %v3279_v57, %v9477_v18 }
0x1040   :  { %v5150_v28 = vpack.i.bf16 %v3285_v46, %v3284_v22 }
0x1041   :  { %v3207_v19 = vpop.f32.mrf.mxu2  ;;  %v3272_v63 = vpop.f32.mrf.mxu3 }
0x1042   :  { %5151 = vrot.lane.b32.xlu0 %v5150_v28, %s5362_s10 }
0x1043   :  { %v3231_v25 = vpop.f32.mrf.mxu0 }
0x1044   :  { %v3232_v51 = vadd.f32 %v3231_v25, %v3173_v52 }
0x1046   :  { %v3276_v62 = vmax.f32 %v3232_v51, 0.0 }
0x1048   :  { %v3286_v34 = vmul.f32 %v3276_v62, %v9476_v55 }
0x1049   :  { %v3244_v61 = vpop.f32.mrf.mxu1 }
0x104a   :  { %v5155_v48 = vpack.i.bf16 %v3289_v33, %v3286_v34  ;;  %v3245_v8 = vadd.f32 %v3244_v61, %v3173_v52 }
0x104b   :  { %v3233_v29 = vpop.f32.mrf.mxu0 }
0x104c   :  { %5156 = vrot.lane.b32.xlu1 %v5155_v48, %s5362_s10  ;;  %v3277_v49 = vmax.f32 %v3245_v8, 0.0 }
0x104e   :  { %v3287_v21 = vmul.f32 %v3277_v49, %v9480_v9 }
0x104f   :  { %v3257_v7 = vpop.f32.mrf.mxu2 }
0x1050   :  { %v3258_v53 = vadd.f32 %v3257_v7, %v3173_v52 }
0x1051   :  { %v3246_v20 = vpop.f32.mrf.mxu1 }
0x1052   :  { %v3278_v26 = vmax.f32 %v3258_v53, 0.0 }
0x1054   :  { %v3288_v1 = vmul.f32 %v3278_v26, %v9481_v15 }
0x1056   :  { %v5160_v11 = vpack.i.bf16 %v3288_v1, %v3287_v21 }
0x1057   :  { %v3259_v45 = vpop.f32.mrf.mxu2 }
0x1058   :  { %5161 = vrot.lane.b32.xlu2 %v5160_v11, %s5362_s10 }
0x10b2   :  { %v5162_v55 = vpop.permute.xlu2 %5161 }
0x10b3   :  { %v5163_v47 = vunpack.i.l.bf16 %v5162_v55  ;;  %v5164_v44 = vunpack.i.h.bf16 %v5162_v55 }
0x10b4   :  { %v5152_v18 = vpop.permute.xlu0 %5151 }
0x10b5   :  { %v5154_v0 = vunpack.i.h.bf16 %v5152_v18  ;;  %v5153_v50 = vunpack.i.l.bf16 %v5152_v18  ;;  %v8951_v56 = vsel %vm107_vm0, %v5163_v47, %v5164_v44 }
0x10b7   :  { %v8938_v3 = vsel %vm107_vm0, %v5153_v50, %v5154_v0 }
0x10be   :  { %v5157_v35 = vpop.permute.xlu1 %5156 }
0x10bf   :  { %v5158_v23 = vunpack.i.l.bf16 %v5157_v35  ;;  %v5159_v15 = vunpack.i.h.bf16 %v5157_v35 }
0x10c1   :  { %v8918_v12 = vsel %vm107_vm0, %v5158_v23, %v5163_v47  ;;  %v8922_v41 = vsel %vm107_vm0, %v5154_v0, %v5158_v23  ;;  %v8934_v30 = vsel %vm107_vm0, %v5159_v15, %v5153_v50  ;;  %v8947_v16 = vsel %vm107_vm0, %v5164_v44, %v5159_v15  ;;  %vm9490_vm0 = vmmov %vm9488_vm9 }
0x10c2   :  { %v5175_v9 = vpack.i.bf16 %v8918_v12, %v8922_v41  ;;  %v5210_v43 = vpack.i.bf16 %v8938_v3, %v8934_v30  ;;  %v5230_v4 = vpack.i.bf16 %v8947_v16, %v8951_v56  ;;  %vm9491_vm12 = vmmov %vm9490_vm0 }
0x10c3   :  { %vm9493_vm13 = vmmov %vm9490_vm0 }
0x10c4   :  { %5176 = vrot.lane.b32.xlu2 %v5175_v9, %s5366_s14  ;;  %5171 = vrot.lane.b32.xlu0 %v5175_v9, %s5363_s11 }
0x10c5   :  { %5166 = vrot.lane.b32.xlu1 %v5175_v9, %s5364_s12 }
0x10cc   :  { %5196 = vrot.lane.b32.xlu2 %v5175_v9, %s5368_s16  ;;  %5186 = vrot.lane.b32.xlu0 %v5175_v9, %s5367_s15 }
0x10cd   :  { %5181 = vrot.lane.b32.xlu1 %v5175_v9, %s5365_s13 }
0x10d4   :  { %5191 = vrot.lane.b32.xlu0 %v5175_v9, %s5369_s17  ;;  %5211 = vrot.lane.b32.xlu2 %v5210_v43, %s5363_s11 }
0x10d5   :  { %5216 = vrot.lane.b32.xlu1 %v5210_v43, %s5366_s14 }
0x10dc   :  { %5201 = vrot.lane.b32.xlu0 %v5175_v9, %s5370_s18  ;;  %5226 = vrot.lane.b32.xlu2 %v5210_v43, %s5367_s15 }
0x10dd   :  { %5231 = vrot.lane.b32.xlu1 %v5230_v4, %s5364_s12 }
0x10e4   :  { %5236 = vrot.lane.b32.xlu2 %v5210_v43, %s5369_s17  ;;  %5206 = vrot.lane.b32.xlu0 %v5210_v43, %s5364_s12 }
0x10e5   :  { %5241 = vrot.lane.b32.xlu1 %v5210_v43, %s5368_s16 }
0x10ec   :  { %5246 = vrot.lane.b32.xlu2 %v5210_v43, %s5370_s18  ;;  %5221 = vrot.lane.b32.xlu0 %v5210_v43, %s5365_s13  ;;  %v9089_v43 = vld [vmem:[%s9311_s1 + $0x20] sm:$0xf] }
0x10ed   :  { %3424 = vrot.lane.b32.xlu1 %v8951_v56, %s5366_s14 }
0x10f4   :  { %3388 = vrot.lane.b32.xlu2 %v8951_v56, %s5367_s15  ;;  %3406 = vrot.lane.b32.xlu0 %v8951_v56, %s5363_s11 }
0x10f5   :  { %3370 = vrot.lane.b32.xlu1 %v8951_v56, %s5365_s13 }
0x10fc   :  { %3316 = vrot.lane.b32.xlu2 %v8951_v56, %s5370_s18  ;;  %3334 = vrot.lane.b32.xlu0 %v8951_v56, %s5369_s17 }
0x10fd   :  { %3352 = vrot.lane.b32.xlu1 %v8951_v56, %s5368_s16 }
0x1104   :  { %3372 = vrot.lane.b32.xlu2 %v8947_v16, %s5365_s13  ;;  %3408 = vrot.lane.b32.xlu0 %v8947_v16, %s5363_s11 }
0x1105   :  { %3426 = vrot.lane.b32.xlu1 %v8947_v16, %s5366_s14 }
0x110c   :  { %3354 = vrot.lane.b32.xlu2 %v8947_v16, %s5368_s16  ;;  %3390 = vrot.lane.b32.xlu0 %v8947_v16, %s5367_s15 }
0x110d   :  { %3336 = vrot.lane.b32.xlu1 %v8947_v16, %s5369_s17  ;;  %s3832_s17 = sshll.u32 %s9319_s9, 4  ;;  %s3833_s17 = int_to_ptr.hbm [resolvable:$true] %s3832_s17 }
0x1114   :  { %3602 = vperm.xlu2 %4243, %v3599_v59   ;;  %3318 = vrot.lane.b32.xlu0 %v8947_v16, %s5370_s18 }
0x1115   :  { %3484 = vperm.xlu1 %4514, %v3930_v38  }
0x111e   :  { %v8997_v36 = vpop.permute.xlu2 %5176 }
0x111f   :  { %v5179_v42 = vunpack.i.h.bf16 %v8997_v36  ;;  %v5178_v17 = vunpack.i.l.bf16 %v8997_v36 }
0x1121   :  { %v3430_v57 = vsel %vm240_vm4, %v5178_v17, %v5179_v42 }
0x1126   :  { %v8999_v5 = vpop.permute.xlu2 %5196 }
0x1127   :  { %v5199_v8 = vunpack.i.h.bf16 %v8999_v5  ;;  %v5198_v7 = vunpack.i.l.bf16 %v8999_v5 }
0x1129   :  { %v3358_v1 = vsel %vm164_vm7, %v5198_v7, %v5199_v8 }
0x112e   :  { %v9005_v14 = vpop.permute.xlu2 %5211 }
0x1136   :  { %v9001_v60 = vpop.permute.xlu0 %5171  ;;  %v9044_v29 = vpop.permute.xlu2 %5226 }
0x1137   :  { %v5167_v40 = vpop.permute.xlu1 %5166  ;;  %v5174_v39 = vunpack.i.h.bf16 %v9001_v60  ;;  %v5173_v58 = vunpack.i.l.bf16 %v9001_v60 }
0x1138   :  { %v5169_v10 = vunpack.i.h.bf16 %v5167_v40  ;;  %v5168_v52 = vunpack.i.l.bf16 %v5167_v40 }
0x1139   :  { %v3412_v28 = vsel %vm221_vm3, %v5173_v58, %v5174_v39 }
0x113a   :  { %v3448_v31 = vsel %vm259_vm1, %v5168_v52, %v5169_v10  ;;  %v3472_v33 = vpack.c.bf16 %v3430_v57, %v3412_v28  ;;  %v5214_v28 = vunpack.i.h.bf16 %v9005_v14  ;;  %v5213_v57 = vunpack.i.l.bf16 %v9005_v14 }
0x113b   :  { %v3478_v46 = vpack.c.bf16 %v3448_v31, %v3448_v31 }
0x113d   :  { %v3497_v22 = vsel %vm305_vm2, %v3478_v46, 0 }
0x113e   :  { %3537 = vmatpush.bf16.msra.mxu2 %v3497_v22  ;;  %v9018_v32 = vpop.permute.xlu0 %5186  ;;  %v9066_v45 = vpop.permute.xlu2 %5236 }
0x113f   :  { %v5189_v19 = vunpack.i.h.bf16 %v9018_v32  ;;  %v5188_v63 = vunpack.i.l.bf16 %v9018_v32  ;;  %v9022_v25 = vpop.permute.xlu1 %5181 }
0x1140   :  { %v5184_v51 = vunpack.i.h.bf16 %v9022_v25  ;;  %v5183_v62 = vunpack.i.l.bf16 %v9022_v25 }
0x1141   :  { %v3394_v34 = vsel %vm202_vm6, %v5188_v63, %v5189_v19 }
0x1142   :  { %3538 = vmatpush.bf16.msra.mxu2 %v3472_v33  ;;  %v3376_v61 = vsel %vm183_vm5, %v5183_v62, %v5184_v51 }
0x1143   :  { %v3466_v48 = vpack.c.bf16 %v3394_v34, %v3376_v61  ;;  %v5229_v61 = vunpack.i.h.bf16 %v9044_v29 }
0x1146   :  { %3539 = vmatpush.bf16.msra.mxu2 %v3466_v48  ;;  %v9048_v49 = vpop.permute.xlu0 %5191  ;;  %v9098_v31 = vpop.permute.xlu2 %5246  ;;  %v5228_v48 = vunpack.i.l.bf16 %v9044_v29 }
0x1147   :  { %v5194_v53 = vunpack.i.h.bf16 %v9048_v49  ;;  %v5193_v20 = vunpack.i.l.bf16 %v9048_v49  ;;  %v9052_v26 = vpop.permute.xlu1 %5216 }
0x1148   :  { %v5219_v40 = vunpack.i.h.bf16 %v9052_v26 }
0x1149   :  { %v3340_v21 = vsel %vm145_vm8, %v5193_v20, %v5194_v53 }
0x114a   :  { %v3460_v11 = vpack.c.bf16 %v3358_v1, %v3340_v21 }
0x114c   :  { %3540 = vmatpush.bf16.msra.mxu2 %v3460_v11 }
0x114e   :  { %v9068_v55 = vpop.permute.xlu0 %5201 }
0x114f   :  { %v5204_v18 = vunpack.i.h.bf16 %v9068_v55  ;;  %v5203_v35 = vunpack.i.l.bf16 %v9068_v55  ;;  %v9072_v47 = vpop.permute.xlu1 %5231 }
0x1150   :  { %v5233_v0 = vunpack.i.l.bf16 %v9072_v47 }
0x1151   :  { %v3322_v23 = vsel %vm9490_vm0, %v5203_v35, %v5204_v18 }
0x1152   :  { %v3454_v9 = vpack.c.bf16 %v3322_v23, %v8922_v41  ;;  %v3447_v15 = vsel %vm259_vm1, %v5169_v10, %v5233_v0  ;;  %v5218_v10 = vunpack.i.l.bf16 %v9052_v26 }
0x1153   :  { %v3479_v50 = vpack.c.bf16 %v3447_v15, %v3447_v15  ;;  %v3413_v15 = vsel %vm221_vm3, %v5214_v28, %v5173_v58 }
0x1154   :  { %3541 = vmatpush.bf16.msra.mxu2 %v3454_v9  ;;  %v3432_v11 = vsel %vm240_vm4, %v5218_v10, %v5219_v40  ;;  %v3414_v9 = vsel %vm221_vm3, %v5213_v57, %v5214_v28 }
0x1155   :  { %v3500_v44 = vsel %vm305_vm2, %v3479_v50, 0 }
0x1156   :  { %3550 = vmatpush.bf16.msra.mxu3 %v3500_v44  ;;  %v5207_v4 = vpop.permute.xlu0 %5206 }
0x1157   :  { %v9092_v59 = vpop.permute.xlu1 %5241  ;;  %v5209_v38 = vunpack.i.h.bf16 %v5207_v4  ;;  %v5208_v41 = vunpack.i.l.bf16 %v5207_v4  ;;  %3933 = vmatmul.msk.bf16.vlgmr.msra.gmra.mxu2 %vm301_vm10, %v9089_v43  ;;  %v3470_v4 = vpack.c.bf16 %v3432_v11, %v3414_v9  ;;  %v9153_v11 = vpop.permute.xlu2 %3388 }
0x1159   :  { %v3450_v46 = vsel %vm259_vm1, %v5208_v41, %v5209_v38  ;;  %v3449_v22 = vsel %vm259_vm1, %v5209_v38, %v5168_v52  ;;  %v3431_v52 = vsel %vm240_vm4, %v5219_v40, %v5178_v17  ;;  %v5244_v40 = vunpack.i.h.bf16 %v9092_v59 }
0x115a   :  { %v3476_v33 = vpack.c.bf16 %v3450_v46, %v3450_v46  ;;  %v3477_v34 = vpack.c.bf16 %v3449_v22, %v3449_v22  ;;  %v3471_v38 = vpack.c.bf16 %v3431_v52, %v3413_v15  ;;  %v5243_v46 = vunpack.i.l.bf16 %v9092_v59 }
0x115b   :  { %v3396_v22 = vsel %vm202_vm6, %v5228_v48, %v5229_v61  ;;  %v5249_v15 = vunpack.i.h.bf16 %v9098_v31 }
0x115c   :  { %v3491_v21 = vsel %vm305_vm2, %v3476_v33, 0  ;;  %v3494_v1 = vsel %vm305_vm2, %v3477_v34, 0  ;;  %v5239_v33 = vunpack.i.h.bf16 %v9066_v45  ;;  %v3395_v34 = vsel %vm202_vm6, %v5229_v61, %v5188_v63 }
0x115d   :  { %3511 = vmatpush.bf16.msra.mxu0 %v3491_v21  ;;  %3524 = vmatpush.bf16.msra.mxu1 %v3494_v1  ;;  %v5238_v21 = vunpack.i.l.bf16 %v9066_v45  ;;  %v5234_v1 = vunpack.i.h.bf16 %v9072_v47  ;;  %v3359_v63 = vsel %vm164_vm7, %v5244_v40, %v5198_v7 }
0x115e   :  { %v9118_v23 = vpop.permute.xlu0 %5221 }
0x115f   :  { %v9128_v50 = vpop.permute.xlu1 %3424  ;;  %v5224_v44 = vunpack.i.h.bf16 %v9118_v23  ;;  %v5223_v17 = vunpack.i.l.bf16 %v9118_v23  ;;  %v3451_v7 = vsel %vm259_vm1, %v5234_v1, %v5208_v41  ;;  %v3393_v41 = vsel %vm202_vm6, %v5189_v19, %v9153_v11 }
0x1161   :  { %3512 = vmatpush.bf16.msra.mxu0 %v3470_v4  ;;  %3525 = vmatpush.bf16.msra.mxu1 %v3471_v38  ;;  %v3378_v58 = vsel %vm183_vm5, %v5223_v17, %v5224_v44  ;;  %v3377_v28 = vsel %vm183_vm5, %v5224_v44, %v5183_v62  ;;  %v5248_v4 = vunpack.i.l.bf16 %v9098_v31  ;;  %v3360_v62 = vsel %vm164_vm7, %v5243_v46, %v5244_v40 }
0x1162   :  { %v3464_v52 = vpack.c.bf16 %v3396_v22, %v3378_v58  ;;  %v3465_v9 = vpack.c.bf16 %v3395_v34, %v3377_v28  ;;  %v3342_v44 = vsel %vm145_vm8, %v5238_v21, %v5239_v33  ;;  %v3341_v38 = vsel %vm145_vm8, %v5239_v33, %v5193_v20 }
0x1163   :  { %v3446_v22 = vsel %vm259_vm1, %v5233_v0, %v5234_v1  ;;  %v3429_v40 = vsel %vm240_vm4, %v5179_v42, %v9128_v50  ;;  %v3458_v33 = vpack.c.bf16 %v3360_v62, %v3342_v44  ;;  %v3459_v47 = vpack.c.bf16 %v3359_v63, %v3341_v38  ;;  %vm9492_vm1 = vmmov %vm9490_vm0  ;;  %v3317_v1 = vpop.permute.xlu2 %3316 }
0x1164   :  { %v3324_v0 = vsel %vm9491_vm12, %v5248_v4, %v5249_v15  ;;  %v3323_v36 = vsel %vm9492_vm1, %v5249_v15, %v5203_v35  ;;  %v3481_v42 = vpack.c.bf16 %v3451_v7, %v3451_v7  ;;  %v3321_v19 = vsel %vm9493_vm13, %v5204_v18, %v3317_v1 }
0x1165   :  { %3513 = vmatpush.bf16.msra.mxu0 %v3464_v52  ;;  %3526 = vmatpush.bf16.msra.mxu1 %v3465_v9  ;;  %v3452_v34 = vpack.c.bf16 %v3324_v0, %v8934_v30  ;;  %v3453_v35 = vpack.c.bf16 %v3323_v36, %v8938_v3  ;;  %v3455_v49 = vpack.c.bf16 %v3321_v19, %v8918_v12 }
0x1166   :  { %v3407_v61 = vpop.permute.xlu0 %3406  ;;  %v3506_v9 = vsel %vm305_vm2, %v3481_v42, 0 }
0x1167   :  { %v3371_v58 = vpop.permute.xlu1 %3370  ;;  %v3411_v20 = vsel %vm221_vm3, %v5174_v39, %v3407_v61  ;;  %v3480_v39 = vpack.c.bf16 %v3446_v22, %v3446_v22 }
0x1168   :  { %v3473_v28 = vpack.c.bf16 %v3429_v40, %v3411_v20  ;;  %v3375_v60 = vsel %vm183_vm5, %v5184_v51, %v3371_v58 }
0x1169   :  { %3514 = vmatpush.bf16.msra.mxu0 %v3458_v33  ;;  %3527 = vmatpush.bf16.msra.mxu1 %v3459_v47  ;;  %v3467_v25 = vpack.c.bf16 %v3393_v41, %v3375_v60  ;;  %v3503_v51 = vsel %vm305_vm2, %v3480_v39, 0 }
0x116a   :  { %3551 = vmatpush.bf16.msra.mxu3 %v3473_v28 }
0x116d   :  { %3515 = vmatpush.bf16.msra.mxu0 %v3452_v34  ;;  %3528 = vmatpush.bf16.msra.mxu1 %v3453_v35 }
0x116e   :  { %3552 = vmatpush.bf16.msra.mxu3 %v3467_v25  ;;  %v3335_v52 = vpop.permute.xlu0 %3334 }
0x116f   :  { %v3353_v15 = vpop.permute.xlu1 %3352  ;;  %v3339_v32 = vsel %vm145_vm8, %v5194_v53, %v3335_v52  ;;  %v3373_v53 = vpop.permute.xlu2 %3372 }
0x1170   :  { %v3357_v30 = vsel %vm164_vm7, %v5199_v8, %v3353_v15  ;;  %3931 = vmatmul.msk.bf16.vlgmr.msra.gmra.mxu0 %vm301_vm10, %v9089_v43  ;;  %3932 = vmatmul.msk.bf16.vlgmr.msra.gmra.mxu1 %vm301_vm10, %v9089_v43  ;;  %v3379_v26 = vsel %vm183_vm5, %v3373_v53, %v5223_v17 }
0x1171   :  { %3563 = vmatpush.bf16.msrb.mxu0 %v3503_v51  ;;  %3576 = vmatpush.bf16.msrb.mxu1 %v3506_v9  ;;  %v3461_v3 = vpack.c.bf16 %v3357_v30, %v3339_v32 }
0x1173   :  { %3553 = vmatpush.bf16.msra.mxu3 %v3461_v3 }
0x1176   :  { %v3409_v5 = vpop.permute.xlu0 %3408 }
0x1177   :  { %v3427_v62 = vpop.permute.xlu1 %3426  ;;  %3554 = vmatpush.bf16.msra.mxu3 %v3455_v49  ;;  %v3410_v8 = vsel %vm221_vm3, %v3407_v61, %v3409_v5  ;;  %v3415_v63 = vsel %vm221_vm3, %v3409_v5, %v5213_v57  ;;  %v3374_v57 = vsel %vm183_vm5, %v3371_v58, %v3373_v53  ;;  %v3355_v38 = vpop.permute.xlu2 %3354  ;;  %vm9494_vm3 = vmmov %vm9490_vm0  ;;  %vm3605_vm5 = vcmask 64512  }
0x1178   :  { %v3428_v55 = vsel %vm240_vm4, %v9128_v50, %v3427_v62  ;;  %v3433_v12 = vsel %vm240_vm4, %v3427_v62, %v5218_v10  ;;  %v3361_v29 = vsel %vm164_vm7, %v3355_v38, %v5243_v46  ;;  %vm9495_vm4 = vmmov %vm9490_vm0 }
0x1179   :  { %v3474_v18 = vpack.c.bf16 %v3428_v55, %v3410_v8  ;;  %v3475_v44 = vpack.c.bf16 %v3433_v12, %v3415_v63 }
0x117a   :  { %3934 = vmatmul.msk.bf16.vlgmr.msra.gmra.mxu3 %vm301_vm10, %v9089_v43 }
0x117b   :  { %3564 = vmatpush.bf16.msrb.mxu0 %v3474_v18  ;;  %3577 = vmatpush.bf16.msrb.mxu1 %v3475_v44 }
0x117e   :  { %v3391_v14 = vpop.permute.xlu0 %3390 }
0x117f   :  { %v3337_v61 = vpop.permute.xlu1 %3336  ;;  %v3392_v10 = vsel %vm202_vm6, %v9153_v11, %v3391_v14  ;;  %v3397_v50 = vsel %vm202_vm6, %v3391_v14, %v5228_v48  ;;  %v3356_v48 = vsel %vm164_vm7, %v3353_v15, %v3355_v38  ;;  %v3603_v55 = vpop.permute.xlu2 %3602 }
0x1180   :  { %v3468_v22 = vpack.c.bf16 %v3392_v10, %v3374_v57  ;;  %v3469_v7 = vpack.c.bf16 %v3397_v50, %v3379_v26  ;;  %v3338_v40 = vsel %vm145_vm8, %v3335_v52, %v3337_v61  ;;  %v3343_v23 = vsel %vm145_vm8, %v3337_v61, %v5238_v21 }
0x1181   :  { %v3462_v17 = vpack.c.bf16 %v3356_v48, %v3338_v40  ;;  %v3463_v11 = vpack.c.bf16 %v3361_v29, %v3343_v23 }
0x1182   :  { %3565 = vmatpush.bf16.msrb.mxu0 %v3468_v22  ;;  %3578 = vmatpush.bf16.msrb.mxu1 %v3469_v7 }
0x1186   :  { %v3319_v58 = vpop.permute.xlu0 %3318  ;;  %3566 = vmatpush.bf16.msrb.mxu0 %v3462_v17  ;;  %3579 = vmatpush.bf16.msrb.mxu1 %v3463_v11 }
0x1187   :  { %v3320_v45 = vsel %vm9494_vm3, %v3317_v1, %v3319_v58  ;;  %v3325_v21 = vsel %vm9495_vm4, %v3319_v58, %v5248_v4  ;;  %v3485_v47 = vpop.permute.xlu1 %3484  ;;  %v3592_v1 = vld [vmem:[%s9315_s5] sm:$0xf]  ;;  %s5380_s5 = smov [#allocation7]  }
0x1188   :  { %v3456_v59 = vpack.c.bf16 %v3320_v45, %v8951_v56  ;;  %v3457_v46 = vpack.c.bf16 %v3325_v21, %v8947_v16  ;;  %s3830_s14 = sshll.u32 %s5380_s5, 4  ;;  %s3831_s14 = int_to_ptr.vmem [resolvable:$true] %s3830_s14 }
0x118a   :  { %3567 = vmatpush.bf16.msrb.mxu0 %v3456_v59  ;;  %3580 = vmatpush.bf16.msrb.mxu1 %v3457_v46 }
0x118d   :  { %3935 = vmatmul.msk.bf16.vlgmr.msrb.gmra.mxu0 %vm301_vm10, %v9089_v43  ;;  %3936 = vmatmul.msk.bf16.vlgmr.msrb.gmra.mxu1 %vm301_vm10, %v9089_v43 }
0x11da   :  { %v3543_v20 = vpop.f32.mrf.mxu2 }
0x11db   :  { %v3544_v28 = vadd.f32 %v3543_v20, %v3485_v47 }
0x11dd   :  { %v3588_v31 = vadd.f32 %v3544_v28, %v8542_v13 }
0x11df   :  { %v3595_v60 = vpack.c.bf16 %v3588_v31, %v3588_v31 }
0x11e1   :  { %v3616_v13 = vsel %vm305_vm2, %v3595_v60, 0 }
0x11e2   :  { %v3545_v33 = vpop.f32.mrf.mxu2 }
0x11ed   :  { %v3517_v24 = vpop.f32.mrf.mxu0  ;;  %v3530_v4 = vpop.f32.mrf.mxu1 }
0x11ee   :  { %v3518_v0 = vadd.f32 %v3517_v24, %v3485_v47  ;;  %v3531_v56 = vadd.f32 %v3530_v4, %v3485_v47 }
0x11f0   :  { %v3586_v16 = vadd.f32 %v3518_v0, %v8512_v27  ;;  %v3587_v36 = vadd.f32 %v3531_v56, %v8508_v54 }
0x11f2   :  { %v3593_v39 = vpack.c.bf16 %v3586_v16, %v3586_v16  ;;  %v3594_v42 = vpack.c.bf16 %v3587_v36, %v3587_v36 }
0x11f4   :  { %v3610_v41 = vsel %vm305_vm2, %v3593_v39, 0  ;;  %v3613_v43 = vsel %vm305_vm2, %v3594_v42, 0 }
0x11f5   :  { %v3519_v34 = vpop.f32.mrf.mxu0  ;;  %v3532_v35 = vpop.f32.mrf.mxu1  ;;  %3634 = vmatpush.bf16.msrb.mxu2 %v3610_v41  ;;  %3647 = vmatpush.bf16.msrb.mxu3 %v3613_v43 }
0x11f8   :  { %3937 = vmatmul.msk.bf16.vlgmr.msrb.gmra.mxu2 %vm3605_vm5, %v3592_v1  ;;  %3938 = vmatmul.msk.bf16.vlgmr.msrb.gmra.mxu3 %vm3605_vm5, %v3592_v1 }
0x11f9   :  { %3660 = vmatpush.bf16.msra.mxu2 %v3616_v13 }
0x11fd   :  { %v3556_v54 = vpop.f32.mrf.mxu3 }
0x11fe   :  { %v3557_v27 = vadd.f32 %v3556_v54, %v3485_v47 }
0x1200   :  { %v3589_v25 = vadd.f32 %v3557_v27, %v8569_v2 }
0x1202   :  { %v3596_v51 = vpack.c.bf16 %v3589_v25, %v3589_v25 }
0x1204   :  { %v3619_v52 = vsel %vm305_vm2, %v3596_v51, 0 }
0x1205   :  { %v3558_v9 = vpop.f32.mrf.mxu3  ;;  %3673 = vmatpush.bf16.msra.mxu3 %v3619_v52 }
0x1208   :  { %3939 = vmatmul.msk.bf16.vlgmr.msra.gmra.mxu2 %vm3605_vm5, %v3592_v1  ;;  %3940 = vmatmul.msk.bf16.vlgmr.msra.gmra.mxu3 %vm3605_vm5, %v3592_v1 }
0x120a   :  { %v3569_v15 = vpop.f32.mrf.mxu0  ;;  %v3582_v32 = vpop.f32.mrf.mxu1 }
0x120b   :  { %v3570_v30 = vadd.f32 %v3569_v15, %v3485_v47  ;;  %v3583_v3 = vadd.f32 %v3582_v32, %v3485_v47 }
0x120d   :  { %v3590_v19 = vadd.f32 %v3570_v30, %v8572_v37  ;;  %v3591_v49 = vadd.f32 %v3583_v3, %v8550_v6 }
0x120f   :  { %v3597_v53 = vpack.c.bf16 %v3590_v19, %v3590_v19  ;;  %v3598_v5 = vpack.c.bf16 %v3591_v49, %v3591_v49 }
0x1211   :  { %v3622_v2 = vsel %vm305_vm2, %v3597_v53, 0  ;;  %v3625_v62 = vsel %vm305_vm2, %v3598_v5, 0 }
0x1212   :  { %v3571_v8 = vpop.f32.mrf.mxu0  ;;  %v3584_v63 = vpop.f32.mrf.mxu1  ;;  %3686 = vmatpush.bf16.msra.mxu0 %v3622_v2  ;;  %3699 = vmatpush.bf16.msra.mxu1 %v3625_v62 }
0x1215   :  { %3941 = vmatmul.msk.bf16.vlgmr.msra.gmra.mxu0 %vm3605_vm5, %v3592_v1  ;;  %3942 = vmatmul.msk.bf16.vlgmr.msra.gmra.mxu1 %vm3605_vm5, %v3592_v1 }
0x127b   :  { %v3636_v12 = vpop.f32.mrf.mxu2  ;;  %v3649_v18 = vpop.f32.mrf.mxu3 }
0x127c   :  { %v3637_v37 = vadd.f32 %v3636_v12, %v3603_v55  ;;  %v3650_v44 = vadd.f32 %v3649_v18, %v3603_v55 }
0x127e   :  { %v3943_v6 = vmul.f32 -1.442695, %v3637_v37  ;;  %v3944_v14 = vmul.f32 -1.442695, %v3650_v44 }
0x1280   :  { %5250 = vpow2.f32 %v3943_v6 }
0x1281   :  { %5252 = vpow2.f32 %v3944_v14 }
0x1283   :  { %v3638_v57 = vpop.f32.mrf.mxu2  ;;  %v3651_v61 = vpop.f32.mrf.mxu3 }
0x1286   :  { %v5251_v26 = vpop.eup %5250 }
0x1287   :  { %v5253_v10 = vpop.eup %5252  ;;  %v3723_v50 = vadd.f32 1.0, %v5251_v26 }
0x1288   :  { %v3724_v38 = vadd.f32 1.0, %v5253_v10 }
0x1289   :  { %5254 = vrcp.f32 %v3723_v50  ;;  %v3738_v59 = vand.u32 2147483647, %v3723_v50  ;;  %v3740_v33 = vand.u32 2147483648, %v3723_v50  ;;  %vm3734_vm7 = vweird.f32 %v3723_v50 }
0x128a   :  { %5256 = vrcp.f32 %v3724_v38  ;;  %v3753_v56 = vand.u32 2147483647, %v3724_v38  ;;  %v3755_v16 = vand.u32 2147483648, %v3724_v38  ;;  %vm3749_vm10 = vweird.f32 %v3724_v38 }
0x128b   :  { %v3662_v22 = vpop.f32.mrf.mxu2  ;;  %v3675_v7 = vpop.f32.mrf.mxu3  ;;  %vm3739_vm8 = vcmp.eq.f32.partialorder %v3738_v59, 8.507059e+37  ;;  %v3741_v34 = vor.u32 1.1754944e-38, %v3740_v33 }
0x128c   :  { %v3663_v40 = vadd.f32 %v3662_v22, %v3603_v55  ;;  %v3676_v23 = vadd.f32 %v3675_v7, %v3603_v55  ;;  %v3756_v54 = vor.u32 1.1754944e-38, %v3755_v16  ;;  %vm3754_vm9 = vcmp.eq.f32.partialorder %v3753_v56, 8.507059e+37 }
0x128e   :  { %v3945_v29 = vmul.f32 -1.442695, %v3663_v40  ;;  %v3946_v48 = vmul.f32 -1.442695, %v3676_v23 }
0x128f   :  { %v5255_v17 = vpop.eup %5254 }
0x1290   :  { %v5257_v11 = vpop.eup %5256  ;;  %v3730_v58 = vmul.f32 %v5255_v17, %v3723_v50  ;;  %5258 = vpow2.f32 %v3945_v29  ;;  %vm3735_vm2 = vweird.f32 %v5255_v17 }
0x1291   :  { %v3745_v45 = vmul.f32 %v5257_v11, %v3724_v38  ;;  %5260 = vpow2.f32 %v3946_v48  ;;  %vm3750_vm6 = vweird.f32 %v5257_v11  ;;  %vm3736_vm14 = vmor %vm3734_vm7, %vm3735_vm2 }
0x1292   :  { %v3731_v21 = vsub.f32 1.0, %v3730_v58  ;;  %v3688_v46 = vpop.f32.mrf.mxu0  ;;  %v3701_v20 = vpop.f32.mrf.mxu1  ;;  %vm3751_vm15 = vmor %vm3749_vm10, %vm3750_vm6 }
0x1293   :  { %v3746_v47 = vsub.f32 1.0, %v3745_v45  ;;  %v3689_v28 = vadd.f32 %v3688_v46, %v3603_v55  ;;  %v3702_v31 = vadd.f32 %v3701_v20, %v3603_v55  ;;  %v3664_v24 = vpop.f32.mrf.mxu2  ;;  %v3677_v4 = vpop.f32.mrf.mxu3 }
0x1294   :  { %v3732_v0 = vmul.f32 %v5255_v17, %v3731_v21 }
0x1295   :  { %v3747_v36 = vmul.f32 %v5257_v11, %v3746_v47  ;;  %v3947_v60 = vmul.f32 -1.442695, %v3689_v28  ;;  %v3948_v39 = vmul.f32 -1.442695, %v3702_v31 }
0x1296   :  { %v5259_v42 = vpop.eup %5258  ;;  %v3733_v41 = vadd.f32 %v5255_v17, %v3732_v0 }
0x1297   :  { %v5261_v43 = vpop.eup %5260  ;;  %v3748_v35 = vadd.f32 %v5257_v11, %v3747_v36  ;;  %v3725_v13 = vadd.f32 1.0, %v5259_v42  ;;  %5262 = vpow2.f32 %v3947_v60 }
0x1298   :  { %v3737_v1 = vsel %vm3736_vm14, %v5255_v17, %v3733_v41  ;;  %v3726_v27 = vadd.f32 1.0, %v5261_v43  ;;  %5264 = vpow2.f32 %v3948_v39 }
0x1299   :  { %v3742_v25 = vsel %vm3739_vm8, %v3741_v34, %v3737_v1  ;;  %v3752_v51 = vsel %vm3751_vm15, %v5257_v11, %v3748_v35  ;;  %5266 = vrcp.f32 %v3725_v13  ;;  %v3768_v8 = vand.u32 2147483647, %v3725_v13 }
0x129a   :  { %3819 = vst [vmem:[#allocation7] sm:$0xff] %v3742_v25  ;;  %v3757_v52 = vsel %vm3754_vm9, %v3756_v54, %v3752_v51  ;;  %5268 = vrcp.f32 %v3726_v27  ;;  %v3690_v9 = vpop.f32.mrf.mxu0  ;;  %v3703_v15 = vpop.f32.mrf.mxu1  ;;  %v3770_v63 = vand.u32 2147483648, %v3725_v13  ;;  %v3783_v18 = vand.u32 2147483647, %v3726_v27 }
0x129b   :  { %3820 = vst [vmem:[#allocation7 + $0x8] sm:$0xff] %v3757_v52  ;;  %v3785_v37 = vand.u32 2147483648, %v3726_v27  ;;  %vm3764_vm12 = vweird.f32 %v3725_v13  ;;  %vm3779_vm13 = vweird.f32 %v3726_v27  ;;  %vm3769_vm3 = vcmp.eq.f32.partialorder %v3768_v8, 8.507059e+37 }
0x129c   :  { %v3771_v57 = vor.u32 1.1754944e-38, %v3770_v63  ;;  %vm3784_vm5 = vcmp.eq.f32.partialorder %v3783_v18, 8.507059e+37 }
0x129d   :  { %v5263_v32 = vpop.eup %5262  ;;  %v3786_v38 = vor.u32 1.1754944e-38, %v3785_v37 }
0x129e   :  { %v5265_v30 = vpop.eup %5264  ;;  %v3727_v3 = vadd.f32 1.0, %v5263_v32 }
0x129f   :  { %v5267_v19 = vpop.eup %5266  ;;  %v9300_v49 = vadd.f32 1.0, %v5265_v30 }
0x12a0   :  { %v5269_v53 = vpop.eup %5268  ;;  %v3760_v5 = vmul.f32 %v5267_v19, %v3725_v13  ;;  %5270 = vrcp.f32 %v3727_v3  ;;  %vm3765_vm11 = vweird.f32 %v5267_v19  ;;  %v3800_v48 = vand.u32 2147483648, %v3727_v3 }
0x12a1   :  { %v3775_v2 = vmul.f32 %v5269_v53, %v3726_v27  ;;  %5272 = vrcp.f32 %v9300_v49  ;;  %vm3780_vm0 = vweird.f32 %v5269_v53  ;;  %vm3766_vm1 = vmor %vm3764_vm12, %vm3765_vm11  ;;  %v3798_v11 = vand.u32 2147483647, %v3727_v3 }
0x12a2   :  { %v3761_v62 = vsub.f32 1.0, %v3760_v5  ;;  %vm3781_vm4 = vmor %vm3779_vm13, %vm3780_vm0  ;;  %vm3794_vm6 = vweird.f32 %v3727_v3  ;;  %v3815_v45 = vand.u32 2147483648, %v9300_v49  ;;  %v3813_v46 = vand.u32 2147483647, %v9300_v49 }
0x12a3   :  { %v3776_v55 = vsub.f32 1.0, %v3775_v2  ;;  %v3801_v20 = vor.u32 1.1754944e-38, %v3800_v48  ;;  %vm3799_vm10 = vcmp.eq.f32.partialorder %v3798_v11, 8.507059e+37  ;;  %vm3809_vm14 = vweird.f32 %v9300_v49 }
0x12a4   :  { %v3762_v12 = vmul.f32 %v5267_v19, %v3761_v62  ;;  %v3816_v31 = vor.u32 1.1754944e-38, %v3815_v45  ;;  %vm3814_vm9 = vcmp.eq.f32.partialorder %v3813_v46, 8.507059e+37 }
0x12a5   :  { %v3777_v44 = vmul.f32 %v5269_v53, %v3776_v55 }
0x12a6   :  { %v5271_v6 = vpop.eup %5270  ;;  %v3763_v14 = vadd.f32 %v5267_v19, %v3762_v12 }
0x12a7   :  { %v3778_v61 = vadd.f32 %v5269_v53, %v3777_v44  ;;  %v3790_v26 = vmul.f32 %v5271_v6, %v3727_v3  ;;  %v5273_v10 = vpop.eup %5272  ;;  %vm3795_vm2 = vweird.f32 %v5271_v6 }
0x12a8   :  { %v3767_v50 = vsel %vm3766_vm1, %v5267_v19, %v3763_v14  ;;  %v3805_v23 = vmul.f32 %v5273_v10, %v9300_v49  ;;  %vm3810_vm7 = vweird.f32 %v5273_v10  ;;  %vm3796_vm8 = vmor %vm3794_vm6, %vm3795_vm2 }
0x12a9   :  { %v3772_v22 = vsel %vm3769_vm3, %v3771_v57, %v3767_v50  ;;  %v3782_v7 = vsel %vm3781_vm4, %v5269_v53, %v3778_v61  ;;  %v3791_v40 = vsub.f32 1.0, %v3790_v26  ;;  %vm3811_vm15 = vmor %vm3809_vm14, %vm3810_vm7 }
0x12aa   :  { %3821 = vst [vmem:[#allocation7 + $0x10] sm:$0xff] %v3772_v22  ;;  %v3787_v29 = vsel %vm3784_vm5, %v3786_v38, %v3782_v7  ;;  %v3806_v58 = vsub.f32 1.0, %v3805_v23 }
0x12ab   :  { %3822 = vst [vmem:[#allocation7 + $0x18] sm:$0xff] %v3787_v29  ;;  %v3792_v17 = vmul.f32 %v5271_v6, %v3791_v40 }
0x12ac   :  { %v3807_v59 = vmul.f32 %v5273_v10, %v3806_v58 }
0x12ad   :  { %v3793_v21 = vadd.f32 %v5271_v6, %v3792_v17 }
0x12ae   :  { %v3808_v47 = vadd.f32 %v5273_v10, %v3807_v59 }
0x12af   :  { %v3797_v33 = vsel %vm3796_vm8, %v5271_v6, %v3793_v21 }
0x12b0   :  { %v3802_v28 = vsel %vm3799_vm10, %v3801_v20, %v3797_v33  ;;  %v3812_v24 = vsel %vm3811_vm15, %v5273_v10, %v3808_v47 }
0x12b1   :  { %3823 = vst [vmem:[#allocation7 + $0x20] sm:$0xff] %v3802_v28  ;;  %v3817_v4 = vsel %vm3814_vm9, %v3816_v31, %v3812_v24 }
0x12b2   :  { %3824 = vst [vmem:[#allocation7 + $0x28] sm:$0xff] %v3817_v4 }
0x12b3   :  { %3835 = dma.vmem_to_hbm [thread:$0]  %s3831_s14, 768, %s3833_s17, [#allocation4]  }
0x12b4   :  { %5356 = dma.done.wait [#allocation4], 768  }
0x12b5   :  { %5357 = vsyncadd [#allocation4], 4294966528 }
0x12b6   :  { %3840 = vsyncpa [#allocation3], 1 }
0x12b7   :  { %3841 = vsyncpa [#allocation6], 1 }
0x12b8   :  { %3842 = vsyncpa [#allocation4], 1 }

</bundles_post_ra>
